<compile_context>
chip_gen: v7x
topology: tpu7x:2x2x1
jax: 0.10.0
libtpu: 0.0.40
codegen_flags: <defaults>
</compile_context>

<pallas_src>
import jax
import jax.numpy as jnp
from jax.experimental import pallas as pl
from jax.experimental.pallas import tpu as pltpu

EPS = 1e-5      # torch BatchNorm2d default eps
KS = 2          # kernel_size == stride == 2 -> non-overlapping 2x2 patches
LANE_PAD = 128  # pad first conv's contraction dim (C*k*k = 12) to a full lane tile


# ---------------------------------------------------------------------------
# Model configuration helpers (mirror FusionAE.__init__)
# ---------------------------------------------------------------------------
def calculate_channel_sizes(image_channels, max_filters, num_layers):
    sizes = [(image_channels, max_filters // (2 ** (num_layers - 1)))]
    for _ in range(1, num_layers):
        prev = sizes[-1][-1]
        sizes.append((prev, prev * 2))
    return sizes


# ---------------------------------------------------------------------------
# Host-side layout glue (only at the NCHW <-> kernel-slab boundary)
# ---------------------------------------------------------------------------
def input_to_patch_slab(x_nchw, num_layers):
    """NCHW image -> Morton-ordered patch slab for the first conv layer.

    Rows are ordered (g_1, g_2, ..., g_{L-1}, cell_i, cell_j, n) where g_k is the 2x2
    sub-position introduced at conv level k; columns are (ki, kj, c) of the first 2x2
    patch.  With this row order every later space-to-depth inside the kernel is simply
    "the four contiguous row-quarter blocks" (pure slicing, no transposes).
    """
    N, C, H, W = x_nchw.shape
    L = num_layers
    So = H >> L
    x = x_nchw.reshape((N, C, So) + (2,) * L + (So,) + (2,) * L)
    # dims: 0:n 1:c 2:cell_i 3..2+L: g_{L-1}i..g_0i  3+L: cell_j  4+L..3+2L: g_{L-1}j..g_0j
    perm = []
    for k in range(1, L):
        perm += [2 + L - k, 3 + 2 * L - k]            # g_k i, g_k j   (k = 1 .. L-1)
    perm += [2, 3 + L, 0, 2 + L, 3 + 2 * L, 1]        # cell_i, cell_j, n, g_0 i, g_0 j, c
    p = x.transpose(perm).reshape((4 ** (L - 1)) * So * So * N, 4 * C)
    if p.shape[1] < LANE_PAD:
        p = jnp.pad(p, ((0, 0), (0, LANE_PAD - p.shape[1])))
    return p


def output_slab_to_nchw(slab, num_layers, N, C, S):
    """Inverse layout transform for the decoder output slab (rows Morton-ordered)."""
    L = num_layers
    So = S >> L
    y = slab.reshape((2, 2) * L + (So, So, N, C))
    perm = ([2 * L + 2, 2 * L + 3, 2 * L]
            + [2 * k for k in range(L - 1, -1, -1)]
            + [2 * L + 1]
            + [2 * k + 1 for k in range(L - 1, -1, -1)])
    return y.transpose(perm).reshape(N, C, S, S)


# ---------------------------------------------------------------------------
# Parameter construction (deterministic; layouts matched to the kernel)
# ---------------------------------------------------------------------------
def init_params(key, cfg):
    L = cfg["num_layers"]
    sizes = calculate_channel_sizes(cfg["image_channels"], cfg["max_filters"], L)
    S = cfg["input_image_dimensions"]
    So = S // (2 ** L)
    hidden = cfg["max_filters"] * So * So
    latent = cfg["latent_dim"]

    keys = list(jax.random.split(key, 2 * L + 4))
    ki = iter(range(2 * L + 4))

    # Encoder Conv2d(k=2, s=2, bias=False): (co, ci, k, k) -> (k*k*ci, co), rows (ki,kj,ci).
    enc = []
    for li, (ci, co) in enumerate(sizes):
        w = jax.random.normal(keys[next(ki)], (co, ci, KS, KS), jnp.float32) / jnp.sqrt(ci * KS * KS)
        w2d = jnp.transpose(w, (2, 3, 1, 0)).reshape(KS * KS * ci, co)
        if li == 0 and w2d.shape[0] < LANE_PAD:
            w2d = jnp.pad(w2d, ((0, LANE_PAD - w2d.shape[0]), (0, 0)))
        enc.append((w2d,
                    jnp.ones((1, co), jnp.float32),        # BatchNorm gamma
                    jnp.zeros((1, co), jnp.float32)))      # BatchNorm beta

    # Encoder Linear(hidden -> latent): rows ordered (cell, channel) to match the kernel's
    # flatten order (equivalent to torch up to a fixed permutation of the random weight).
    wfe = jax.random.normal(keys[next(ki)], (hidden, latent), jnp.float32) / jnp.sqrt(hidden)
    bfe = jax.random.normal(keys[next(ki)], (1, latent), jnp.float32) * 0.01

    # Decoder Linear(latent -> hidden): columns ordered (cell, channel).
    wfd = jax.random.normal(keys[next(ki)], (latent, hidden), jnp.float32) / jnp.sqrt(latent)
    bfd = jax.random.normal(keys[next(ki)], (1, hidden), jnp.float32) * 0.01

    # Decoder ConvTranspose2d(k=2, s=2, bias=False): (ci, co, k, k) -> (ci, k*k*co),
    # columns ordered (ki, kj, co).
    dec = []
    for (enc_in, enc_out) in sizes[::-1]:
        ci, co = enc_out, enc_in
        w = jax.random.normal(keys[next(ki)], (ci, co, KS, KS), jnp.float32) / jnp.sqrt(ci)
        w2d = jnp.transpose(w, (0, 2, 3, 1)).reshape(ci, KS * KS * co)
        dec.append((w2d,
                    jnp.ones((1, co), jnp.float32),
                    jnp.zeros((1, co), jnp.float32)))

    return dict(enc=enc, wfe=wfe, bfe=bfe, wfd=wfd, bfd=bfd, dec=dec,
                sizes=sizes, So=So, hidden=hidden)


# ---------------------------------------------------------------------------
# The fused kernel
# ---------------------------------------------------------------------------
def _make_fusion_kernel(num_layers, cells):
    L = num_layers

    def _bn(y, g_ref, b_ref):
        # training-mode BatchNorm: biased batch statistics over rows (= N*H*W)
        mean = jnp.mean(y, axis=0, keepdims=True)
        var = jnp.mean(jnp.square(y - mean), axis=0, keepdims=True)
        return (y - mean) * (jax.lax.rsqrt(var + EPS) * g_ref[...]) + b_ref[...]

    def kernel(*refs):
        pos = 0
        p_a, p_b = refs[pos], refs[pos + 1]
        pos += 2
        enc = [refs[pos + 3 * l: pos + 3 * (l + 1)] for l in range(L)]
        pos += 3 * L
        wfe, bfe, wfd, bfd = refs[pos: pos + 4]
        pos += 4
        dec = [refs[pos + 3 * l: pos + 3 * (l + 1)] for l in range(L)]
        pos += 3 * L
        out_ref = refs[pos]
        pos += 1
        enc_scr = refs[pos: pos + L]
        dec_scr = refs[pos + L: pos + 2 * L]

        # ----------------------- encoder (unrolled twice, shared weights) ------------
        def encode(p_ref):
            # layer 0: patch slab (Morton row order, K padded to 128) built on the host
            w, g, b = enc[0]
            y = jnp.dot(p_ref[...], w[...], preferred_element_type=jnp.float32)
            enc_scr[0][...] = jnp.maximum(_bn(y, g, b), 0.0)
            # layers 1..L-1: space-to-depth fused into the matmul -- the 2x2 patch of
            # layer l is the four contiguous row-quarter blocks of layer l-1's output,
            # so Conv2d(k=2,s=2) == sum of 4 row-block matmuls on the MXU.
            for l in range(1, L):
                w, g, b = enc[l]
                src = enc_scr[l - 1]
                m = src.shape[0] // 4
                c = src.shape[1]
                y = jnp.dot(src[0:m, :], w[0:c, :], preferred_element_type=jnp.float32)
                for q in range(1, 4):
                    y = y + jnp.dot(src[q * m:(q + 1) * m, :], w[q * c:(q + 1) * c, :],
                                    preferred_element_type=jnp.float32)
                enc_scr[l][...] = jnp.maximum(_bn(y, g, b), 0.0)
            # Flatten + Linear + Sigmoid (flatten fused into the matmul the same way)
            src = enc_scr[L - 1]
            n = src.shape[0] // cells
            c = src.shape[1]
            z = jnp.dot(src[0:n, :], wfe[0:c, :], preferred_element_type=jnp.float32)
            for s in range(1, cells):
                z = z + jnp.dot(src[s * n:(s + 1) * n, :], wfe[s * c:(s + 1) * c, :],
                                preferred_element_type=jnp.float32)
            return jax.nn.sigmoid(z + bfe[...])

        hidden = 0.4 * (encode(p_a) + encode(p_b))          # latent fusion in-register

        # ----------------------- decoder ---------------------------------------------
        # Linear + Sigmoid + Unflatten: each spatial cell is one column block of the FC
        # weight; its activations become one row block of the first decoder feature map.
        nb = hidden.shape[0]
        cmax = wfd.shape[1] // cells
        for s in range(cells):
            zs = (jnp.dot(hidden, wfd[:, s * cmax:(s + 1) * cmax],
                          preferred_element_type=jnp.float32)
                  + bfd[:, s * cmax:(s + 1) * cmax])
            dec_scr[0][s * nb:(s + 1) * nb, :] = jax.nn.sigmoid(zs)

        # ConvTranspose(k=2,s=2) + BatchNorm + (ReLU | Sigmoid), fused.  y = x @ W gives
        # the four 2x2 output sub-positions as four column blocks; BN stats are reduced
        # over rows and over the four blocks, then each block is written back as a row
        # block (depth-to-space).  The last layer writes straight into the output ref.
        for l in range(L):
            w, g, b = dec[l]
            x = dec_scr[l][...]
            m = x.shape[0]
            co = w.shape[1] // 4
            ys = [jnp.dot(x, w[:, q * co:(q + 1) * co], preferred_element_type=jnp.float32)
                  for q in range(4)]
            cnt = 4.0 * m
            mean = (jnp.sum(ys[0], axis=0, keepdims=True)
                    + jnp.sum(ys[1], axis=0, keepdims=True)
                    + jnp.sum(ys[2], axis=0, keepdims=True)
                    + jnp.sum(ys[3], axis=0, keepdims=True)) / cnt
            var = (jnp.sum(jnp.square(ys[0] - mean), axis=0, keepdims=True)
                   + jnp.sum(jnp.square(ys[1] - mean), axis=0, keepdims=True)
                   + jnp.sum(jnp.square(ys[2] - mean), axis=0, keepdims=True)
                   + jnp.sum(jnp.square(ys[3] - mean), axis=0, keepdims=True)) / cnt
            scale = jax.lax.rsqrt(var + EPS) * g[...]
            shift = b[...] - mean * scale
            dst = out_ref if l == L - 1 else dec_scr[l + 1]
            for q in range(4):
                z = ys[q] * scale + shift
                z = jax.nn.sigmoid(z) if l == L - 1 else jnp.maximum(z, 0.0)
                dst[q * m:(q + 1) * m, :] = z.astype(dst.dtype)

    return kernel


# ---------------------------------------------------------------------------
# Forward pass wrapper
# ---------------------------------------------------------------------------
def fusion_ae_forward(x1, x2, params, cfg):
    N, C, S, _ = x1.shape
    L = cfg["num_layers"]
    So = params["So"]
    cells = So * So
    sizes = params["sizes"]

    p_a = input_to_patch_slab(x1, L)
    p_b = input_to_patch_slab(x2, L)

    args = [p_a, p_b]
    for t in params["enc"]:
        args += list(t)
    args += [params["wfe"], params["bfe"], params["wfd"], params["bfd"]]
    for t in params["dec"]:
        args += list(t)

    # VMEM scratch: per-layer encoder activations (shared by both encoder passes) and the
    # assembled depth-to-space activations of the decoder.  Total << 1 MiB.
    enc_scr = [pltpu.VMEM((N * (S >> (l + 1)) ** 2, sizes[l][1]), jnp.float32)
               for l in range(L)]
    dec_cos = [sizes[::-1][l][0] for l in range(L)]          # decoder out-channels per layer
    dec_scr = [pltpu.VMEM((N * cells, cfg["max_filters"]), jnp.float32)]
    dec_scr += [pltpu.VMEM((N * cells * (4 ** l), dec_cos[l - 1]), jnp.float32)
                for l in range(1, L)]

    # Single grid-less call: at this problem size everything is VMEM-resident, so one
    # TensorCore invocation is the whole forward (no megacore grid needed / wanted here,
    # since BatchNorm batch statistics couple all rows of every layer).
    slab = pl.pallas_call(
        _make_fusion_kernel(L, cells),
        out_shape=jax.ShapeDtypeStruct((N * S * S, C), jnp.float32),
        in_specs=[pl.BlockSpec(memory_space=pltpu.MemorySpace.VMEM) for _ in args],
        out_specs=pl.BlockSpec(memory_space=pltpu.MemorySpace.VMEM),
        scratch_shapes=enc_scr + dec_scr,
    )(*args)
    return output_slab_to_nchw(slab, L, N, C, S)


# ---------------------------------------------------------------------------
if __name__ == "__main__":
    cfg = dict(
        image_channels=3,
        max_filters=64,
        num_layers=3,
        kernel_size=2,
        stride=2,
        padding=0,
        latent_dim=32,
        input_image_dimensions=16,
    )

    key = jax.random.PRNGKey(0)
    kp, k1, k2 = jax.random.split(key, 3)
    params = init_params(kp, cfg)

    B = 2
    S = cfg["input_image_dimensions"]
    x1 = jax.random.uniform(k1, (B, cfg["image_channels"], S, S), jnp.float32)
    x2 = jax.random.uniform(k2, (B, cfg["image_channels"], S, S), jnp.float32)

    fwd = jax.jit(lambda a, b: fusion_ae_forward(a, b, params, cfg))
    out = jax.block_until_ready(fwd(x1, x2))

    assert out.shape == (B, cfg["image_channels"], S, S), out.shape
    assert bool(jnp.all(jnp.isfinite(out)))
    assert bool(jnp.all((out >= 0.0) & (out <= 1.0)))  # final Sigmoid range
    print("KERNEL_OK")
</pallas_src>

<mosaic_0001>
module attributes {stable_mosaic.version = 11 : i64} {
  func.func @kernel(%arg0: memref<128x128xf32, #tpu.memory_space<vmem>>, %arg1: memref<128x128xf32, #tpu.memory_space<vmem>>, %arg2: memref<128x16xf32, #tpu.memory_space<vmem>>, %arg3: memref<1x16xf32, #tpu.memory_space<vmem>>, %arg4: memref<1x16xf32, #tpu.memory_space<vmem>>, %arg5: memref<64x32xf32, #tpu.memory_space<vmem>>, %arg6: memref<1x32xf32, #tpu.memory_space<vmem>>, %arg7: memref<1x32xf32, #tpu.memory_space<vmem>>, %arg8: memref<128x64xf32, #tpu.memory_space<vmem>>, %arg9: memref<1x64xf32, #tpu.memory_space<vmem>>, %arg10: memref<1x64xf32, #tpu.memory_space<vmem>>, %arg11: memref<256x32xf32, #tpu.memory_space<vmem>>, %arg12: memref<1x32xf32, #tpu.memory_space<vmem>>, %arg13: memref<32x256xf32, #tpu.memory_space<vmem>>, %arg14: memref<1x256xf32, #tpu.memory_space<vmem>>, %arg15: memref<64x128xf32, #tpu.memory_space<vmem>>, %arg16: memref<1x32xf32, #tpu.memory_space<vmem>>, %arg17: memref<1x32xf32, #tpu.memory_space<vmem>>, %arg18: memref<32x64xf32, #tpu.memory_space<vmem>>, %arg19: memref<1x16xf32, #tpu.memory_space<vmem>>, %arg20: memref<1x16xf32, #tpu.memory_space<vmem>>, %arg21: memref<16x12xf32, #tpu.memory_space<vmem>>, %arg22: memref<1x3xf32, #tpu.memory_space<vmem>>, %arg23: memref<1x3xf32, #tpu.memory_space<vmem>>, %arg24: memref<512x3xf32, #tpu.memory_space<vmem>>, %arg25: memref<128x16xf32, #tpu.memory_space<vmem>>, %arg26: memref<32x32xf32, #tpu.memory_space<vmem>>, %arg27: memref<8x64xf32, #tpu.memory_space<vmem>>, %arg28: memref<8x64xf32, #tpu.memory_space<vmem>>, %arg29: memref<32x32xf32, #tpu.memory_space<vmem>>, %arg30: memref<128x16xf32, #tpu.memory_space<vmem>>) attributes {dimension_semantics = [], scalar_prefetch = 0 : i64, scratch_operands = 6 : i64, tpu.core_type = #tpu.core_type<tc>} {
    %c0 = arith.constant 0 : index
    %c0_0 = arith.constant 0 : index
    %0 = vector.load %arg0[%c0, %c0_0] : memref<128x128xf32, #tpu.memory_space<vmem>>, vector<128x128xf32>
    %c0_1 = arith.constant 0 : index
    %c0_2 = arith.constant 0 : index
    %1 = vector.load %arg2[%c0_1, %c0_2] : memref<128x16xf32, #tpu.memory_space<vmem>>, vector<128x16xf32>
    %cst = arith.constant dense<0.000000e+00> : vector<128x16xf32>
    %2 = tpu.matmul %0, %1, %cst {dimension_numbers = #tpu.dot_dimension_numbers<[1], [0], [0], [1], [0, 0, 1, 1], [], []>} : vector<128x128xf32>, vector<128x16xf32>, vector<128x16xf32> -> vector<128x16xf32>
    %cst_3 = arith.constant dense<0.000000e+00> : vector<16xf32>
    %3 = vector.multi_reduction <add>, %2, %cst_3 [0] : vector<128x16xf32> to vector<16xf32>
    %4 = vector.shape_cast %3 : vector<16xf32> to vector<1x16xf32>
    %cst_4 = arith.constant 1.280000e+02 : f32
    %5 = vector.broadcast %cst_4 : f32 to vector<1x16xf32>
    %6 = arith.divf %4, %5 : vector<1x16xf32>
    %7 = vector.broadcast %6 : vector<1x16xf32> to vector<128x16xf32>
    %8 = arith.subf %2, %7 : vector<128x16xf32>
    %9 = arith.mulf %8, %8 : vector<128x16xf32>
    %cst_5 = arith.constant dense<0.000000e+00> : vector<16xf32>
    %10 = vector.multi_reduction <add>, %9, %cst_5 [0] : vector<128x16xf32> to vector<16xf32>
    %11 = vector.shape_cast %10 : vector<16xf32> to vector<1x16xf32>
    %cst_6 = arith.constant 1.280000e+02 : f32
    %12 = vector.broadcast %cst_6 : f32 to vector<1x16xf32>
    %13 = arith.divf %11, %12 : vector<1x16xf32>
    %14 = vector.broadcast %6 : vector<1x16xf32> to vector<128x16xf32>
    %15 = arith.subf %2, %14 : vector<128x16xf32>
    %cst_7 = arith.constant 9.99999974E-6 : f32
    %16 = vector.broadcast %cst_7 : f32 to vector<1x16xf32>
    %17 = arith.addf %13, %16 : vector<1x16xf32>
    %18 = math.rsqrt %17 : vector<1x16xf32>
    %c0_8 = arith.constant 0 : index
    %c0_9 = arith.constant 0 : index
    %19 = vector.load %arg3[%c0_8, %c0_9] : memref<1x16xf32, #tpu.memory_space<vmem>>, vector<1x16xf32>
    %20 = arith.mulf %18, %19 : vector<1x16xf32>
    %21 = vector.broadcast %20 : vector<1x16xf32> to vector<128x16xf32>
    %22 = arith.mulf %15, %21 : vector<128x16xf32>
    %c0_10 = arith.constant 0 : index
    %c0_11 = arith.constant 0 : index
    %23 = vector.load %arg4[%c0_10, %c0_11] : memref<1x16xf32, #tpu.memory_space<vmem>>, vector<1x16xf32>
    %24 = vector.broadcast %23 : vector<1x16xf32> to vector<128x16xf32>
    %25 = arith.addf %22, %24 : vector<128x16xf32>
    %cst_12 = arith.constant 0.000000e+00 : f32
    %26 = vector.broadcast %cst_12 : f32 to vector<128x16xf32>
    %27 = arith.maximumf %25, %26 : vector<128x16xf32>
    %c0_13 = arith.constant 0 : index
    %c0_14 = arith.constant 0 : index
    %28 = vector.load %arg25[%c0_13, %c0_14] : memref<128x16xf32, #tpu.memory_space<vmem>>, vector<128x16xf32>
    tpu.vector_store %arg25[%c0_13, %c0_14], %27 {strides = array<i32>} : memref<128x16xf32, #tpu.memory_space<vmem>>, vector<128x16xf32>,
    %c0_15 = arith.constant 0 : index
    %c0_16 = arith.constant 0 : index
    %29 = vector.load %arg25[%c0_15, %c0_16] : memref<128x16xf32, #tpu.memory_space<vmem>>, vector<32x16xf32>
    %c0_17 = arith.constant 0 : index
    %c0_18 = arith.constant 0 : index
    %30 = vector.load %arg5[%c0_17, %c0_18] : memref<64x32xf32, #tpu.memory_space<vmem>>, vector<16x32xf32>
    %cst_19 = arith.constant dense<0.000000e+00> : vector<32x32xf32>
    %31 = tpu.matmul %29, %30, %cst_19 {dimension_numbers = #tpu.dot_dimension_numbers<[1], [0], [0], [1], [0, 0, 1, 1], [], []>} : vector<32x16xf32>, vector<16x32xf32>, vector<32x32xf32> -> vector<32x32xf32>
    %c32 = arith.constant 32 : index
    %c0_20 = arith.constant 0 : index
    %32 = vector.load %arg25[%c32, %c0_20] : memref<128x16xf32, #tpu.memory_space<vmem>>, vector<32x16xf32>
    %c16 = arith.constant 16 : index
    %c0_21 = arith.constant 0 : index
    %33 = vector.load %arg5[%c16, %c0_21] : memref<64x32xf32, #tpu.memory_space<vmem>>, vector<16x32xf32>
    %cst_22 = arith.constant dense<0.000000e+00> : vector<32x32xf32>
    %34 = tpu.matmul %32, %33, %cst_22 {dimension_numbers = #tpu.dot_dimension_numbers<[1], [0], [0], [1], [0, 0, 1, 1], [], []>} : vector<32x16xf32>, vector<16x32xf32>, vector<32x32xf32> -> vector<32x32xf32>
    %35 = arith.addf %31, %34 : vector<32x32xf32>
    %c64 = arith.constant 64 : index
    %c0_23 = arith.constant 0 : index
    %36 = vector.load %arg25[%c64, %c0_23] : memref<128x16xf32, #tpu.memory_space<vmem>>, vector<32x16xf32>
    %c32_24 = arith.constant 32 : index
    %c0_25 = arith.constant 0 : index
    %37 = vector.load %arg5[%c32_24, %c0_25] : memref<64x32xf32, #tpu.memory_space<vmem>>, vector<16x32xf32>
    %cst_26 = arith.constant dense<0.000000e+00> : vector<32x32xf32>
    %38 = tpu.matmul %36, %37, %cst_26 {dimension_numbers = #tpu.dot_dimension_numbers<[1], [0], [0], [1], [0, 0, 1, 1], [], []>} : vector<32x16xf32>, vector<16x32xf32>, vector<32x32xf32> -> vector<32x32xf32>
    %39 = arith.addf %35, %38 : vector<32x32xf32>
    %c96 = arith.constant 96 : index
    %c0_27 = arith.constant 0 : index
    %40 = vector.load %arg25[%c96, %c0_27] : memref<128x16xf32, #tpu.memory_space<vmem>>, vector<32x16xf32>
    %c48 = arith.constant 48 : index
    %c0_28 = arith.constant 0 : index
    %41 = vector.load %arg5[%c48, %c0_28] : memref<64x32xf32, #tpu.memory_space<vmem>>, vector<16x32xf32>
    %cst_29 = arith.constant dense<0.000000e+00> : vector<32x32xf32>
    %42 = tpu.matmul %40, %41, %cst_29 {dimension_numbers = #tpu.dot_dimension_numbers<[1], [0], [0], [1], [0, 0, 1, 1], [], []>} : vector<32x16xf32>, vector<16x32xf32>, vector<32x32xf32> -> vector<32x32xf32>
    %43 = arith.addf %39, %42 : vector<32x32xf32>
    %cst_30 = arith.constant dense<0.000000e+00> : vector<32xf32>
    %44 = vector.multi_reduction <add>, %43, %cst_30 [0] : vector<32x32xf32> to vector<32xf32>
    %45 = vector.shape_cast %44 : vector<32xf32> to vector<1x32xf32>
    %cst_31 = arith.constant 3.200000e+01 : f32
    %46 = vector.broadcast %cst_31 : f32 to vector<1x32xf32>
    %47 = arith.divf %45, %46 : vector<1x32xf32>
    %48 = vector.broadcast %47 : vector<1x32xf32> to vector<32x32xf32>
    %49 = arith.subf %43, %48 : vector<32x32xf32>
    %50 = arith.mulf %49, %49 : vector<32x32xf32>
    %cst_32 = arith.constant dense<0.000000e+00> : vector<32xf32>
    %51 = vector.multi_reduction <add>, %50, %cst_32 [0] : vector<32x32xf32> to vector<32xf32>
    %52 = vector.shape_cast %51 : vector<32xf32> to vector<1x32xf32>
    %cst_33 = arith.constant 3.200000e+01 : f32
    %53 = vector.broadcast %cst_33 : f32 to vector<1x32xf32>
    %54 = arith.divf %52, %53 : vector<1x32xf32>
    %55 = vector.broadcast %47 : vector<1x32xf32> to vector<32x32xf32>
    %56 = arith.subf %43, %55 : vector<32x32xf32>
    %cst_34 = arith.constant 9.99999974E-6 : f32
    %57 = vector.broadcast %cst_34 : f32 to vector<1x32xf32>
    %58 = arith.addf %54, %57 : vector<1x32xf32>
    %59 = math.rsqrt %58 : vector<1x32xf32>
    %c0_35 = arith.constant 0 : index
    %c0_36 = arith.constant 0 : index
    %60 = vector.load %arg6[%c0_35, %c0_36] : memref<1x32xf32, #tpu.memory_space<vmem>>, vector<1x32xf32>
    %61 = arith.mulf %59, %60 : vector<1x32xf32>
    %62 = vector.broadcast %61 : vector<1x32xf32> to vector<32x32xf32>
    %63 = arith.mulf %56, %62 : vector<32x32xf32>
    %c0_37 = arith.constant 0 : index
    %c0_38 = arith.constant 0 : index
    %64 = vector.load %arg7[%c0_37, %c0_38] : memref<1x32xf32, #tpu.memory_space<vmem>>, vector<1x32xf32>
    %65 = vector.broadcast %64 : vector<1x32xf32> to vector<32x32xf32>
    %66 = arith.addf %63, %65 : vector<32x32xf32>
    %cst_39 = arith.constant 0.000000e+00 : f32
    %67 = vector.broadcast %cst_39 : f32 to vector<32x32xf32>
    %68 = arith.maximumf %66, %67 : vector<32x32xf32>
    %c0_40 = arith.constant 0 : index
    %c0_41 = arith.constant 0 : index
    %69 = vector.load %arg26[%c0_40, %c0_41] : memref<32x32xf32, #tpu.memory_space<vmem>>, vector<32x32xf32>
    tpu.vector_store %arg26[%c0_40, %c0_41], %68 {strides = array<i32>} : memref<32x32xf32, #tpu.memory_space<vmem>>, vector<32x32xf32>,
    %c0_42 = arith.constant 0 : index
    %c0_43 = arith.constant 0 : index
    %70 = vector.load %arg26[%c0_42, %c0_43] : memref<32x32xf32, #tpu.memory_space<vmem>>, vector<8x32xf32>
    %c0_44 = arith.constant 0 : index
    %c0_45 = arith.constant 0 : index
    %71 = vector.load %arg8[%c0_44, %c0_45] : memref<128x64xf32, #tpu.memory_space<vmem>>, vector<32x64xf32>
    %cst_46 = arith.constant dense<0.000000e+00> : vector<8x64xf32>
    %72 = tpu.matmul %70, %71, %cst_46 {dimension_numbers = #tpu.dot_dimension_numbers<[1], [0], [0], [1], [0, 0, 1, 1], [], []>} : vector<8x32xf32>, vector<32x64xf32>, vector<8x64xf32> -> vector<8x64xf32>
    %c8 = arith.constant 8 : index
    %c0_47 = arith.constant 0 : index
    %73 = vector.load %arg26[%c8, %c0_47] : memref<32x32xf32, #tpu.memory_space<vmem>>, vector<8x32xf32>
    %c32_48 = arith.constant 32 : index
    %c0_49 = arith.constant 0 : index
    %74 = vector.load %arg8[%c32_48, %c0_49] : memref<128x64xf32, #tpu.memory_space<vmem>>, vector<32x64xf32>
    %cst_50 = arith.constant dense<0.000000e+00> : vector<8x64xf32>
    %75 = tpu.matmul %73, %74, %cst_50 {dimension_numbers = #tpu.dot_dimension_numbers<[1], [0], [0], [1], [0, 0, 1, 1], [], []>} : vector<8x32xf32>, vector<32x64xf32>, vector<8x64xf32> -> vector<8x64xf32>
    %76 = arith.addf %72, %75 : vector<8x64xf32>
    %c16_51 = arith.constant 16 : index
    %c0_52 = arith.constant 0 : index
    %77 = vector.load %arg26[%c16_51, %c0_52] : memref<32x32xf32, #tpu.memory_space<vmem>>, vector<8x32xf32>
    %c64_53 = arith.constant 64 : index
    %c0_54 = arith.constant 0 : index
    %78 = vector.load %arg8[%c64_53, %c0_54] : memref<128x64xf32, #tpu.memory_space<vmem>>, vector<32x64xf32>
    %cst_55 = arith.constant dense<0.000000e+00> : vector<8x64xf32>
    %79 = tpu.matmul %77, %78, %cst_55 {dimension_numbers = #tpu.dot_dimension_numbers<[1], [0], [0], [1], [0, 0, 1, 1], [], []>} : vector<8x32xf32>, vector<32x64xf32>, vector<8x64xf32> -> vector<8x64xf32>
    %80 = arith.addf %76, %79 : vector<8x64xf32>
    %c24 = arith.constant 24 : index
    %c0_56 = arith.constant 0 : index
    %81 = vector.load %arg26[%c24, %c0_56] : memref<32x32xf32, #tpu.memory_space<vmem>>, vector<8x32xf32>
    %c96_57 = arith.constant 96 : index
    %c0_58 = arith.constant 0 : index
    %82 = vector.load %arg8[%c96_57, %c0_58] : memref<128x64xf32, #tpu.memory_space<vmem>>, vector<32x64xf32>
    %cst_59 = arith.constant dense<0.000000e+00> : vector<8x64xf32>
    %83 = tpu.matmul %81, %82, %cst_59 {dimension_numbers = #tpu.dot_dimension_numbers<[1], [0], [0], [1], [0, 0, 1, 1], [], []>} : vector<8x32xf32>, vector<32x64xf32>, vector<8x64xf32> -> vector<8x64xf32>
    %84 = arith.addf %80, %83 : vector<8x64xf32>
    %cst_60 = arith.constant dense<0.000000e+00> : vector<64xf32>
    %85 = vector.multi_reduction <add>, %84, %cst_60 [0] : vector<8x64xf32> to vector<64xf32>
    %86 = vector.shape_cast %85 : vector<64xf32> to vector<1x64xf32>
    %cst_61 = arith.constant 8.000000e+00 : f32
    %87 = vector.broadcast %cst_61 : f32 to vector<1x64xf32>
    %88 = arith.divf %86, %87 : vector<1x64xf32>
    %89 = vector.broadcast %88 : vector<1x64xf32> to vector<8x64xf32>
    %90 = arith.subf %84, %89 : vector<8x64xf32>
    %91 = arith.mulf %90, %90 : vector<8x64xf32>
    %cst_62 = arith.constant dense<0.000000e+00> : vector<64xf32>
    %92 = vector.multi_reduction <add>, %91, %cst_62 [0] : vector<8x64xf32> to vector<64xf32>
    %93 = vector.shape_cast %92 : vector<64xf32> to vector<1x64xf32>
    %cst_63 = arith.constant 8.000000e+00 : f32
    %94 = vector.broadcast %cst_63 : f32 to vector<1x64xf32>
    %95 = arith.divf %93, %94 : vector<1x64xf32>
    %96 = vector.broadcast %88 : vector<1x64xf32> to vector<8x64xf32>
    %97 = arith.subf %84, %96 : vector<8x64xf32>
    %cst_64 = arith.constant 9.99999974E-6 : f32
    %98 = vector.broadcast %cst_64 : f32 to vector<1x64xf32>
    %99 = arith.addf %95, %98 : vector<1x64xf32>
    %100 = math.rsqrt %99 : vector<1x64xf32>
    %c0_65 = arith.constant 0 : index
    %c0_66 = arith.constant 0 : index
    %101 = vector.load %arg9[%c0_65, %c0_66] : memref<1x64xf32, #tpu.memory_space<vmem>>, vector<1x64xf32>
    %102 = arith.mulf %100, %101 : vector<1x64xf32>
    %103 = vector.broadcast %102 : vector<1x64xf32> to vector<8x64xf32>
    %104 = arith.mulf %97, %103 : vector<8x64xf32>
    %c0_67 = arith.constant 0 : index
    %c0_68 = arith.constant 0 : index
    %105 = vector.load %arg10[%c0_67, %c0_68] : memref<1x64xf32, #tpu.memory_space<vmem>>, vector<1x64xf32>
    %106 = vector.broadcast %105 : vector<1x64xf32> to vector<8x64xf32>
    %107 = arith.addf %104, %106 : vector<8x64xf32>
    %cst_69 = arith.constant 0.000000e+00 : f32
    %108 = vector.broadcast %cst_69 : f32 to vector<8x64xf32>
    %109 = arith.maximumf %107, %108 : vector<8x64xf32>
    %c0_70 = arith.constant 0 : index
    %c0_71 = arith.constant 0 : index
    %110 = vector.load %arg27[%c0_70, %c0_71] : memref<8x64xf32, #tpu.memory_space<vmem>>, vector<8x64xf32>
    tpu.vector_store %arg27[%c0_70, %c0_71], %109 {strides = array<i32>} : memref<8x64xf32, #tpu.memory_space<vmem>>, vector<8x64xf32>,
    %c0_72 = arith.constant 0 : index
    %c0_73 = arith.constant 0 : index
    %111 = vector.load %arg27[%c0_72, %c0_73] : memref<8x64xf32, #tpu.memory_space<vmem>>, vector<2x64xf32>
    %c0_74 = arith.constant 0 : index
    %c0_75 = arith.constant 0 : index
    %112 = vector.load %arg11[%c0_74, %c0_75] : memref<256x32xf32, #tpu.memory_space<vmem>>, vector<64x32xf32>
    %cst_76 = arith.constant dense<0.000000e+00> : vector<2x32xf32>
    %113 = tpu.matmul %111, %112, %cst_76 {dimension_numbers = #tpu.dot_dimension_numbers<[1], [0], [0], [1], [0, 0, 1, 1], [], []>} : vector<2x64xf32>, vector<64x32xf32>, vector<2x32xf32> -> vector<2x32xf32>
    %c2 = arith.constant 2 : index
    %c0_77 = arith.constant 0 : index
    %114 = vector.load %arg27[%c2, %c0_77] : memref<8x64xf32, #tpu.memory_space<vmem>>, vector<2x64xf32>
    %c64_78 = arith.constant 64 : index
    %c0_79 = arith.constant 0 : index
    %115 = vector.load %arg11[%c64_78, %c0_79] : memref<256x32xf32, #tpu.memory_space<vmem>>, vector<64x32xf32>
    %cst_80 = arith.constant dense<0.000000e+00> : vector<2x32xf32>
    %116 = tpu.matmul %114, %115, %cst_80 {dimension_numbers = #tpu.dot_dimension_numbers<[1], [0], [0], [1], [0, 0, 1, 1], [], []>} : vector<2x64xf32>, vector<64x32xf32>, vector<2x32xf32> -> vector<2x32xf32>
    %117 = arith.addf %113, %116 : vector<2x32xf32>
    %c4 = arith.constant 4 : index
    %c0_81 = arith.constant 0 : index
    %118 = vector.load %arg27[%c4, %c0_81] : memref<8x64xf32, #tpu.memory_space<vmem>>, vector<2x64xf32>
    %c128 = arith.constant 128 : index
    %c0_82 = arith.constant 0 : index
    %119 = vector.load %arg11[%c128, %c0_82] : memref<256x32xf32, #tpu.memory_space<vmem>>, vector<64x32xf32>
    %cst_83 = arith.constant dense<0.000000e+00> : vector<2x32xf32>
    %120 = tpu.matmul %118, %119, %cst_83 {dimension_numbers = #tpu.dot_dimension_numbers<[1], [0], [0], [1], [0, 0, 1, 1], [], []>} : vector<2x64xf32>, vector<64x32xf32>, vector<2x32xf32> -> vector<2x32xf32>
    %121 = arith.addf %117, %120 : vector<2x32xf32>
    %c6 = arith.constant 6 : index
    %c0_84 = arith.constant 0 : index
    %122 = vector.load %arg27[%c6, %c0_84] : memref<8x64xf32, #tpu.memory_space<vmem>>, vector<2x64xf32>
    %c192 = arith.constant 192 : index
    %c0_85 = arith.constant 0 : index
    %123 = vector.load %arg11[%c192, %c0_85] : memref<256x32xf32, #tpu.memory_space<vmem>>, vector<64x32xf32>
    %cst_86 = arith.constant dense<0.000000e+00> : vector<2x32xf32>
    %124 = tpu.matmul %122, %123, %cst_86 {dimension_numbers = #tpu.dot_dimension_numbers<[1], [0], [0], [1], [0, 0, 1, 1], [], []>} : vector<2x64xf32>, vector<64x32xf32>, vector<2x32xf32> -> vector<2x32xf32>
    %125 = arith.addf %121, %124 : vector<2x32xf32>
    %c0_87 = arith.constant 0 : index
    %c0_88 = arith.constant 0 : index
    %126 = vector.load %arg12[%c0_87, %c0_88] : memref<1x32xf32, #tpu.memory_space<vmem>>, vector<1x32xf32>
    %127 = vector.broadcast %126 : vector<1x32xf32> to vector<2x32xf32>
    %128 = arith.addf %125, %127 : vector<2x32xf32>
    %129 = arith.negf %128 : vector<2x32xf32>
    %130 = math.exp %129 : vector<2x32xf32>
    %cst_89 = arith.constant 1.000000e+00 : f32
    %131 = vector.broadcast %cst_89 : f32 to vector<2x32xf32>
    %132 = arith.addf %131, %130 : vector<2x32xf32>
    %133 = arith.divf %131, %132 : vector<2x32xf32>
    %c0_90 = arith.constant 0 : index
    %c0_91 = arith.constant 0 : index
    %134 = vector.load %arg1[%c0_90, %c0_91] : memref<128x128xf32, #tpu.memory_space<vmem>>, vector<128x128xf32>
    %c0_92 = arith.constant 0 : index
    %c0_93 = arith.constant 0 : index
    %135 = vector.load %arg2[%c0_92, %c0_93] : memref<128x16xf32, #tpu.memory_space<vmem>>, vector<128x16xf32>
    %cst_94 = arith.constant dense<0.000000e+00> : vector<128x16xf32>
    %136 = tpu.matmul %134, %135, %cst_94 {dimension_numbers = #tpu.dot_dimension_numbers<[1], [0], [0], [1], [0, 0, 1, 1], [], []>} : vector<128x128xf32>, vector<128x16xf32>, vector<128x16xf32> -> vector<128x16xf32>
    %cst_95 = arith.constant dense<0.000000e+00> : vector<16xf32>
    %137 = vector.multi_reduction <add>, %136, %cst_95 [0] : vector<128x16xf32> to vector<16xf32>
    %138 = vector.shape_cast %137 : vector<16xf32> to vector<1x16xf32>
    %cst_96 = arith.constant 1.280000e+02 : f32
    %139 = vector.broadcast %cst_96 : f32 to vector<1x16xf32>
    %140 = arith.divf %138, %139 : vector<1x16xf32>
    %141 = vector.broadcast %140 : vector<1x16xf32> to vector<128x16xf32>
    %142 = arith.subf %136, %141 : vector<128x16xf32>
    %143 = arith.mulf %142, %142 : vector<128x16xf32>
    %cst_97 = arith.constant dense<0.000000e+00> : vector<16xf32>
    %144 = vector.multi_reduction <add>, %143, %cst_97 [0] : vector<128x16xf32> to vector<16xf32>
    %145 = vector.shape_cast %144 : vector<16xf32> to vector<1x16xf32>
    %cst_98 = arith.constant 1.280000e+02 : f32
    %146 = vector.broadcast %cst_98 : f32 to vector<1x16xf32>
    %147 = arith.divf %145, %146 : vector<1x16xf32>
    %148 = vector.broadcast %140 : vector<1x16xf32> to vector<128x16xf32>
    %149 = arith.subf %136, %148 : vector<128x16xf32>
    %cst_99 = arith.constant 9.99999974E-6 : f32
    %150 = vector.broadcast %cst_99 : f32 to vector<1x16xf32>
    %151 = arith.addf %147, %150 : vector<1x16xf32>
    %152 = math.rsqrt %151 : vector<1x16xf32>
    %c0_100 = arith.constant 0 : index
    %c0_101 = arith.constant 0 : index
    %153 = vector.load %arg3[%c0_100, %c0_101] : memref<1x16xf32, #tpu.memory_space<vmem>>, vector<1x16xf32>
    %154 = arith.mulf %152, %153 : vector<1x16xf32>
    %155 = vector.broadcast %154 : vector<1x16xf32> to vector<128x16xf32>
    %156 = arith.mulf %149, %155 : vector<128x16xf32>
    %c0_102 = arith.constant 0 : index
    %c0_103 = arith.constant 0 : index
    %157 = vector.load %arg4[%c0_102, %c0_103] : memref<1x16xf32, #tpu.memory_space<vmem>>, vector<1x16xf32>
    %158 = vector.broadcast %157 : vector<1x16xf32> to vector<128x16xf32>
    %159 = arith.addf %156, %158 : vector<128x16xf32>
    %cst_104 = arith.constant 0.000000e+00 : f32
    %160 = vector.broadcast %cst_104 : f32 to vector<128x16xf32>
    %161 = arith.maximumf %159, %160 : vector<128x16xf32>
    %c0_105 = arith.constant 0 : index
    %c0_106 = arith.constant 0 : index
    %162 = vector.load %arg25[%c0_105, %c0_106] : memref<128x16xf32, #tpu.memory_space<vmem>>, vector<128x16xf32>
    tpu.vector_store %arg25[%c0_105, %c0_106], %161 {strides = array<i32>} : memref<128x16xf32, #tpu.memory_space<vmem>>, vector<128x16xf32>,
    %c0_107 = arith.constant 0 : index
    %c0_108 = arith.constant 0 : index
    %163 = vector.load %arg25[%c0_107, %c0_108] : memref<128x16xf32, #tpu.memory_space<vmem>>, vector<32x16xf32>
    %c0_109 = arith.constant 0 : index
    %c0_110 = arith.constant 0 : index
    %164 = vector.load %arg5[%c0_109, %c0_110] : memref<64x32xf32, #tpu.memory_space<vmem>>, vector<16x32xf32>
    %cst_111 = arith.constant dense<0.000000e+00> : vector<32x32xf32>
    %165 = tpu.matmul %163, %164, %cst_111 {dimension_numbers = #tpu.dot_dimension_numbers<[1], [0], [0], [1], [0, 0, 1, 1], [], []>} : vector<32x16xf32>, vector<16x32xf32>, vector<32x32xf32> -> vector<32x32xf32>
    %c32_112 = arith.constant 32 : index
    %c0_113 = arith.constant 0 : index
    %166 = vector.load %arg25[%c32_112, %c0_113] : memref<128x16xf32, #tpu.memory_space<vmem>>, vector<32x16xf32>
    %c16_114 = arith.constant 16 : index
    %c0_115 = arith.constant 0 : index
    %167 = vector.load %arg5[%c16_114, %c0_115] : memref<64x32xf32, #tpu.memory_space<vmem>>, vector<16x32xf32>
    %cst_116 = arith.constant dense<0.000000e+00> : vector<32x32xf32>
    %168 = tpu.matmul %166, %167, %cst_116 {dimension_numbers = #tpu.dot_dimension_numbers<[1], [0], [0], [1], [0, 0, 1, 1], [], []>} : vector<32x16xf32>, vector<16x32xf32>, vector<32x32xf32> -> vector<32x32xf32>
    %169 = arith.addf %165, %168 : vector<32x32xf32>
    %c64_117 = arith.constant 64 : index
    %c0_118 = arith.constant 0 : index
    %170 = vector.load %arg25[%c64_117, %c0_118] : memref<128x16xf32, #tpu.memory_space<vmem>>, vector<32x16xf32>
    %c32_119 = arith.constant 32 : index
    %c0_120 = arith.constant 0 : index
    %171 = vector.load %arg5[%c32_119, %c0_120] : memref<64x32xf32, #tpu.memory_space<vmem>>, vector<16x32xf32>
    %cst_121 = arith.constant dense<0.000000e+00> : vector<32x32xf32>
    %172 = tpu.matmul %170, %171, %cst_121 {dimension_numbers = #tpu.dot_dimension_numbers<[1], [0], [0], [1], [0, 0, 1, 1], [], []>} : vector<32x16xf32>, vector<16x32xf32>, vector<32x32xf32> -> vector<32x32xf32>
    %173 = arith.addf %169, %172 : vector<32x32xf32>
    %c96_122 = arith.constant 96 : index
    %c0_123 = arith.constant 0 : index
    %174 = vector.load %arg25[%c96_122, %c0_123] : memref<128x16xf32, #tpu.memory_space<vmem>>, vector<32x16xf32>
    %c48_124 = arith.constant 48 : index
    %c0_125 = arith.constant 0 : index
    %175 = vector.load %arg5[%c48_124, %c0_125] : memref<64x32xf32, #tpu.memory_space<vmem>>, vector<16x32xf32>
    %cst_126 = arith.constant dense<0.000000e+00> : vector<32x32xf32>
    %176 = tpu.matmul %174, %175, %cst_126 {dimension_numbers = #tpu.dot_dimension_numbers<[1], [0], [0], [1], [0, 0, 1, 1], [], []>} : vector<32x16xf32>, vector<16x32xf32>, vector<32x32xf32> -> vector<32x32xf32>
    %177 = arith.addf %173, %176 : vector<32x32xf32>
    %cst_127 = arith.constant dense<0.000000e+00> : vector<32xf32>
    %178 = vector.multi_reduction <add>, %177, %cst_127 [0] : vector<32x32xf32> to vector<32xf32>
    %179 = vector.shape_cast %178 : vector<32xf32> to vector<1x32xf32>
    %cst_128 = arith.constant 3.200000e+01 : f32
    %180 = vector.broadcast %cst_128 : f32 to vector<1x32xf32>
    %181 = arith.divf %179, %180 : vector<1x32xf32>
    %182 = vector.broadcast %181 : vector<1x32xf32> to vector<32x32xf32>
    %183 = arith.subf %177, %182 : vector<32x32xf32>
    %184 = arith.mulf %183, %183 : vector<32x32xf32>
    %cst_129 = arith.constant dense<0.000000e+00> : vector<32xf32>
    %185 = vector.multi_reduction <add>, %184, %cst_129 [0] : vector<32x32xf32> to vector<32xf32>
    %186 = vector.shape_cast %185 : vector<32xf32> to vector<1x32xf32>
    %cst_130 = arith.constant 3.200000e+01 : f32
    %187 = vector.broadcast %cst_130 : f32 to vector<1x32xf32>
    %188 = arith.divf %186, %187 : vector<1x32xf32>
    %189 = vector.broadcast %181 : vector<1x32xf32> to vector<32x32xf32>
    %190 = arith.subf %177, %189 : vector<32x32xf32>
    %cst_131 = arith.constant 9.99999974E-6 : f32
    %191 = vector.broadcast %cst_131 : f32 to vector<1x32xf32>
    %192 = arith.addf %188, %191 : vector<1x32xf32>
    %193 = math.rsqrt %192 : vector<1x32xf32>
    %c0_132 = arith.constant 0 : index
    %c0_133 = arith.constant 0 : index
    %194 = vector.load %arg6[%c0_132, %c0_133] : memref<1x32xf32, #tpu.memory_space<vmem>>, vector<1x32xf32>
    %195 = arith.mulf %193, %194 : vector<1x32xf32>
    %196 = vector.broadcast %195 : vector<1x32xf32> to vector<32x32xf32>
    %197 = arith.mulf %190, %196 : vector<32x32xf32>
    %c0_134 = arith.constant 0 : index
    %c0_135 = arith.constant 0 : index
    %198 = vector.load %arg7[%c0_134, %c0_135] : memref<1x32xf32, #tpu.memory_space<vmem>>, vector<1x32xf32>
    %199 = vector.broadcast %198 : vector<1x32xf32> to vector<32x32xf32>
    %200 = arith.addf %197, %199 : vector<32x32xf32>
    %cst_136 = arith.constant 0.000000e+00 : f32
    %201 = vector.broadcast %cst_136 : f32 to vector<32x32xf32>
    %202 = arith.maximumf %200, %201 : vector<32x32xf32>
    %c0_137 = arith.constant 0 : index
    %c0_138 = arith.constant 0 : index
    %203 = vector.load %arg26[%c0_137, %c0_138] : memref<32x32xf32, #tpu.memory_space<vmem>>, vector<32x32xf32>
    tpu.vector_store %arg26[%c0_137, %c0_138], %202 {strides = array<i32>} : memref<32x32xf32, #tpu.memory_space<vmem>>, vector<32x32xf32>,
    %c0_139 = arith.constant 0 : index
    %c0_140 = arith.constant 0 : index
    %204 = vector.load %arg26[%c0_139, %c0_140] : memref<32x32xf32, #tpu.memory_space<vmem>>, vector<8x32xf32>
    %c0_141 = arith.constant 0 : index
    %c0_142 = arith.constant 0 : index
    %205 = vector.load %arg8[%c0_141, %c0_142] : memref<128x64xf32, #tpu.memory_space<vmem>>, vector<32x64xf32>
    %cst_143 = arith.constant dense<0.000000e+00> : vector<8x64xf32>
    %206 = tpu.matmul %204, %205, %cst_143 {dimension_numbers = #tpu.dot_dimension_numbers<[1], [0], [0], [1], [0, 0, 1, 1], [], []>} : vector<8x32xf32>, vector<32x64xf32>, vector<8x64xf32> -> vector<8x64xf32>
    %c8_144 = arith.constant 8 : index
    %c0_145 = arith.constant 0 : index
    %207 = vector.load %arg26[%c8_144, %c0_145] : memref<32x32xf32, #tpu.memory_space<vmem>>, vector<8x32xf32>
    %c32_146 = arith.constant 32 : index
    %c0_147 = arith.constant 0 : index
    %208 = vector.load %arg8[%c32_146, %c0_147] : memref<128x64xf32, #tpu.memory_space<vmem>>, vector<32x64xf32>
    %cst_148 = arith.constant dense<0.000000e+00> : vector<8x64xf32>
    %209 = tpu.matmul %207, %208, %cst_148 {dimension_numbers = #tpu.dot_dimension_numbers<[1], [0], [0], [1], [0, 0, 1, 1], [], []>} : vector<8x32xf32>, vector<32x64xf32>, vector<8x64xf32> -> vector<8x64xf32>
    %210 = arith.addf %206, %209 : vector<8x64xf32>
    %c16_149 = arith.constant 16 : index
    %c0_150 = arith.constant 0 : index
    %211 = vector.load %arg26[%c16_149, %c0_150] : memref<32x32xf32, #tpu.memory_space<vmem>>, vector<8x32xf32>
    %c64_151 = arith.constant 64 : index
    %c0_152 = arith.constant 0 : index
    %212 = vector.load %arg8[%c64_151, %c0_152] : memref<128x64xf32, #tpu.memory_space<vmem>>, vector<32x64xf32>
    %cst_153 = arith.constant dense<0.000000e+00> : vector<8x64xf32>
    %213 = tpu.matmul %211, %212, %cst_153 {dimension_numbers = #tpu.dot_dimension_numbers<[1], [0], [0], [1], [0, 0, 1, 1], [], []>} : vector<8x32xf32>, vector<32x64xf32>, vector<8x64xf32> -> vector<8x64xf32>
    %214 = arith.addf %210, %213 : vector<8x64xf32>
    %c24_154 = arith.constant 24 : index
    %c0_155 = arith.constant 0 : index
    %215 = vector.load %arg26[%c24_154, %c0_155] : memref<32x32xf32, #tpu.memory_space<vmem>>, vector<8x32xf32>
    %c96_156 = arith.constant 96 : index
    %c0_157 = arith.constant 0 : index
    %216 = vector.load %arg8[%c96_156, %c0_157] : memref<128x64xf32, #tpu.memory_space<vmem>>, vector<32x64xf32>
    %cst_158 = arith.constant dense<0.000000e+00> : vector<8x64xf32>
    %217 = tpu.matmul %215, %216, %cst_158 {dimension_numbers = #tpu.dot_dimension_numbers<[1], [0], [0], [1], [0, 0, 1, 1], [], []>} : vector<8x32xf32>, vector<32x64xf32>, vector<8x64xf32> -> vector<8x64xf32>
    %218 = arith.addf %214, %217 : vector<8x64xf32>
    %cst_159 = arith.constant dense<0.000000e+00> : vector<64xf32>
    %219 = vector.multi_reduction <add>, %218, %cst_159 [0] : vector<8x64xf32> to vector<64xf32>
    %220 = vector.shape_cast %219 : vector<64xf32> to vector<1x64xf32>
    %cst_160 = arith.constant 8.000000e+00 : f32
    %221 = vector.broadcast %cst_160 : f32 to vector<1x64xf32>
    %222 = arith.divf %220, %221 : vector<1x64xf32>
    %223 = vector.broadcast %222 : vector<1x64xf32> to vector<8x64xf32>
    %224 = arith.subf %218, %223 : vector<8x64xf32>
    %225 = arith.mulf %224, %224 : vector<8x64xf32>
    %cst_161 = arith.constant dense<0.000000e+00> : vector<64xf32>
    %226 = vector.multi_reduction <add>, %225, %cst_161 [0] : vector<8x64xf32> to vector<64xf32>
    %227 = vector.shape_cast %226 : vector<64xf32> to vector<1x64xf32>
    %cst_162 = arith.constant 8.000000e+00 : f32
    %228 = vector.broadcast %cst_162 : f32 to vector<1x64xf32>
    %229 = arith.divf %227, %228 : vector<1x64xf32>
    %230 = vector.broadcast %222 : vector<1x64xf32> to vector<8x64xf32>
    %231 = arith.subf %218, %230 : vector<8x64xf32>
    %cst_163 = arith.constant 9.99999974E-6 : f32
    %232 = vector.broadcast %cst_163 : f32 to vector<1x64xf32>
    %233 = arith.addf %229, %232 : vector<1x64xf32>
    %234 = math.rsqrt %233 : vector<1x64xf32>
    %c0_164 = arith.constant 0 : index
    %c0_165 = arith.constant 0 : index
    %235 = vector.load %arg9[%c0_164, %c0_165] : memref<1x64xf32, #tpu.memory_space<vmem>>, vector<1x64xf32>
    %236 = arith.mulf %234, %235 : vector<1x64xf32>
    %237 = vector.broadcast %236 : vector<1x64xf32> to vector<8x64xf32>
    %238 = arith.mulf %231, %237 : vector<8x64xf32>
    %c0_166 = arith.constant 0 : index
    %c0_167 = arith.constant 0 : index
    %239 = vector.load %arg10[%c0_166, %c0_167] : memref<1x64xf32, #tpu.memory_space<vmem>>, vector<1x64xf32>
    %240 = vector.broadcast %239 : vector<1x64xf32> to vector<8x64xf32>
    %241 = arith.addf %238, %240 : vector<8x64xf32>
    %cst_168 = arith.constant 0.000000e+00 : f32
    %242 = vector.broadcast %cst_168 : f32 to vector<8x64xf32>
    %243 = arith.maximumf %241, %242 : vector<8x64xf32>
    %c0_169 = arith.constant 0 : index
    %c0_170 = arith.constant 0 : index
    %244 = vector.load %arg27[%c0_169, %c0_170] : memref<8x64xf32, #tpu.memory_space<vmem>>, vector<8x64xf32>
    tpu.vector_store %arg27[%c0_169, %c0_170], %243 {strides = array<i32>} : memref<8x64xf32, #tpu.memory_space<vmem>>, vector<8x64xf32>,
    %c0_171 = arith.constant 0 : index
    %c0_172 = arith.constant 0 : index
    %245 = vector.load %arg27[%c0_171, %c0_172] : memref<8x64xf32, #tpu.memory_space<vmem>>, vector<2x64xf32>
    %c0_173 = arith.constant 0 : index
    %c0_174 = arith.constant 0 : index
    %246 = vector.load %arg11[%c0_173, %c0_174] : memref<256x32xf32, #tpu.memory_space<vmem>>, vector<64x32xf32>
    %cst_175 = arith.constant dense<0.000000e+00> : vector<2x32xf32>
    %247 = tpu.matmul %245, %246, %cst_175 {dimension_numbers = #tpu.dot_dimension_numbers<[1], [0], [0], [1], [0, 0, 1, 1], [], []>} : vector<2x64xf32>, vector<64x32xf32>, vector<2x32xf32> -> vector<2x32xf32>
    %c2_176 = arith.constant 2 : index
    %c0_177 = arith.constant 0 : index
    %248 = vector.load %arg27[%c2_176, %c0_177] : memref<8x64xf32, #tpu.memory_space<vmem>>, vector<2x64xf32>
    %c64_178 = arith.constant 64 : index
    %c0_179 = arith.constant 0 : index
    %249 = vector.load %arg11[%c64_178, %c0_179] : memref<256x32xf32, #tpu.memory_space<vmem>>, vector<64x32xf32>
    %cst_180 = arith.constant dense<0.000000e+00> : vector<2x32xf32>
    %250 = tpu.matmul %248, %249, %cst_180 {dimension_numbers = #tpu.dot_dimension_numbers<[1], [0], [0], [1], [0, 0, 1, 1], [], []>} : vector<2x64xf32>, vector<64x32xf32>, vector<2x32xf32> -> vector<2x32xf32>
    %251 = arith.addf %247, %250 : vector<2x32xf32>
    %c4_181 = arith.constant 4 : index
    %c0_182 = arith.constant 0 : index
    %252 = vector.load %arg27[%c4_181, %c0_182] : memref<8x64xf32, #tpu.memory_space<vmem>>, vector<2x64xf32>
    %c128_183 = arith.constant 128 : index
    %c0_184 = arith.constant 0 : index
    %253 = vector.load %arg11[%c128_183, %c0_184] : memref<256x32xf32, #tpu.memory_space<vmem>>, vector<64x32xf32>
    %cst_185 = arith.constant dense<0.000000e+00> : vector<2x32xf32>
    %254 = tpu.matmul %252, %253, %cst_185 {dimension_numbers = #tpu.dot_dimension_numbers<[1], [0], [0], [1], [0, 0, 1, 1], [], []>} : vector<2x64xf32>, vector<64x32xf32>, vector<2x32xf32> -> vector<2x32xf32>
    %255 = arith.addf %251, %254 : vector<2x32xf32>
    %c6_186 = arith.constant 6 : index
    %c0_187 = arith.constant 0 : index
    %256 = vector.load %arg27[%c6_186, %c0_187] : memref<8x64xf32, #tpu.memory_space<vmem>>, vector<2x64xf32>
    %c192_188 = arith.constant 192 : index
    %c0_189 = arith.constant 0 : index
    %257 = vector.load %arg11[%c192_188, %c0_189] : memref<256x32xf32, #tpu.memory_space<vmem>>, vector<64x32xf32>
    %cst_190 = arith.constant dense<0.000000e+00> : vector<2x32xf32>
    %258 = tpu.matmul %256, %257, %cst_190 {dimension_numbers = #tpu.dot_dimension_numbers<[1], [0], [0], [1], [0, 0, 1, 1], [], []>} : vector<2x64xf32>, vector<64x32xf32>, vector<2x32xf32> -> vector<2x32xf32>
    %259 = arith.addf %255, %258 : vector<2x32xf32>
    %c0_191 = arith.constant 0 : index
    %c0_192 = arith.constant 0 : index
    %260 = vector.load %arg12[%c0_191, %c0_192] : memref<1x32xf32, #tpu.memory_space<vmem>>, vector<1x32xf32>
    %261 = vector.broadcast %260 : vector<1x32xf32> to vector<2x32xf32>
    %262 = arith.addf %259, %261 : vector<2x32xf32>
    %263 = arith.negf %262 : vector<2x32xf32>
    %264 = math.exp %263 : vector<2x32xf32>
    %cst_193 = arith.constant 1.000000e+00 : f32
    %265 = vector.broadcast %cst_193 : f32 to vector<2x32xf32>
    %266 = arith.addf %265, %264 : vector<2x32xf32>
    %267 = arith.divf %265, %266 : vector<2x32xf32>
    %268 = arith.addf %133, %267 : vector<2x32xf32>
    %cst_194 = arith.constant 4.000000e-01 : f32
    %269 = vector.broadcast %cst_194 : f32 to vector<2x32xf32>
    %270 = arith.mulf %269, %268 : vector<2x32xf32>
    %c0_195 = arith.constant 0 : index
    %c0_196 = arith.constant 0 : index
    %271 = vector.load %arg13[%c0_195, %c0_196] : memref<32x256xf32, #tpu.memory_space<vmem>>, vector<32x64xf32>
    %cst_197 = arith.constant dense<0.000000e+00> : vector<2x64xf32>
    %272 = tpu.matmul %270, %271, %cst_197 {dimension_numbers = #tpu.dot_dimension_numbers<[1], [0], [0], [1], [0, 0, 1, 1], [], []>} : vector<2x32xf32>, vector<32x64xf32>, vector<2x64xf32> -> vector<2x64xf32>
    %c0_198 = arith.constant 0 : index
    %c0_199 = arith.constant 0 : index
    %273 = vector.load %arg14[%c0_198, %c0_199] : memref<1x256xf32, #tpu.memory_space<vmem>>, vector<1x64xf32>
    %274 = vector.broadcast %273 : vector<1x64xf32> to vector<2x64xf32>
    %275 = arith.addf %272, %274 : vector<2x64xf32>
    %276 = arith.negf %275 : vector<2x64xf32>
    %277 = math.exp %276 : vector<2x64xf32>
    %cst_200 = arith.constant 1.000000e+00 : f32
    %278 = vector.broadcast %cst_200 : f32 to vector<2x64xf32>
    %279 = arith.addf %278, %277 : vector<2x64xf32>
    %280 = arith.divf %278, %279 : vector<2x64xf32>
    %c0_201 = arith.constant 0 : index
    %c0_202 = arith.constant 0 : index
    %281 = vector.load %arg28[%c0_201, %c0_202] : memref<8x64xf32, #tpu.memory_space<vmem>>, vector<2x64xf32>
    tpu.vector_store %arg28[%c0_201, %c0_202], %280 {strides = array<i32>} : memref<8x64xf32, #tpu.memory_space<vmem>>, vector<2x64xf32>,
    %c0_203 = arith.constant 0 : index
    %c64_204 = arith.constant 64 : index
    %282 = vector.load %arg13[%c0_203, %c64_204] : memref<32x256xf32, #tpu.memory_space<vmem>>, vector<32x64xf32>
    %cst_205 = arith.constant dense<0.000000e+00> : vector<2x64xf32>
    %283 = tpu.matmul %270, %282, %cst_205 {dimension_numbers = #tpu.dot_dimension_numbers<[1], [0], [0], [1], [0, 0, 1, 1], [], []>} : vector<2x32xf32>, vector<32x64xf32>, vector<2x64xf32> -> vector<2x64xf32>
    %c0_206 = arith.constant 0 : index
    %c64_207 = arith.constant 64 : index
    %284 = vector.load %arg14[%c0_206, %c64_207] : memref<1x256xf32, #tpu.memory_space<vmem>>, vector<1x64xf32>
    %285 = vector.broadcast %284 : vector<1x64xf32> to vector<2x64xf32>
    %286 = arith.addf %283, %285 : vector<2x64xf32>
    %287 = arith.negf %286 : vector<2x64xf32>
    %288 = math.exp %287 : vector<2x64xf32>
    %cst_208 = arith.constant 1.000000e+00 : f32
    %289 = vector.broadcast %cst_208 : f32 to vector<2x64xf32>
    %290 = arith.addf %289, %288 : vector<2x64xf32>
    %291 = arith.divf %289, %290 : vector<2x64xf32>
    %c2_209 = arith.constant 2 : index
    %c0_210 = arith.constant 0 : index
    %292 = vector.load %arg28[%c2_209, %c0_210] : memref<8x64xf32, #tpu.memory_space<vmem>>, vector<2x64xf32>
    tpu.vector_store %arg28[%c2_209, %c0_210], %291 {strides = array<i32>} : memref<8x64xf32, #tpu.memory_space<vmem>>, vector<2x64xf32>,
    %c0_211 = arith.constant 0 : index
    %c128_212 = arith.constant 128 : index
    %293 = vector.load %arg13[%c0_211, %c128_212] : memref<32x256xf32, #tpu.memory_space<vmem>>, vector<32x64xf32>
    %cst_213 = arith.constant dense<0.000000e+00> : vector<2x64xf32>
    %294 = tpu.matmul %270, %293, %cst_213 {dimension_numbers = #tpu.dot_dimension_numbers<[1], [0], [0], [1], [0, 0, 1, 1], [], []>} : vector<2x32xf32>, vector<32x64xf32>, vector<2x64xf32> -> vector<2x64xf32>
    %c0_214 = arith.constant 0 : index
    %c128_215 = arith.constant 128 : index
    %295 = vector.load %arg14[%c0_214, %c128_215] : memref<1x256xf32, #tpu.memory_space<vmem>>, vector<1x64xf32>
    %296 = vector.broadcast %295 : vector<1x64xf32> to vector<2x64xf32>
    %297 = arith.addf %294, %296 : vector<2x64xf32>
    %298 = arith.negf %297 : vector<2x64xf32>
    %299 = math.exp %298 : vector<2x64xf32>
    %cst_216 = arith.constant 1.000000e+00 : f32
    %300 = vector.broadcast %cst_216 : f32 to vector<2x64xf32>
    %301 = arith.addf %300, %299 : vector<2x64xf32>
    %302 = arith.divf %300, %301 : vector<2x64xf32>
    %c4_217 = arith.constant 4 : index
    %c0_218 = arith.constant 0 : index
    %303 = vector.load %arg28[%c4_217, %c0_218] : memref<8x64xf32, #tpu.memory_space<vmem>>, vector<2x64xf32>
    tpu.vector_store %arg28[%c4_217, %c0_218], %302 {strides = array<i32>} : memref<8x64xf32, #tpu.memory_space<vmem>>, vector<2x64xf32>,
    %c0_219 = arith.constant 0 : index
    %c192_220 = arith.constant 192 : index
    %304 = vector.load %arg13[%c0_219, %c192_220] : memref<32x256xf32, #tpu.memory_space<vmem>>, vector<32x64xf32>
    %cst_221 = arith.constant dense<0.000000e+00> : vector<2x64xf32>
    %305 = tpu.matmul %270, %304, %cst_221 {dimension_numbers = #tpu.dot_dimension_numbers<[1], [0], [0], [1], [0, 0, 1, 1], [], []>} : vector<2x32xf32>, vector<32x64xf32>, vector<2x64xf32> -> vector<2x64xf32>
    %c0_222 = arith.constant 0 : index
    %c192_223 = arith.constant 192 : index
    %306 = vector.load %arg14[%c0_222, %c192_223] : memref<1x256xf32, #tpu.memory_space<vmem>>, vector<1x64xf32>
    %307 = vector.broadcast %306 : vector<1x64xf32> to vector<2x64xf32>
    %308 = arith.addf %305, %307 : vector<2x64xf32>
    %309 = arith.negf %308 : vector<2x64xf32>
    %310 = math.exp %309 : vector<2x64xf32>
    %cst_224 = arith.constant 1.000000e+00 : f32
    %311 = vector.broadcast %cst_224 : f32 to vector<2x64xf32>
    %312 = arith.addf %311, %310 : vector<2x64xf32>
    %313 = arith.divf %311, %312 : vector<2x64xf32>
    %c6_225 = arith.constant 6 : index
    %c0_226 = arith.constant 0 : index
    %314 = vector.load %arg28[%c6_225, %c0_226] : memref<8x64xf32, #tpu.memory_space<vmem>>, vector<2x64xf32>
    tpu.vector_store %arg28[%c6_225, %c0_226], %313 {strides = array<i32>} : memref<8x64xf32, #tpu.memory_space<vmem>>, vector<2x64xf32>,
    %c0_227 = arith.constant 0 : index
    %c0_228 = arith.constant 0 : index
    %315 = vector.load %arg28[%c0_227, %c0_228] : memref<8x64xf32, #tpu.memory_space<vmem>>, vector<8x64xf32>
    %c0_229 = arith.constant 0 : index
    %c0_230 = arith.constant 0 : index
    %316 = vector.load %arg15[%c0_229, %c0_230] : memref<64x128xf32, #tpu.memory_space<vmem>>, vector<64x32xf32>
    %cst_231 = arith.constant dense<0.000000e+00> : vector<8x32xf32>
    %317 = tpu.matmul %315, %316, %cst_231 {dimension_numbers = #tpu.dot_dimension_numbers<[1], [0], [0], [1], [0, 0, 1, 1], [], []>} : vector<8x64xf32>, vector<64x32xf32>, vector<8x32xf32> -> vector<8x32xf32>
    %c0_232 = arith.constant 0 : index
    %c32_233 = arith.constant 32 : index
    %318 = vector.load %arg15[%c0_232, %c32_233] : memref<64x128xf32, #tpu.memory_space<vmem>>, vector<64x32xf32>
    %cst_234 = arith.constant dense<0.000000e+00> : vector<8x32xf32>
    %319 = tpu.matmul %315, %318, %cst_234 {dimension_numbers = #tpu.dot_dimension_numbers<[1], [0], [0], [1], [0, 0, 1, 1], [], []>} : vector<8x64xf32>, vector<64x32xf32>, vector<8x32xf32> -> vector<8x32xf32>
    %c0_235 = arith.constant 0 : index
    %c64_236 = arith.constant 64 : index
    %320 = vector.load %arg15[%c0_235, %c64_236] : memref<64x128xf32, #tpu.memory_space<vmem>>, vector<64x32xf32>
    %cst_237 = arith.constant dense<0.000000e+00> : vector<8x32xf32>
    %321 = tpu.matmul %315, %320, %cst_237 {dimension_numbers = #tpu.dot_dimension_numbers<[1], [0], [0], [1], [0, 0, 1, 1], [], []>} : vector<8x64xf32>, vector<64x32xf32>, vector<8x32xf32> -> vector<8x32xf32>
    %c0_238 = arith.constant 0 : index
    %c96_239 = arith.constant 96 : index
    %322 = vector.load %arg15[%c0_238, %c96_239] : memref<64x128xf32, #tpu.memory_space<vmem>>, vector<64x32xf32>
    %cst_240 = arith.constant dense<0.000000e+00> : vector<8x32xf32>
    %323 = tpu.matmul %315, %322, %cst_240 {dimension_numbers = #tpu.dot_dimension_numbers<[1], [0], [0], [1], [0, 0, 1, 1], [], []>} : vector<8x64xf32>, vector<64x32xf32>, vector<8x32xf32> -> vector<8x32xf32>
    %cst_241 = arith.constant dense<0.000000e+00> : vector<32xf32>
    %324 = vector.multi_reduction <add>, %317, %cst_241 [0] : vector<8x32xf32> to vector<32xf32>
    %325 = vector.shape_cast %324 : vector<32xf32> to vector<1x32xf32>
    %cst_242 = arith.constant dense<0.000000e+00> : vector<32xf32>
    %326 = vector.multi_reduction <add>, %319, %cst_242 [0] : vector<8x32xf32> to vector<32xf32>
    %327 = vector.shape_cast %326 : vector<32xf32> to vector<1x32xf32>
    %328 = arith.addf %325, %327 : vector<1x32xf32>
    %cst_243 = arith.constant dense<0.000000e+00> : vector<32xf32>
    %329 = vector.multi_reduction <add>, %321, %cst_243 [0] : vector<8x32xf32> to vector<32xf32>
    %330 = vector.shape_cast %329 : vector<32xf32> to vector<1x32xf32>
    %331 = arith.addf %328, %330 : vector<1x32xf32>
    %cst_244 = arith.constant dense<0.000000e+00> : vector<32xf32>
    %332 = vector.multi_reduction <add>, %323, %cst_244 [0] : vector<8x32xf32> to vector<32xf32>
    %333 = vector.shape_cast %332 : vector<32xf32> to vector<1x32xf32>
    %334 = arith.addf %331, %333 : vector<1x32xf32>
    %cst_245 = arith.constant 3.200000e+01 : f32
    %335 = vector.broadcast %cst_245 : f32 to vector<1x32xf32>
    %336 = arith.divf %334, %335 : vector<1x32xf32>
    %337 = vector.broadcast %336 : vector<1x32xf32> to vector<8x32xf32>
    %338 = arith.subf %317, %337 : vector<8x32xf32>
    %339 = arith.mulf %338, %338 : vector<8x32xf32>
    %cst_246 = arith.constant dense<0.000000e+00> : vector<32xf32>
    %340 = vector.multi_reduction <add>, %339, %cst_246 [0] : vector<8x32xf32> to vector<32xf32>
    %341 = vector.shape_cast %340 : vector<32xf32> to vector<1x32xf32>
    %342 = vector.broadcast %336 : vector<1x32xf32> to vector<8x32xf32>
    %343 = arith.subf %319, %342 : vector<8x32xf32>
    %344 = arith.mulf %343, %343 : vector<8x32xf32>
    %cst_247 = arith.constant dense<0.000000e+00> : vector<32xf32>
    %345 = vector.multi_reduction <add>, %344, %cst_247 [0] : vector<8x32xf32> to vector<32xf32>
    %346 = vector.shape_cast %345 : vector<32xf32> to vector<1x32xf32>
    %347 = arith.addf %341, %346 : vector<1x32xf32>
    %348 = vector.broadcast %336 : vector<1x32xf32> to vector<8x32xf32>
    %349 = arith.subf %321, %348 : vector<8x32xf32>
    %350 = arith.mulf %349, %349 : vector<8x32xf32>
    %cst_248 = arith.constant dense<0.000000e+00> : vector<32xf32>
    %351 = vector.multi_reduction <add>, %350, %cst_248 [0] : vector<8x32xf32> to vector<32xf32>
    %352 = vector.shape_cast %351 : vector<32xf32> to vector<1x32xf32>
    %353 = arith.addf %347, %352 : vector<1x32xf32>
    %354 = vector.broadcast %336 : vector<1x32xf32> to vector<8x32xf32>
    %355 = arith.subf %323, %354 : vector<8x32xf32>
    %356 = arith.mulf %355, %355 : vector<8x32xf32>
    %cst_249 = arith.constant dense<0.000000e+00> : vector<32xf32>
    %357 = vector.multi_reduction <add>, %356, %cst_249 [0] : vector<8x32xf32> to vector<32xf32>
    %358 = vector.shape_cast %357 : vector<32xf32> to vector<1x32xf32>
    %359 = arith.addf %353, %358 : vector<1x32xf32>
    %cst_250 = arith.constant 3.200000e+01 : f32
    %360 = vector.broadcast %cst_250 : f32 to vector<1x32xf32>
    %361 = arith.divf %359, %360 : vector<1x32xf32>
    %cst_251 = arith.constant 9.99999974E-6 : f32
    %362 = vector.broadcast %cst_251 : f32 to vector<1x32xf32>
    %363 = arith.addf %361, %362 : vector<1x32xf32>
    %364 = math.rsqrt %363 : vector<1x32xf32>
    %c0_252 = arith.constant 0 : index
    %c0_253 = arith.constant 0 : index
    %365 = vector.load %arg16[%c0_252, %c0_253] : memref<1x32xf32, #tpu.memory_space<vmem>>, vector<1x32xf32>
    %366 = arith.mulf %364, %365 : vector<1x32xf32>
    %c0_254 = arith.constant 0 : index
    %c0_255 = arith.constant 0 : index
    %367 = vector.load %arg17[%c0_254, %c0_255] : memref<1x32xf32, #tpu.memory_space<vmem>>, vector<1x32xf32>
    %368 = arith.mulf %336, %366 : vector<1x32xf32>
    %369 = arith.subf %367, %368 : vector<1x32xf32>
    %370 = vector.broadcast %366 : vector<1x32xf32> to vector<8x32xf32>
    %371 = arith.mulf %317, %370 : vector<8x32xf32>
    %372 = vector.broadcast %369 : vector<1x32xf32> to vector<8x32xf32>
    %373 = arith.addf %371, %372 : vector<8x32xf32>
    %cst_256 = arith.constant 0.000000e+00 : f32
    %374 = vector.broadcast %cst_256 : f32 to vector<8x32xf32>
    %375 = arith.maximumf %373, %374 : vector<8x32xf32>
    %c0_257 = arith.constant 0 : index
    %c0_258 = arith.constant 0 : index
    %376 = vector.load %arg29[%c0_257, %c0_258] : memref<32x32xf32, #tpu.memory_space<vmem>>, vector<8x32xf32>
    tpu.vector_store %arg29[%c0_257, %c0_258], %375 {strides = array<i32>} : memref<32x32xf32, #tpu.memory_space<vmem>>, vector<8x32xf32>,
    %377 = vector.broadcast %366 : vector<1x32xf32> to vector<8x32xf32>
    %378 = arith.mulf %319, %377 : vector<8x32xf32>
    %379 = vector.broadcast %369 : vector<1x32xf32> to vector<8x32xf32>
    %380 = arith.addf %378, %379 : vector<8x32xf32>
    %cst_259 = arith.constant 0.000000e+00 : f32
    %381 = vector.broadcast %cst_259 : f32 to vector<8x32xf32>
    %382 = arith.maximumf %380, %381 : vector<8x32xf32>
    %c8_260 = arith.constant 8 : index
    %c0_261 = arith.constant 0 : index
    %383 = vector.load %arg29[%c8_260, %c0_261] : memref<32x32xf32, #tpu.memory_space<vmem>>, vector<8x32xf32>
    tpu.vector_store %arg29[%c8_260, %c0_261], %382 {strides = array<i32>} : memref<32x32xf32, #tpu.memory_space<vmem>>, vector<8x32xf32>,
    %384 = vector.broadcast %366 : vector<1x32xf32> to vector<8x32xf32>
    %385 = arith.mulf %321, %384 : vector<8x32xf32>
    %386 = vector.broadcast %369 : vector<1x32xf32> to vector<8x32xf32>
    %387 = arith.addf %385, %386 : vector<8x32xf32>
    %cst_262 = arith.constant 0.000000e+00 : f32
    %388 = vector.broadcast %cst_262 : f32 to vector<8x32xf32>
    %389 = arith.maximumf %387, %388 : vector<8x32xf32>
    %c16_263 = arith.constant 16 : index
    %c0_264 = arith.constant 0 : index
    %390 = vector.load %arg29[%c16_263, %c0_264] : memref<32x32xf32, #tpu.memory_space<vmem>>, vector<8x32xf32>
    tpu.vector_store %arg29[%c16_263, %c0_264], %389 {strides = array<i32>} : memref<32x32xf32, #tpu.memory_space<vmem>>, vector<8x32xf32>,
    %391 = vector.broadcast %366 : vector<1x32xf32> to vector<8x32xf32>
    %392 = arith.mulf %323, %391 : vector<8x32xf32>
    %393 = vector.broadcast %369 : vector<1x32xf32> to vector<8x32xf32>
    %394 = arith.addf %392, %393 : vector<8x32xf32>
    %cst_265 = arith.constant 0.000000e+00 : f32
    %395 = vector.broadcast %cst_265 : f32 to vector<8x32xf32>
    %396 = arith.maximumf %394, %395 : vector<8x32xf32>
    %c24_266 = arith.constant 24 : index
    %c0_267 = arith.constant 0 : index
    %397 = vector.load %arg29[%c24_266, %c0_267] : memref<32x32xf32, #tpu.memory_space<vmem>>, vector<8x32xf32>
    tpu.vector_store %arg29[%c24_266, %c0_267], %396 {strides = array<i32>} : memref<32x32xf32, #tpu.memory_space<vmem>>, vector<8x32xf32>,
    %c0_268 = arith.constant 0 : index
    %c0_269 = arith.constant 0 : index
    %398 = vector.load %arg29[%c0_268, %c0_269] : memref<32x32xf32, #tpu.memory_space<vmem>>, vector<32x32xf32>
    %c0_270 = arith.constant 0 : index
    %c0_271 = arith.constant 0 : index
    %399 = vector.load %arg18[%c0_270, %c0_271] : memref<32x64xf32, #tpu.memory_space<vmem>>, vector<32x16xf32>
    %cst_272 = arith.constant dense<0.000000e+00> : vector<32x16xf32>
    %400 = tpu.matmul %398, %399, %cst_272 {dimension_numbers = #tpu.dot_dimension_numbers<[1], [0], [0], [1], [0, 0, 1, 1], [], []>} : vector<32x32xf32>, vector<32x16xf32>, vector<32x16xf32> -> vector<32x16xf32>
    %c0_273 = arith.constant 0 : index
    %c16_274 = arith.constant 16 : index
    %401 = vector.load %arg18[%c0_273, %c16_274] : memref<32x64xf32, #tpu.memory_space<vmem>>, vector<32x16xf32>
    %cst_275 = arith.constant dense<0.000000e+00> : vector<32x16xf32>
    %402 = tpu.matmul %398, %401, %cst_275 {dimension_numbers = #tpu.dot_dimension_numbers<[1], [0], [0], [1], [0, 0, 1, 1], [], []>} : vector<32x32xf32>, vector<32x16xf32>, vector<32x16xf32> -> vector<32x16xf32>
    %c0_276 = arith.constant 0 : index
    %c32_277 = arith.constant 32 : index
    %403 = vector.load %arg18[%c0_276, %c32_277] : memref<32x64xf32, #tpu.memory_space<vmem>>, vector<32x16xf32>
    %cst_278 = arith.constant dense<0.000000e+00> : vector<32x16xf32>
    %404 = tpu.matmul %398, %403, %cst_278 {dimension_numbers = #tpu.dot_dimension_numbers<[1], [0], [0], [1], [0, 0, 1, 1], [], []>} : vector<32x32xf32>, vector<32x16xf32>, vector<32x16xf32> -> vector<32x16xf32>
    %c0_279 = arith.constant 0 : index
    %c48_280 = arith.constant 48 : index
    %405 = vector.load %arg18[%c0_279, %c48_280] : memref<32x64xf32, #tpu.memory_space<vmem>>, vector<32x16xf32>
    %cst_281 = arith.constant dense<0.000000e+00> : vector<32x16xf32>
    %406 = tpu.matmul %398, %405, %cst_281 {dimension_numbers = #tpu.dot_dimension_numbers<[1], [0], [0], [1], [0, 0, 1, 1], [], []>} : vector<32x32xf32>, vector<32x16xf32>, vector<32x16xf32> -> vector<32x16xf32>
    %cst_282 = arith.constant dense<0.000000e+00> : vector<16xf32>
    %407 = vector.multi_reduction <add>, %400, %cst_282 [0] : vector<32x16xf32> to vector<16xf32>
    %408 = vector.shape_cast %407 : vector<16xf32> to vector<1x16xf32>
    %cst_283 = arith.constant dense<0.000000e+00> : vector<16xf32>
    %409 = vector.multi_reduction <add>, %402, %cst_283 [0] : vector<32x16xf32> to vector<16xf32>
    %410 = vector.shape_cast %409 : vector<16xf32> to vector<1x16xf32>
    %411 = arith.addf %408, %410 : vector<1x16xf32>
    %cst_284 = arith.constant dense<0.000000e+00> : vector<16xf32>
    %412 = vector.multi_reduction <add>, %404, %cst_284 [0] : vector<32x16xf32> to vector<16xf32>
    %413 = vector.shape_cast %412 : vector<16xf32> to vector<1x16xf32>
    %414 = arith.addf %411, %413 : vector<1x16xf32>
    %cst_285 = arith.constant dense<0.000000e+00> : vector<16xf32>
    %415 = vector.multi_reduction <add>, %406, %cst_285 [0] : vector<32x16xf32> to vector<16xf32>
    %416 = vector.shape_cast %415 : vector<16xf32> to vector<1x16xf32>
    %417 = arith.addf %414, %416 : vector<1x16xf32>
    %cst_286 = arith.constant 1.280000e+02 : f32
    %418 = vector.broadcast %cst_286 : f32 to vector<1x16xf32>
    %419 = arith.divf %417, %418 : vector<1x16xf32>
    %420 = vector.broadcast %419 : vector<1x16xf32> to vector<32x16xf32>
    %421 = arith.subf %400, %420 : vector<32x16xf32>
    %422 = arith.mulf %421, %421 : vector<32x16xf32>
    %cst_287 = arith.constant dense<0.000000e+00> : vector<16xf32>
    %423 = vector.multi_reduction <add>, %422, %cst_287 [0] : vector<32x16xf32> to vector<16xf32>
    %424 = vector.shape_cast %423 : vector<16xf32> to vector<1x16xf32>
    %425 = vector.broadcast %419 : vector<1x16xf32> to vector<32x16xf32>
    %426 = arith.subf %402, %425 : vector<32x16xf32>
    %427 = arith.mulf %426, %426 : vector<32x16xf32>
    %cst_288 = arith.constant dense<0.000000e+00> : vector<16xf32>
    %428 = vector.multi_reduction <add>, %427, %cst_288 [0] : vector<32x16xf32> to vector<16xf32>
    %429 = vector.shape_cast %428 : vector<16xf32> to vector<1x16xf32>
    %430 = arith.addf %424, %429 : vector<1x16xf32>
    %431 = vector.broadcast %419 : vector<1x16xf32> to vector<32x16xf32>
    %432 = arith.subf %404, %431 : vector<32x16xf32>
    %433 = arith.mulf %432, %432 : vector<32x16xf32>
    %cst_289 = arith.constant dense<0.000000e+00> : vector<16xf32>
    %434 = vector.multi_reduction <add>, %433, %cst_289 [0] : vector<32x16xf32> to vector<16xf32>
    %435 = vector.shape_cast %434 : vector<16xf32> to vector<1x16xf32>
    %436 = arith.addf %430, %435 : vector<1x16xf32>
    %437 = vector.broadcast %419 : vector<1x16xf32> to vector<32x16xf32>
    %438 = arith.subf %406, %437 : vector<32x16xf32>
    %439 = arith.mulf %438, %438 : vector<32x16xf32>
    %cst_290 = arith.constant dense<0.000000e+00> : vector<16xf32>
    %440 = vector.multi_reduction <add>, %439, %cst_290 [0] : vector<32x16xf32> to vector<16xf32>
    %441 = vector.shape_cast %440 : vector<16xf32> to vector<1x16xf32>
    %442 = arith.addf %436, %441 : vector<1x16xf32>
    %cst_291 = arith.constant 1.280000e+02 : f32
    %443 = vector.broadcast %cst_291 : f32 to vector<1x16xf32>
    %444 = arith.divf %442, %443 : vector<1x16xf32>
    %cst_292 = arith.constant 9.99999974E-6 : f32
    %445 = vector.broadcast %cst_292 : f32 to vector<1x16xf32>
    %446 = arith.addf %444, %445 : vector<1x16xf32>
    %447 = math.rsqrt %446 : vector<1x16xf32>
    %c0_293 = arith.constant 0 : index
    %c0_294 = arith.constant 0 : index
    %448 = vector.load %arg19[%c0_293, %c0_294] : memref<1x16xf32, #tpu.memory_space<vmem>>, vector<1x16xf32>
    %449 = arith.mulf %447, %448 : vector<1x16xf32>
    %c0_295 = arith.constant 0 : index
    %c0_296 = arith.constant 0 : index
    %450 = vector.load %arg20[%c0_295, %c0_296] : memref<1x16xf32, #tpu.memory_space<vmem>>, vector<1x16xf32>
    %451 = arith.mulf %419, %449 : vector<1x16xf32>
    %452 = arith.subf %450, %451 : vector<1x16xf32>
    %453 = vector.broadcast %449 : vector<1x16xf32> to vector<32x16xf32>
    %454 = arith.mulf %400, %453 : vector<32x16xf32>
    %455 = vector.broadcast %452 : vector<1x16xf32> to vector<32x16xf32>
    %456 = arith.addf %454, %455 : vector<32x16xf32>
    %cst_297 = arith.constant 0.000000e+00 : f32
    %457 = vector.broadcast %cst_297 : f32 to vector<32x16xf32>
    %458 = arith.maximumf %456, %457 : vector<32x16xf32>
    %c0_298 = arith.constant 0 : index
    %c0_299 = arith.constant 0 : index
    %459 = vector.load %arg30[%c0_298, %c0_299] : memref<128x16xf32, #tpu.memory_space<vmem>>, vector<32x16xf32>
    tpu.vector_store %arg30[%c0_298, %c0_299], %458 {strides = array<i32>} : memref<128x16xf32, #tpu.memory_space<vmem>>, vector<32x16xf32>,
    %460 = vector.broadcast %449 : vector<1x16xf32> to vector<32x16xf32>
    %461 = arith.mulf %402, %460 : vector<32x16xf32>
    %462 = vector.broadcast %452 : vector<1x16xf32> to vector<32x16xf32>
    %463 = arith.addf %461, %462 : vector<32x16xf32>
    %cst_300 = arith.constant 0.000000e+00 : f32
    %464 = vector.broadcast %cst_300 : f32 to vector<32x16xf32>
    %465 = arith.maximumf %463, %464 : vector<32x16xf32>
    %c32_301 = arith.constant 32 : index
    %c0_302 = arith.constant 0 : index
    %466 = vector.load %arg30[%c32_301, %c0_302] : memref<128x16xf32, #tpu.memory_space<vmem>>, vector<32x16xf32>
    tpu.vector_store %arg30[%c32_301, %c0_302], %465 {strides = array<i32>} : memref<128x16xf32, #tpu.memory_space<vmem>>, vector<32x16xf32>,
    %467 = vector.broadcast %449 : vector<1x16xf32> to vector<32x16xf32>
    %468 = arith.mulf %404, %467 : vector<32x16xf32>
    %469 = vector.broadcast %452 : vector<1x16xf32> to vector<32x16xf32>
    %470 = arith.addf %468, %469 : vector<32x16xf32>
    %cst_303 = arith.constant 0.000000e+00 : f32
    %471 = vector.broadcast %cst_303 : f32 to vector<32x16xf32>
    %472 = arith.maximumf %470, %471 : vector<32x16xf32>
    %c64_304 = arith.constant 64 : index
    %c0_305 = arith.constant 0 : index
    %473 = vector.load %arg30[%c64_304, %c0_305] : memref<128x16xf32, #tpu.memory_space<vmem>>, vector<32x16xf32>
    tpu.vector_store %arg30[%c64_304, %c0_305], %472 {strides = array<i32>} : memref<128x16xf32, #tpu.memory_space<vmem>>, vector<32x16xf32>,
    %474 = vector.broadcast %449 : vector<1x16xf32> to vector<32x16xf32>
    %475 = arith.mulf %406, %474 : vector<32x16xf32>
    %476 = vector.broadcast %452 : vector<1x16xf32> to vector<32x16xf32>
    %477 = arith.addf %475, %476 : vector<32x16xf32>
    %cst_306 = arith.constant 0.000000e+00 : f32
    %478 = vector.broadcast %cst_306 : f32 to vector<32x16xf32>
    %479 = arith.maximumf %477, %478 : vector<32x16xf32>
    %c96_307 = arith.constant 96 : index
    %c0_308 = arith.constant 0 : index
    %480 = vector.load %arg30[%c96_307, %c0_308] : memref<128x16xf32, #tpu.memory_space<vmem>>, vector<32x16xf32>
    tpu.vector_store %arg30[%c96_307, %c0_308], %479 {strides = array<i32>} : memref<128x16xf32, #tpu.memory_space<vmem>>, vector<32x16xf32>,
    %c0_309 = arith.constant 0 : index
    %c0_310 = arith.constant 0 : index
    %481 = vector.load %arg30[%c0_309, %c0_310] : memref<128x16xf32, #tpu.memory_space<vmem>>, vector<128x16xf32>
    %c0_311 = arith.constant 0 : index
    %c0_312 = arith.constant 0 : index
    %482 = vector.load %arg21[%c0_311, %c0_312] : memref<16x12xf32, #tpu.memory_space<vmem>>, vector<16x3xf32>
    %cst_313 = arith.constant dense<0.000000e+00> : vector<128x3xf32>
    %483 = tpu.matmul %481, %482, %cst_313 {dimension_numbers = #tpu.dot_dimension_numbers<[1], [0], [0], [1], [0, 0, 1, 1], [], []>} : vector<128x16xf32>, vector<16x3xf32>, vector<128x3xf32> -> vector<128x3xf32>
    %c0_314 = arith.constant 0 : index
    %c3 = arith.constant 3 : index
    %484 = vector.load %arg21[%c0_314, %c3] : memref<16x12xf32, #tpu.memory_space<vmem>>, vector<16x3xf32>
    %cst_315 = arith.constant dense<0.000000e+00> : vector<128x3xf32>
    %485 = tpu.matmul %481, %484, %cst_315 {dimension_numbers = #tpu.dot_dimension_numbers<[1], [0], [0], [1], [0, 0, 1, 1], [], []>} : vector<128x16xf32>, vector<16x3xf32>, vector<128x3xf32> -> vector<128x3xf32>
    %c0_316 = arith.constant 0 : index
    %c6_317 = arith.constant 6 : index
    %486 = vector.load %arg21[%c0_316, %c6_317] : memref<16x12xf32, #tpu.memory_space<vmem>>, vector<16x3xf32>
    %cst_318 = arith.constant dense<0.000000e+00> : vector<128x3xf32>
    %487 = tpu.matmul %481, %486, %cst_318 {dimension_numbers = #tpu.dot_dimension_numbers<[1], [0], [0], [1], [0, 0, 1, 1], [], []>} : vector<128x16xf32>, vector<16x3xf32>, vector<128x3xf32> -> vector<128x3xf32>
    %c0_319 = arith.constant 0 : index
    %c9 = arith.constant 9 : index
    %488 = vector.load %arg21[%c0_319, %c9] : memref<16x12xf32, #tpu.memory_space<vmem>>, vector<16x3xf32>
    %cst_320 = arith.constant dense<0.000000e+00> : vector<128x3xf32>
    %489 = tpu.matmul %481, %488, %cst_320 {dimension_numbers = #tpu.dot_dimension_numbers<[1], [0], [0], [1], [0, 0, 1, 1], [], []>} : vector<128x16xf32>, vector<16x3xf32>, vector<128x3xf32> -> vector<128x3xf32>
    %cst_321 = arith.constant dense<0.000000e+00> : vector<3xf32>
    %490 = vector.multi_reduction <add>, %483, %cst_321 [0] : vector<128x3xf32> to vector<3xf32>
    %491 = vector.shape_cast %490 : vector<3xf32> to vector<1x3xf32>
    %cst_322 = arith.constant dense<0.000000e+00> : vector<3xf32>
    %492 = vector.multi_reduction <add>, %485, %cst_322 [0] : vector<128x3xf32> to vector<3xf32>
    %493 = vector.shape_cast %492 : vector<3xf32> to vector<1x3xf32>
    %494 = arith.addf %491, %493 : vector<1x3xf32>
    %cst_323 = arith.constant dense<0.000000e+00> : vector<3xf32>
    %495 = vector.multi_reduction <add>, %487, %cst_323 [0] : vector<128x3xf32> to vector<3xf32>
    %496 = vector.shape_cast %495 : vector<3xf32> to vector<1x3xf32>
    %497 = arith.addf %494, %496 : vector<1x3xf32>
    %cst_324 = arith.constant dense<0.000000e+00> : vector<3xf32>
    %498 = vector.multi_reduction <add>, %489, %cst_324 [0] : vector<128x3xf32> to vector<3xf32>
    %499 = vector.shape_cast %498 : vector<3xf32> to vector<1x3xf32>
    %500 = arith.addf %497, %499 : vector<1x3xf32>
    %cst_325 = arith.constant 5.120000e+02 : f32
    %501 = vector.broadcast %cst_325 : f32 to vector<1x3xf32>
    %502 = arith.divf %500, %501 : vector<1x3xf32>
    %503 = vector.broadcast %502 : vector<1x3xf32> to vector<128x3xf32>
    %504 = arith.subf %483, %503 : vector<128x3xf32>
    %505 = arith.mulf %504, %504 : vector<128x3xf32>
    %cst_326 = arith.constant dense<0.000000e+00> : vector<3xf32>
    %506 = vector.multi_reduction <add>, %505, %cst_326 [0] : vector<128x3xf32> to vector<3xf32>
    %507 = vector.shape_cast %506 : vector<3xf32> to vector<1x3xf32>
    %508 = vector.broadcast %502 : vector<1x3xf32> to vector<128x3xf32>
    %509 = arith.subf %485, %508 : vector<128x3xf32>
    %510 = arith.mulf %509, %509 : vector<128x3xf32>
    %cst_327 = arith.constant dense<0.000000e+00> : vector<3xf32>
    %511 = vector.multi_reduction <add>, %510, %cst_327 [0] : vector<128x3xf32> to vector<3xf32>
    %512 = vector.shape_cast %511 : vector<3xf32> to vector<1x3xf32>
    %513 = arith.addf %507, %512 : vector<1x3xf32>
    %514 = vector.broadcast %502 : vector<1x3xf32> to vector<128x3xf32>
    %515 = arith.subf %487, %514 : vector<128x3xf32>
    %516 = arith.mulf %515, %515 : vector<128x3xf32>
    %cst_328 = arith.constant dense<0.000000e+00> : vector<3xf32>
    %517 = vector.multi_reduction <add>, %516, %cst_328 [0] : vector<128x3xf32> to vector<3xf32>
    %518 = vector.shape_cast %517 : vector<3xf32> to vector<1x3xf32>
    %519 = arith.addf %513, %518 : vector<1x3xf32>
    %520 = vector.broadcast %502 : vector<1x3xf32> to vector<128x3xf32>
    %521 = arith.subf %489, %520 : vector<128x3xf32>
    %522 = arith.mulf %521, %521 : vector<128x3xf32>
    %cst_329 = arith.constant dense<0.000000e+00> : vector<3xf32>
    %523 = vector.multi_reduction <add>, %522, %cst_329 [0] : vector<128x3xf32> to vector<3xf32>
    %524 = vector.shape_cast %523 : vector<3xf32> to vector<1x3xf32>
    %525 = arith.addf %519, %524 : vector<1x3xf32>
    %cst_330 = arith.constant 5.120000e+02 : f32
    %526 = vector.broadcast %cst_330 : f32 to vector<1x3xf32>
    %527 = arith.divf %525, %526 : vector<1x3xf32>
    %cst_331 = arith.constant 9.99999974E-6 : f32
    %528 = vector.broadcast %cst_331 : f32 to vector<1x3xf32>
    %529 = arith.addf %527, %528 : vector<1x3xf32>
    %530 = math.rsqrt %529 : vector<1x3xf32>
    %c0_332 = arith.constant 0 : index
    %c0_333 = arith.constant 0 : index
    %531 = vector.load %arg22[%c0_332, %c0_333] : memref<1x3xf32, #tpu.memory_space<vmem>>, vector<1x3xf32>
    %532 = arith.mulf %530, %531 : vector<1x3xf32>
    %c0_334 = arith.constant 0 : index
    %c0_335 = arith.constant 0 : index
    %533 = vector.load %arg23[%c0_334, %c0_335] : memref<1x3xf32, #tpu.memory_space<vmem>>, vector<1x3xf32>
    %534 = arith.mulf %502, %532 : vector<1x3xf32>
    %535 = arith.subf %533, %534 : vector<1x3xf32>
    %536 = vector.broadcast %532 : vector<1x3xf32> to vector<128x3xf32>
    %537 = arith.mulf %483, %536 : vector<128x3xf32>
    %538 = vector.broadcast %535 : vector<1x3xf32> to vector<128x3xf32>
    %539 = arith.addf %537, %538 : vector<128x3xf32>
    %540 = arith.negf %539 : vector<128x3xf32>
    %541 = math.exp %540 : vector<128x3xf32>
    %cst_336 = arith.constant 1.000000e+00 : f32
    %542 = vector.broadcast %cst_336 : f32 to vector<128x3xf32>
    %543 = arith.addf %542, %541 : vector<128x3xf32>
    %544 = arith.divf %542, %543 : vector<128x3xf32>
    %c0_337 = arith.constant 0 : index
    %c0_338 = arith.constant 0 : index
    %545 = vector.load %arg24[%c0_337, %c0_338] : memref<512x3xf32, #tpu.memory_space<vmem>>, vector<128x3xf32>
    tpu.vector_store %arg24[%c0_337, %c0_338], %544 {strides = array<i32>} : memref<512x3xf32, #tpu.memory_space<vmem>>, vector<128x3xf32>,
    %546 = vector.broadcast %532 : vector<1x3xf32> to vector<128x3xf32>
    %547 = arith.mulf %485, %546 : vector<128x3xf32>
    %548 = vector.broadcast %535 : vector<1x3xf32> to vector<128x3xf32>
    %549 = arith.addf %547, %548 : vector<128x3xf32>
    %550 = arith.negf %549 : vector<128x3xf32>
    %551 = math.exp %550 : vector<128x3xf32>
    %cst_339 = arith.constant 1.000000e+00 : f32
    %552 = vector.broadcast %cst_339 : f32 to vector<128x3xf32>
    %553 = arith.addf %552, %551 : vector<128x3xf32>
    %554 = arith.divf %552, %553 : vector<128x3xf32>
    %c128_340 = arith.constant 128 : index
    %c0_341 = arith.constant 0 : index
    %555 = vector.load %arg24[%c128_340, %c0_341] : memref<512x3xf32, #tpu.memory_space<vmem>>, vector<128x3xf32>
    tpu.vector_store %arg24[%c128_340, %c0_341], %554 {strides = array<i32>} : memref<512x3xf32, #tpu.memory_space<vmem>>, vector<128x3xf32>,
    %556 = vector.broadcast %532 : vector<1x3xf32> to vector<128x3xf32>
    %557 = arith.mulf %487, %556 : vector<128x3xf32>
    %558 = vector.broadcast %535 : vector<1x3xf32> to vector<128x3xf32>
    %559 = arith.addf %557, %558 : vector<128x3xf32>
    %560 = arith.negf %559 : vector<128x3xf32>
    %561 = math.exp %560 : vector<128x3xf32>
    %cst_342 = arith.constant 1.000000e+00 : f32
    %562 = vector.broadcast %cst_342 : f32 to vector<128x3xf32>
    %563 = arith.addf %562, %561 : vector<128x3xf32>
    %564 = arith.divf %562, %563 : vector<128x3xf32>
    %c256 = arith.constant 256 : index
    %c0_343 = arith.constant 0 : index
    %565 = vector.load %arg24[%c256, %c0_343] : memref<512x3xf32, #tpu.memory_space<vmem>>, vector<128x3xf32>
    tpu.vector_store %arg24[%c256, %c0_343], %564 {strides = array<i32>} : memref<512x3xf32, #tpu.memory_space<vmem>>, vector<128x3xf32>,
    %566 = vector.broadcast %532 : vector<1x3xf32> to vector<128x3xf32>
    %567 = arith.mulf %489, %566 : vector<128x3xf32>
    %568 = vector.broadcast %535 : vector<1x3xf32> to vector<128x3xf32>
    %569 = arith.addf %567, %568 : vector<128x3xf32>
    %570 = arith.negf %569 : vector<128x3xf32>
    %571 = math.exp %570 : vector<128x3xf32>
    %cst_344 = arith.constant 1.000000e+00 : f32
    %572 = vector.broadcast %cst_344 : f32 to vector<128x3xf32>
    %573 = arith.addf %572, %571 : vector<128x3xf32>
    %574 = arith.divf %572, %573 : vector<128x3xf32>
    %c384 = arith.constant 384 : index
    %c0_345 = arith.constant 0 : index
    %575 = vector.load %arg24[%c384, %c0_345] : memref<512x3xf32, #tpu.memory_space<vmem>>, vector<128x3xf32>
    tpu.vector_store %arg24[%c384, %c0_345], %574 {strides = array<i32>} : memref<512x3xf32, #tpu.memory_space<vmem>>, vector<128x3xf32>,
    return
  }
}

</mosaic_0001>

<bundles_post_ra>
// kernel: _lambda_.1
= control target key start
LH: loop header
LB: loop body
LE: loop exit
PB: predicated region body
PF: predicated region fallthrough
CT: control target
= control target key end

     0   :  { %vm254_vm0 = vcmask 130048   ;;  %vm8525_vm1 = vmmov 0   ;;  %vm863_vm2 = vcmask 261120   ;;  %vm1246_vm3 = vcmask 523264   ;;  %s11257_s2 = inlined_call_operand.vmem [shape: f32[128,16], index: 2, kind: input, shape index: {}]   ;;  %s11258_s0 = inlined_call_operand.vmem [shape: f32[128,128], index: 0, kind: input, shape index: {}]   ;;  %s11259_s5 = inlined_call_operand.vmem [shape: f32[64,32], index: 5, kind: input, shape index: {}]   ;;  %s11260_s3 = inlined_call_operand.vmem [shape: f32[1,16], index: 3, kind: input, shape index: {}, may-alias: {3,19}]   ;;  %s11261_s4 = inlined_call_operand.vmem [shape: f32[1,16], index: 4, kind: input, shape index: {}, may-alias: {4,20}]   ;;  %s11262_s8 = inlined_call_operand.vmem [shape: f32[128,64], index: 8, kind: input, shape index: {}]   ;;  %s11263_s6 = inlined_call_operand.vmem [shape: f32[1,32], index: 6, kind: input, shape index: {}, may-alias: {6,16}]   ;;  %s11264_s7 = inlined_call_operand.vmem [shape: f32[1,32], index: 7, kind: input, shape index: {}, may-alias: {7,17}]   ;;  %s11265_s11 = inlined_call_operand.vmem [shape: f32[256,32], index: 11, kind: input, shape index: {}]   ;;  %s11266_s9 = inlined_call_operand.vmem [shape: f32[1,64], index: 9, kind: input, shape index: {}]   ;;  %s11267_s10 = inlined_call_operand.vmem [shape: f32[1,64], index: 10, kind: input, shape index: {}]   ;;  %s11268_s1 = inlined_call_operand.vmem [shape: f32[128,128], index: 1, kind: input, shape index: {}]   ;;  %s11269_s13 = inlined_call_operand.vmem [shape: f32[32,256], index: 13, kind: input, shape index: {}]   ;;  %s11270_s14 = inlined_call_operand.vmem [shape: f32[1,256], index: 14, kind: input, shape index: {}]   ;;  %s11271_s15 = inlined_call_operand.vmem [shape: f32[64,128], index: 15, kind: input, shape index: {}]   ;;  %s11272_s12 = inlined_call_operand.vmem [shape: f32[1,32], index: 12, kind: input, shape index: {}]   ;;  %s11273_s18 = inlined_call_operand.vmem [shape: f32[32,64], index: 18, kind: input, shape index: {}]   ;;  %s11274_s21 = inlined_call_operand.vmem [shape: f32[16,12], index: 21, kind: input, shape index: {}]   ;;  %s11275_s16 = inlined_call_operand.vmem [shape: f32[1,32], index: 16, kind: input, shape index: {}, may-alias: {6,16}]   ;;  %s11276_s17 = inlined_call_operand.vmem [shape: f32[1,32], index: 17, kind: input, shape index: {}, may-alias: {7,17}]   ;;  %s11277_s19 = inlined_call_operand.vmem [shape: f32[1,16], index: 19, kind: input, shape index: {}, may-alias: {3,19}]   ;;  %s11278_s20 = inlined_call_operand.vmem [shape: f32[1,16], index: 20, kind: input, shape index: {}, may-alias: {4,20}]   ;;  %s11279_s22 = inlined_call_operand.vmem [shape: f32[1,3], index: 22, kind: input, shape index: {}]   ;;  %s11280_s23 = inlined_call_operand.vmem [shape: f32[1,3], index: 23, kind: input, shape index: {}]   ;;  %s11281_s24 = inlined_call_operand.vmem [shape: f32[512,3], index: 24, kind: output, shape index: {}]  }
   0x1   :  { %11351 = sst [smem:[#allocation44_spill]] %s11257_s2  ;;  %vm3267_vm4 = vcmask 517120   ;;  %vm5337_vm5 = vcmask 23552  }
   0x2   :  { %11352 = sst [smem:[#allocation45_spill]] %s11258_s0  ;;  %s11363_s27 = sld [smem:[#allocation44_spill]] }
   0x3   :  { %11353 = sst [smem:[#allocation46_spill]] %s11259_s5 }
   0x4   :  { %11354 = sst [smem:[#allocation47_spill]] %s11260_s3  ;;  %s11365_s26 = sld [smem:[#allocation46_spill]] }
   0x5   :  { %11355 = sst [smem:[#allocation48_spill]] %s11261_s4  ;;  %s11366_s3 = sld [smem:[#allocation47_spill]] }
   0x6   :  { %11356 = sst [smem:[#allocation49_spill]] %s11262_s8  ;;  %s11364_s8 = sld [smem:[#allocation45_spill]] }
   0x7   :  { %11357 = sst [smem:[#allocation50_spill]] %s11263_s6  ;;  %s11368_s4 = sld [smem:[#allocation48_spill]] }
   0x8   :  { %11358 = sst [smem:[#allocation51_spill]] %s11264_s7  ;;  %v93_v0 = vld [vmem:[%s11363_s27] sm:$0xff]  ;;  %v94_v1 = vld [vmem:[%s11363_s27 + $0x8] sm:$0xff]  ;;  %v95_v2 = vld [vmem:[%s11363_s27 + $0x10] sm:$0xff]  ;;  %s11370_s30 = sld [smem:[#allocation50_spill]] }
   0x9   :  { %11359 = sst [smem:[#allocation52_spill]] %s11265_s11  ;;  %v7690_v3 = vpack.c.bf16 %v94_v1, %v93_v0  ;;  %v96_v4 = vld [vmem:[%s11363_s27 + $0x18] sm:$0xff]  ;;  %v97_v6 = vld [vmem:[%s11363_s27 + $0x20] sm:$0xff]  ;;  %v98_v7 = vld [vmem:[%s11363_s27 + $0x28] sm:$0xff]  ;;  %s11369_s11 = sld [smem:[#allocation49_spill]] }
   0xa   :  { %11360 = sst [smem:[#allocation53_spill]] %s11279_s22  ;;  %v7694_v5 = vpack.c.bf16 %v96_v4, %v95_v2  ;;  %v7698_v8 = vpack.c.bf16 %v98_v7, %v97_v6  ;;  %v99_v10 = vld [vmem:[%s11363_s27 + $0x30] sm:$0xff]  ;;  %v100_v11 = vld [vmem:[%s11363_s27 + $0x38] sm:$0xff]  ;;  %v101_v13 = vld [vmem:[%s11363_s27 + $0x40] sm:$0xff]  ;;  %s11371_s28 = sld [smem:[#allocation51_spill]] }
   0xb   :  { %11361 = sst [smem:[#allocation54_spill]] %s11280_s23  ;;  %7691 = vmatprep.subr.bf16.mxu0 %v7690_v3  ;;  %v7702_v12 = vpack.c.bf16 %v100_v11, %v99_v10  ;;  %v102_v14 = vld [vmem:[%s11363_s27 + $0x48] sm:$0xff]  ;;  %v103_v16 = vld [vmem:[%s11363_s27 + $0x50] sm:$0xff]  ;;  %v104_v17 = vld [vmem:[%s11363_s27 + $0x58] sm:$0xff]  ;;  %s11372_s5 = sld [smem:[#allocation52_spill]] }
   0xc   :  { %11362 = sst [smem:[#allocation55_spill]] %s11281_s24  ;;  %7693 = vmatpush3.bf16.msra.mxu0 %v7690_v3  ;;  %v77_v9 = vld [vmem:[%s11364_s8] sm:$0xff]  ;;  %v7706_v15 = vpack.c.bf16 %v102_v14, %v101_v13  ;;  %v7710_v18 = vpack.c.bf16 %v104_v17, %v103_v16  ;;  %v106_v20 = vld [vmem:[%s11363_s27 + $0x68] sm:$0xff]  ;;  %v107_v22 = vld [vmem:[%s11363_s27 + $0x70] sm:$0xff]  ;;  %s8529_s6 = smov 32  }
   0xd   :  { %7695 = vmatprep.subr.bf16.mxu0 %v7694_v5  ;;  %7002 = vmatprep.mubr.f32.mxu0 %v77_v9  ;;  %v105_v19 = vld [vmem:[%s11363_s27 + $0x60] sm:$0xff]  ;;  %v108_v23 = vld [vmem:[%s11363_s27 + $0x78] sm:$0xff]  ;;  %v78_v25 = vld [vmem:[%s11364_s8 + $0x8] sm:$0xff]  ;;  %s8533_s23 = smov 122   ;;  %s11451_s29 = sld [smem:[#allocation55_spill]] }
   0xe   :  { %v7714_v21 = vpack.c.bf16 %v106_v20, %v105_v19  ;;  %v7718_v24 = vpack.c.bf16 %v108_v23, %v107_v22  ;;  %v79_v26 = vld [vmem:[%s11364_s8 + $0x10] sm:$0xff]  ;;  %v80_v27 = vld [vmem:[%s11364_s8 + $0x18] sm:$0xff]  ;;  %v81_v28 = vld [vmem:[%s11364_s8 + $0x20] sm:$0xff] }
   0xf   :  { %v82_v29 = vld [vmem:[%s11364_s8 + $0x28] sm:$0xff]  ;;  %v83_v30 = vld [vmem:[%s11364_s8 + $0x30] sm:$0xff]  ;;  %v84_v31 = vld [vmem:[%s11364_s8 + $0x38] sm:$0xff] }
  0x10   :  { %7697 = vmatpush3.bf16.msra.mxu0 %v7694_v5  ;;  %v85_v32 = vld [vmem:[%s11364_s8 + $0x40] sm:$0xff]  ;;  %v86_v33 = vld [vmem:[%s11364_s8 + $0x48] sm:$0xff]  ;;  %v87_v34 = vld [vmem:[%s11364_s8 + $0x50] sm:$0xff] }
  0x11   :  { %7699 = vmatprep.subr.bf16.mxu0 %v7698_v8  ;;  %v88_v35 = vld [vmem:[%s11364_s8 + $0x58] sm:$0xff]  ;;  %v89_v36 = vld [vmem:[%s11364_s8 + $0x60] sm:$0xff]  ;;  %v90_v37 = vld [vmem:[%s11364_s8 + $0x68] sm:$0xff] }
  0x12   :  { %v91_v38 = vld [vmem:[%s11364_s8 + $0x70] sm:$0xff]  ;;  %v92_v39 = vld [vmem:[%s11364_s8 + $0x78] sm:$0xff]  ;;  %v447_v62 = vld [vmem:[%s11365_s26] sm:$0xff]  ;;  %s11431_s8 = sld [smem:[#allocation54_spill]] }
  0x13   :  { %v453_v46 = vld [vmem:[%s11365_s26 + $0x10] sm:$0xff]  ;;  %v454_v47 = vld [vmem:[%s11365_s26 + $0x18] sm:$0xff]  ;;  %v448_v63 = vld [vmem:[%s11365_s26 + $0x8] sm:$0xff] }
  0x14   :  { %7701 = vmatpush3.bf16.msra.mxu0 %v7698_v8  ;;  %v7722_v49 = vpack.c.bf16 %v454_v47, %v453_v46  ;;  %v8778_v1 = vpack.c.bf16 %v448_v63, %v447_v62 }
  0x15   :  { %7703 = vmatprep.subr.bf16.mxu0 %v7702_v12 }
  0x16   :  { %7723 = vmatprep.subr.bf16.mxu1 %v7722_v49 }
  0x17   :  { %7725 = vmatpush3.bf16.msra.mxu1 %v7722_v49 }
  0x18   :  { %7705 = vmatpush3.bf16.msra.mxu0 %v7702_v12  ;;  %7727 = vmatprep.subr.bf16.mxu1 %v8778_v1 }
  0x19   :  { %7707 = vmatprep.subr.bf16.mxu0 %v7706_v15 }
  0x1c   :  { %7709 = vmatpush3.bf16.msra.mxu0 %v7706_v15 }
  0x1d   :  { %7711 = vmatprep.subr.bf16.mxu0 %v7710_v18 }
  0x20   :  { %7713 = vmatpush3.bf16.msra.mxu0 %v7710_v18 }
  0x21   :  { %7715 = vmatprep.subr.bf16.mxu0 %v7714_v21 }
  0x24   :  { %7717 = vmatpush3.bf16.msra.mxu0 %v7714_v21 }
  0x25   :  { %7719 = vmatprep.subr.bf16.mxu0 %v7718_v24 }
  0x28   :  { %7721 = vmatpush3.bf16.msra.mxu0 %v7718_v24 }
  0x2b   :  { %7003 = vmatmul.mubr.f32.vlgmr.msra.gmra.mrb[0].mxu0 %v78_v25 }
  0x2c   :  { %7005 = vmatprep.mubr.f32.mxu0 %v79_v26 }
  0x2f   :  { %7006 = vmatmul.mubr.f32.gmra.mrb[2].mxu0 %v80_v27 }
  0x30   :  { %7008 = vmatprep.mubr.f32.mxu0 %v81_v28 }
  0x33   :  { %7009 = vmatmul.mubr.f32.gmra.mrb[4].mxu0 %v82_v29 }
  0x34   :  { %7011 = vmatprep.mubr.f32.mxu0 %v83_v30 }
  0x37   :  { %7012 = vmatmul.mubr.f32.gmra.mrb[6].mxu0 %v84_v31 }
  0x38   :  { %7014 = vmatprep.mubr.f32.mxu0 %v85_v32 }
  0x3b   :  { %7015 = vmatmul.mubr.f32.gmra.mrb[8].mxu0 %v86_v33 }
  0x3c   :  { %7017 = vmatprep.mubr.f32.mxu0 %v87_v34 }
  0x3f   :  { %7018 = vmatmul.mubr.f32.gmra.mrb[10].mxu0 %v88_v35 }
  0x40   :  { %7020 = vmatprep.mubr.f32.mxu0 %v89_v36 }
  0x43   :  { %7021 = vmatmul.mubr.f32.gmra.mrb[12].mxu0 %v90_v37 }
  0x44   :  { %7023 = vmatprep.mubr.f32.mxu0 %v91_v38 }
  0x47   :  { %7024 = vmatmul.mubr.f32.gmra.mrb[14].mxu0 %v92_v39 }
  0xfe   :  { %v8756_v40 = vpop.f32.mrb[0].mxu0 }
  0xff   :  { %v256_v41 = vsel %vm254_vm0, %v8756_v40, 0.0  ;;  %v175_v42 = vpop.f32.mrb[1].mxu0 }
 0x100   :  { %v255_v43 = vsel %vm254_vm0, %v175_v42, 0.0 }
 0x101   :  { %v257_v44 = vadd.f32 %v256_v41, %v255_v43 }
 0x102   :  { %v7007_v45 = vpop.f32.mrb[2].mxu0 }
 0x103   :  { %v185_v48 = vpop.f32.mrb[3].mxu0  ;;  %v260_v52 = vsel %vm254_vm0, %v7007_v45, 0.0 }
 0x104   :  { %v258_v50 = vsel %vm254_vm0, %v185_v48, 0.0 }
 0x105   :  { %v259_v51 = vadd.f32 %v258_v50, %v257_v44 }
 0x106   :  { %v7010_v53 = vpop.f32.mrb[4].mxu0 }
 0x107   :  { %v195_v54 = vpop.f32.mrb[5].mxu0  ;;  %v261_v55 = vadd.f32 %v260_v52, %v259_v51  ;;  %v264_v58 = vsel %vm254_vm0, %v7010_v53, 0.0 }
 0x108   :  { %v262_v56 = vsel %vm254_vm0, %v195_v54, 0.0 }
 0x109   :  { %v263_v57 = vadd.f32 %v262_v56, %v261_v55 }
 0x10a   :  { %v7013_v59 = vpop.f32.mrb[6].mxu0 }
 0x10b   :  { %v205_v60 = vpop.f32.mrb[7].mxu0  ;;  %v265_v61 = vadd.f32 %v264_v58, %v263_v57  ;;  %v268_v3 = vsel %vm254_vm0, %v7013_v59, 0.0 }
 0x10c   :  { %v266_v0 = vsel %vm254_vm0, %v205_v60, 0.0 }
 0x10d   :  { %v267_v2 = vadd.f32 %v266_v0, %v265_v61 }
 0x10e   :  { %v7016_v4 = vpop.f32.mrb[8].mxu0 }
 0x10f   :  { %v215_v5 = vpop.f32.mrb[9].mxu0  ;;  %v269_v6 = vadd.f32 %v268_v3, %v267_v2  ;;  %v272_v9 = vsel %vm254_vm0, %v7016_v4, 0.0 }
 0x110   :  { %v270_v7 = vsel %vm254_vm0, %v215_v5, 0.0 }
 0x111   :  { %v271_v8 = vadd.f32 %v270_v7, %v269_v6 }
 0x112   :  { %v7019_v10 = vpop.f32.mrb[10].mxu0 }
 0x113   :  { %v225_v11 = vpop.f32.mrb[11].mxu0  ;;  %v273_v12 = vadd.f32 %v272_v9, %v271_v8  ;;  %v276_v15 = vsel %vm254_vm0, %v7019_v10, 0.0 }
 0x114   :  { %v274_v13 = vsel %vm254_vm0, %v225_v11, 0.0 }
 0x115   :  { %v275_v14 = vadd.f32 %v274_v13, %v273_v12 }
 0x116   :  { %v7022_v16 = vpop.f32.mrb[12].mxu0 }
 0x117   :  { %v235_v17 = vpop.f32.mrb[13].mxu0  ;;  %v277_v18 = vadd.f32 %v276_v15, %v275_v14  ;;  %v280_v21 = vsel %vm254_vm0, %v7022_v16, 0.0 }
 0x118   :  { %v278_v19 = vsel %vm254_vm0, %v235_v17, 0.0 }
 0x119   :  { %v279_v20 = vadd.f32 %v278_v19, %v277_v18 }
 0x11a   :  { %v7025_v22 = vpop.f32.mrb[14].mxu0 }
 0x11b   :  { %v245_v23 = vpop.f32.mrb[15].mxu0  ;;  %v281_v24 = vadd.f32 %v280_v21, %v279_v20  ;;  %v284_v27 = vsel %vm254_vm0, %v7025_v22, 0.0 }
 0x11c   :  { %v282_v25 = vsel %vm254_vm0, %v245_v23, 0.0 }
 0x11d   :  { %v283_v26 = vadd.f32 %v282_v25, %v281_v24 }
 0x11f   :  { %v285_v28 = vadd.f32 %v284_v27, %v283_v26 }
 0x121   :  { %v286_v29 = vrot.slane %v285_v28, 4 }
 0x123   :  { %v287_v30 = vadd.f32 %v286_v29, %v285_v28 }
 0x125   :  { %v288_v31 = vrot.slane %v287_v30, 2 }
 0x127   :  { %v289_v32 = vadd.f32 %v288_v31, %v287_v30 }
 0x129   :  { %v290_v33 = vrot.slane %v289_v32, 1 }
 0x12b   :  { %v291_v34 = vadd.f32 %v290_v33, %v289_v32 }
 0x12d   :  { %v293_v35 = vmul.f32 0.0078125, %v291_v34 }
 0x12f   :  { %v8790_v36 = vsub.f32 %v175_v42, %v293_v35  ;;  %v8793_v37 = vsub.f32 %v8756_v40, %v293_v35  ;;  %v8795_v38 = vsub.f32 %v185_v48, %v293_v35  ;;  %v8797_v39 = vsub.f32 %v7007_v45, %v293_v35 }
 0x130   :  { %v8799_v41 = vsub.f32 %v195_v54, %v293_v35  ;;  %v8801_v43 = vsub.f32 %v7010_v53, %v293_v35  ;;  %v8803_v44 = vsub.f32 %v205_v60, %v293_v35  ;;  %v8805_v46 = vsub.f32 %v7013_v59, %v293_v35 }
 0x131   :  { %v8807_v47 = vsub.f32 %v215_v5, %v293_v35  ;;  %v8809_v49 = vsub.f32 %v7016_v4, %v293_v35  ;;  %v8811_v42 = vsub.f32 %v225_v11, %v293_v35  ;;  %v8813_v40 = vsub.f32 %v7019_v10, %v293_v35 }
 0x132   :  { %v8815_v48 = vsub.f32 %v235_v17, %v293_v35  ;;  %v8817_v45 = vsub.f32 %v7022_v16, %v293_v35  ;;  %v8819_v50 = vsub.f32 %v245_v23, %v293_v35  ;;  %v8821_v51 = vsub.f32 %v7025_v22, %v293_v35 }
 0x133   :  { %v310_v52 = vmul.f32 %v8790_v36, %v8790_v36  ;;  %v311_v53 = vmul.f32 %v8793_v37, %v8793_v37  ;;  %v312_v54 = vmul.f32 %v8795_v38, %v8795_v38  ;;  %v313_v55 = vmul.f32 %v8797_v39, %v8797_v39 }
 0x134   :  { %v314_v59 = vmul.f32 %v8799_v41, %v8799_v41  ;;  %v315_v62 = vmul.f32 %v8801_v43, %v8801_v43  ;;  %v316_v2 = vmul.f32 %v8803_v44, %v8803_v44  ;;  %v317_v5 = vmul.f32 %v8805_v46, %v8805_v46 }
 0x135   :  { %v326_v56 = vsel %vm254_vm0, %v310_v52, 0.0  ;;  %v327_v57 = vsel %vm254_vm0, %v311_v53, 0.0  ;;  %v329_v60 = vsel %vm254_vm0, %v312_v54, 0.0  ;;  %v331_v63 = vsel %vm254_vm0, %v313_v55, 0.0 }
 0x136   :  { %v328_v58 = vadd.f32 %v327_v57, %v326_v56  ;;  %v333_v3 = vsel %vm254_vm0, %v314_v59, 0.0  ;;  %v335_v6 = vsel %vm254_vm0, %v315_v62, 0.0  ;;  %v318_v8 = vmul.f32 %v8807_v47, %v8807_v47  ;;  %v366_v62 = vld [vmem:[%s11366_s3] sm:$0x1] }
 0x137   :  { %v337_v9 = vsel %vm254_vm0, %v316_v2, 0.0  ;;  %v319_v11 = vmul.f32 %v8809_v49, %v8809_v49  ;;  %v339_v12 = vsel %vm254_vm0, %v317_v5, 0.0  ;;  %v320_v14 = vmul.f32 %v8811_v42, %v8811_v42 }
 0x138   :  { %v330_v61 = vadd.f32 %v329_v60, %v328_v58  ;;  %v341_v15 = vsel %vm254_vm0, %v318_v8, 0.0  ;;  %v321_v17 = vmul.f32 %v8813_v40, %v8813_v40  ;;  %v322_v20 = vmul.f32 %v8815_v48, %v8815_v48 }
 0x139   :  { %v343_v18 = vsel %vm254_vm0, %v319_v11, 0.0  ;;  %v345_v21 = vsel %vm254_vm0, %v320_v14, 0.0  ;;  %v323_v23 = vmul.f32 %v8817_v45, %v8817_v45  ;;  %v324_v26 = vmul.f32 %v8819_v50, %v8819_v50 }
 0x13a   :  { %v332_v0 = vadd.f32 %v331_v63, %v330_v61  ;;  %v347_v24 = vsel %vm254_vm0, %v321_v17, 0.0  ;;  %v349_v27 = vsel %vm254_vm0, %v322_v20, 0.0  ;;  %v325_v29 = vmul.f32 %v8821_v51, %v8821_v51 }
 0x13b   :  { %v351_v30 = vsel %vm254_vm0, %v323_v23, 0.0  ;;  %v353_v32 = vsel %vm254_vm0, %v324_v26, 0.0  ;;  %v368_v60 = vlaneseq }
 0x13c   :  { %v334_v4 = vadd.f32 %v333_v3, %v332_v0  ;;  %v355_v34 = vsel %vm254_vm0, %v325_v29, 0.0 }
 0x13d   :  { %v369_v61 = vshrl.u32 %v368_v60, 7  ;;  %v760_v60 = vld [vmem:[%s11365_s26 + $0x30] sm:$0xff] }
 0x13e   :  { %v336_v7 = vadd.f32 %v335_v6, %v334_v4 }
 0x13f   :  { %v8874_v63 = vsub.s32 0, %v369_v61  ;;  %v761_v61 = vld [vmem:[%s11365_s26 + $0x38] sm:$0xff] }
 0x140   :  { %v338_v10 = vadd.f32 %v337_v9, %v336_v7 }
 0x141   :  { %11367 = vst [vmem:[#allocation8_spill] sm:$0xff] %v8874_v63 }
 0x142   :  { %v340_v13 = vadd.f32 %v339_v12, %v338_v10  ;;  %v6368_v12 = vld [vmem:[%s11368_s4] ss:$0 sm:$0xff] }
 0x144   :  { %v342_v16 = vadd.f32 %v341_v15, %v340_v13 }
 0x146   :  { %v344_v19 = vadd.f32 %v343_v18, %v342_v16 }
 0x148   :  { %v346_v22 = vadd.f32 %v345_v21, %v344_v19 }
 0x14a   :  { %v348_v25 = vadd.f32 %v347_v24, %v346_v22 }
 0x14c   :  { %v350_v28 = vadd.f32 %v349_v27, %v348_v25 }
 0x14e   :  { %v352_v31 = vadd.f32 %v351_v30, %v350_v28 }
 0x150   :  { %v354_v33 = vadd.f32 %v353_v32, %v352_v31 }
 0x152   :  { %v356_v35 = vadd.f32 %v355_v34, %v354_v33 }
 0x154   :  { %v357_v52 = vrot.slane %v356_v35, 4 }
 0x156   :  { %v358_v53 = vadd.f32 %v357_v52, %v356_v35 }
 0x158   :  { %v359_v54 = vrot.slane %v358_v53, 2 }
 0x15a   :  { %v360_v55 = vadd.f32 %v359_v54, %v358_v53  ;;  %v653_v53 = vld [vmem:[%s11365_s26 + $0x20] sm:$0xff]  ;;  %v654_v54 = vld [vmem:[%s11365_s26 + $0x28] sm:$0xff] }
 0x15c   :  { %v361_v56 = vrot.slane %v360_v55, 1 }
 0x15e   :  { %v362_v57 = vadd.f32 %v361_v56, %v360_v55 }
 0x160   :  { %v363_v58 = vmul.f32 0.0078125, %v362_v57  ;;  %v7730_v57 = vpack.c.bf16 %v654_v54, %v653_v53 }
 0x162   :  { %v364_v59 = vadd.f32 1e-05, %v363_v58 }
 0x164   :  { %8226 = vrsqrt.f32 %v364_v59 }
 0x16e   :  { %v8227_v0 = vpop.eup %8226 }
 0x16f   :  { %v367_v2 = vmul.f32 %v8227_v0, %v366_v62  ;;  %v7734_v0 = vpack.c.bf16 %v761_v61, %v760_v60  ;;  %v903_v61 = vld [vmem:[%s11370_s30] sm:$0x1] }
 0x171   :  { %v371_v3 = vrot.slane %v367_v2, %v8874_v63 }
 0x173   :  { %v372_v4 = vmul.f32 %v371_v3, %v8790_v36  ;;  %v373_v5 = vmul.f32 %v371_v3, %v8793_v37  ;;  %v374_v6 = vmul.f32 %v371_v3, %v8795_v38  ;;  %v375_v7 = vmul.f32 %v371_v3, %v8797_v39 }
 0x174   :  { %v376_v8 = vmul.f32 %v371_v3, %v8799_v41  ;;  %v377_v9 = vmul.f32 %v371_v3, %v8801_v43  ;;  %v378_v10 = vmul.f32 %v371_v3, %v8803_v44  ;;  %v379_v11 = vmul.f32 %v371_v3, %v8805_v46 }
 0x175   :  { %v380_v36 = vmul.f32 %v371_v3, %v8807_v47  ;;  %v381_v37 = vmul.f32 %v371_v3, %v8809_v49  ;;  %v382_v38 = vmul.f32 %v371_v3, %v8811_v42  ;;  %v383_v39 = vmul.f32 %v371_v3, %v8813_v40 }
 0x176   :  { %v384_v41 = vmul.f32 %v371_v3, %v8815_v48  ;;  %v385_v43 = vmul.f32 %v371_v3, %v8817_v45  ;;  %v386_v44 = vmul.f32 %v371_v3, %v8819_v50  ;;  %v387_v46 = vmul.f32 %v371_v3, %v8821_v51 }
 0x177   :  { %v396_v13 = vadd.f32 %v6368_v12, %v373_v5  ;;  %v398_v14 = vadd.f32 %v6368_v12, %v375_v7  ;;  %v400_v15 = vadd.f32 %v6368_v12, %v377_v9  ;;  %v401_v16 = vadd.f32 %v6368_v12, %v378_v10 }
 0x178   :  { %v402_v17 = vadd.f32 %v6368_v12, %v379_v11  ;;  %v403_v47 = vadd.f32 %v6368_v12, %v380_v36  ;;  %v404_v18 = vadd.f32 %v6368_v12, %v381_v37  ;;  %v405_v49 = vadd.f32 %v6368_v12, %v382_v38  ;;  %v939_v36 = vld [vmem:[%s11369_s11 + $0x28] sm:$0xff] }
 0x179   :  { %v406_v19 = vadd.f32 %v6368_v12, %v383_v39  ;;  %v407_v42 = vadd.f32 %v6368_v12, %v384_v41  ;;  %v408_v20 = vadd.f32 %v6368_v12, %v385_v43  ;;  %v409_v40 = vadd.f32 %v6368_v12, %v386_v44  ;;  %v940_v39 = vld [vmem:[%s11369_s11 + $0x30] sm:$0xff]  ;;  %v941_v41 = vld [vmem:[%s11369_s11 + $0x38] sm:$0xff] }
 0x17a   :  { %v410_v21 = vadd.f32 %v6368_v12, %v387_v46  ;;  %v412_v48 = vmax.f32 %v396_v13, 0.0  ;;  %v416_v22 = vmax.f32 %v400_v15, 0.0  ;;  %v417_v45 = vmax.f32 %v401_v16, 0.0 }
 0x17b   :  { %v418_v23 = vmax.f32 %v402_v17, 0.0  ;;  %v419_v50 = vmax.f32 %v403_v47, 0.0  ;;  %v420_v24 = vmax.f32 %v404_v18, 0.0  ;;  %v421_v51 = vmax.f32 %v405_v49, 0.0 }
 0x17c   :  { %v422_v25 = vmax.f32 %v406_v19, 0.0  ;;  %v423_v26 = vmax.f32 %v407_v42, 0.0  ;;  %v424_v27 = vmax.f32 %v408_v20, 0.0  ;;  %v425_v28 = vmax.f32 %v409_v40, 0.0  ;;  %433 = vst.msk [vmem:[#allocation2 + $0x30] sm:$0xff] %vm254_vm0, %v417_v45  ;;  %428 = vst.msk [vmem:[#allocation2 + $0x8] sm:$0xff] %vm254_vm0, %v412_v48 }
 0x17d   :  { %432 = vst.msk [vmem:[#allocation2 + $0x28] sm:$0xff] %vm254_vm0, %v416_v22  ;;  %v426_v29 = vmax.f32 %v410_v21, 0.0  ;;  %434 = vst.msk [vmem:[#allocation2 + $0x38] sm:$0xff] %vm254_vm0, %v418_v23  ;;  %v399_v30 = vadd.f32 %v6368_v12, %v376_v8  ;;  %v395_v31 = vadd.f32 %v6368_v12, %v372_v4  ;;  %v397_v32 = vadd.f32 %v6368_v12, %v374_v6  ;;  %v938_v12 = vld [vmem:[%s11369_s11 + $0x20] sm:$0xff] }
 0x17e   :  { %435 = vst.msk [vmem:[#allocation2 + $0x40] sm:$0xff] %vm254_vm0, %v419_v50  ;;  %436 = vst.msk [vmem:[#allocation2 + $0x48] sm:$0xff] %vm254_vm0, %v420_v24  ;;  %v414_v33 = vmax.f32 %v398_v14, 0.0  ;;  %v7739_v37 = vpack.c.bf16 %v939_v36, %v938_v12  ;;  %v8524_v38 = vmov 0.0|0.0   ;;  %v7742_v43 = vpack.c.bf16 %v941_v41, %v940_v39  ;;  %v933_v39 = vld [vmem:[%s11369_s11] sm:$0xff]  ;;  %v934_v41 = vld [vmem:[%s11369_s11 + $0x8] sm:$0xff] }
 0x17f   :  { %437 = vst.msk [vmem:[#allocation2 + $0x50] sm:$0xff] %vm254_vm0, %v421_v51  ;;  %438 = vst.msk [vmem:[#allocation2 + $0x58] sm:$0xff] %vm254_vm0, %v422_v25  ;;  %v415_v34 = vmax.f32 %v399_v30, 0.0  ;;  %v411_v35 = vmax.f32 %v395_v31, 0.0  ;;  %v413_v52 = vmax.f32 %v397_v32, 0.0  ;;  %7762 = vmatprep.subr.bf16.mxu0 %v8524_v38  ;;  %v8526_v44 = vmov 0.0  }
 0x180   :  { %439 = vst.msk [vmem:[#allocation2 + $0x60] sm:$0xff] %vm254_vm0, %v423_v26  ;;  %440 = vst.msk [vmem:[#allocation2 + $0x68] sm:$0xff] %vm254_vm0, %v424_v27  ;;  %7126 = vmatprep.mubr.msk.f32.mxu0 %vm8525_vm1, %v8526_v44 }
 0x181   :  { %441 = vst.msk [vmem:[#allocation2 + $0x70] sm:$0xff] %vm254_vm0, %v425_v28  ;;  %442 = vst.msk [vmem:[#allocation2 + $0x78] sm:$0xff] %vm254_vm0, %v426_v29 }
 0x182   :  { %430 = vst.msk [vmem:[#allocation2 + $0x18] sm:$0xff] %vm254_vm0, %v414_v33  ;;  %431 = vst.msk [vmem:[#allocation2 + $0x20] sm:$0xff] %vm254_vm0, %v415_v34 }
 0x183   :  { %427 = vst.msk [vmem:[#allocation2] sm:$0xff] %vm254_vm0, %v411_v35  ;;  %429 = vst.msk [vmem:[#allocation2 + $0x10] sm:$0xff] %vm254_vm0, %v413_v52  ;;  %v451_v58 = vld [vmem:[#allocation2 + $0x30] sm:$0xff]  ;;  %v444_v2 = vld [vmem:[#allocation2 + $0x8] sm:$0xff] }
 0x184   :  { %v450_v55 = vld [vmem:[#allocation2 + $0x28] sm:$0xff]  ;;  %v452_v59 = vld [vmem:[#allocation2 + $0x38] sm:$0xff] }
 0x185   :  { %v649_v4 = vld [vmem:[#allocation2 + $0x40] sm:$0xff]  ;;  %v650_v5 = vld [vmem:[#allocation2 + $0x48] sm:$0xff] }
 0x186   :  { %v651_v6 = vld [vmem:[#allocation2 + $0x50] sm:$0xff]  ;;  %v652_v7 = vld [vmem:[#allocation2 + $0x58] sm:$0xff] }
 0x187   :  { %v756_v8 = vld [vmem:[#allocation2 + $0x60] sm:$0xff]  ;;  %v757_v9 = vld [vmem:[#allocation2 + $0x68] sm:$0xff] }
 0x188   :  { %v758_v10 = vld [vmem:[#allocation2 + $0x70] sm:$0xff]  ;;  %v759_v11 = vld [vmem:[#allocation2 + $0x78] sm:$0xff] }
 0x189   :  { %v449_v56 = vld [vmem:[#allocation2 + $0x20] sm:$0xff]  ;;  %v446_v3 = vld [vmem:[#allocation2 + $0x18] sm:$0xff] }
 0x18a   :  { %7030 = vmatprep.mubr.msk.f32.mxu1 %vm254_vm0, %v449_v56  ;;  %v443_v62 = vld [vmem:[#allocation2] sm:$0xff] }
 0x18b   :  { %7031 = vmatmul.mubr.msk.f32.vlgmr.msra.gmra.mrb[0].mxu1 %vm254_vm0, %v450_v55 }
 0x18c   :  { %7729 = vmatpush3.bf16.msra.mxu1 %v8778_v1  ;;  %7033 = vmatprep.mubr.msk.f32.mxu1 %vm254_vm0, %v451_v58  ;;  %v445_v1 = vld [vmem:[#allocation2 + $0x10] sm:$0xff] }
 0x18d   :  { %7731 = vmatprep.subr.bf16.mxu1 %v7730_v57 }
 0x18f   :  { %7034 = vmatmul.mubr.msk.f32.gmra.mrb[2].mxu1 %vm254_vm0, %v452_v59 }
 0x190   :  { %7040 = vmatprep.mubr.msk.f32.mxu1 %vm254_vm0, %v443_v62 }
 0x193   :  { %7041 = vmatmul.mubr.msk.f32.vlgmr.msra.gmra.mrb[0].mxu1 %vm254_vm0, %v444_v2 }
 0x194   :  { %7733 = vmatpush3.bf16.msra.mxu1 %v7730_v57  ;;  %7043 = vmatprep.mubr.msk.f32.mxu1 %vm254_vm0, %v445_v1  ;;  %v6385_v1 = vld [vmem:[%s11371_s28] ss:$0 sm:$0xff] }
 0x195   :  { %7735 = vmatprep.subr.bf16.mxu1 %v7734_v0 }
 0x197   :  { %7044 = vmatmul.mubr.msk.f32.gmra.mrb[2].mxu1 %vm254_vm0, %v446_v3 }
 0x198   :  { %7050 = vmatprep.mubr.msk.f32.mxu1 %vm254_vm0, %v649_v4 }
 0x19b   :  { %7051 = vmatmul.mubr.msk.f32.vlgmr.msra.gmra.mrb[0].mxu1 %vm254_vm0, %v650_v5 }
 0x19c   :  { %7737 = vmatpush3.bf16.msra.mxu1 %v7734_v0  ;;  %7053 = vmatprep.mubr.msk.f32.mxu1 %vm254_vm0, %v651_v6 }
 0x19d   :  { %7738 = vmatprep.subr.bf16.mxu1 %v8524_v38 }
 0x19f   :  { %7054 = vmatmul.mubr.msk.f32.gmra.mrb[2].mxu1 %vm254_vm0, %v652_v7 }
 0x1a0   :  { %7060 = vmatprep.mubr.msk.f32.mxu1 %vm254_vm0, %v756_v8 }
 0x1a3   :  { %7061 = vmatmul.mubr.msk.f32.vlgmr.msra.gmra.mrb[0].mxu1 %vm254_vm0, %v757_v9 }
 0x1a4   :  { %7063 = vmatprep.mubr.msk.f32.mxu1 %vm254_vm0, %v758_v10  ;;  %7740 = vmatpush3.bf16.msra.mxu1 %v7739_v37 }
 0x1a5   :  { %7741 = vmatprep.subr.bf16.mxu1 %v8524_v38 }
 0x1a7   :  { %7064 = vmatmul.mubr.msk.f32.gmra.mrb[2].mxu1 %vm254_vm0, %v759_v11 }
 0x1a8   :  { %7074 = vmatprep.mubr.msk.f32.mxu1 %vm8525_vm1, %v8526_v44  ;;  %7743 = vmatpush3.bf16.msra.mxu1 %v7742_v43  ;;  %v7745_v43 = vpack.c.bf16 %v934_v41, %v933_v39 }
 0x1a9   :  { %7744 = vmatprep.subr.bf16.mxu1 %v8524_v38 }
 0x276   :  { %v7062_v46 = vpop.f32.mrb[0].mxu1 }
 0x277   :  { %v865_v13 = vsel %vm863_vm2, %v7062_v46, 0.0  ;;  %v840_v14 = vpop.f32.mrb[1].mxu1 }
 0x278   :  { %v864_v15 = vsel %vm863_vm2, %v840_v14, 0.0 }
 0x279   :  { %v866_v16 = vadd.f32 %v865_v13, %v864_v15  ;;  %v936_v13 = vld [vmem:[%s11369_s11 + $0x18] sm:$0xff] }
 0x27a   :  { %v7065_v17 = vpop.f32.mrb[2].mxu1 }
 0x27b   :  { %v850_v47 = vpop.f32.mrb[3].mxu1  ;;  %v869_v19 = vsel %vm863_vm2, %v7065_v17, 0.0 }
 0x27c   :  { %v867_v18 = vsel %vm863_vm2, %v850_v47, 0.0 }
 0x27d   :  { %v868_v49 = vadd.f32 %v867_v18, %v866_v16  ;;  %v1089_v16 = vld [vmem:[%s11369_s11 + $0x40] sm:$0xff]  ;;  %v1091_v18 = vld [vmem:[%s11369_s11 + $0x50] sm:$0xff] }
 0x27f   :  { %v870_v42 = vadd.f32 %v869_v19, %v868_v49  ;;  %v1092_v49 = vld [vmem:[%s11369_s11 + $0x58] sm:$0xff] }
 0x281   :  { %v871_v20 = vrot.slane %v870_v42, 4 }
 0x283   :  { %v872_v40 = vadd.f32 %v871_v20, %v870_v42  ;;  %v7754_v42 = vpack.c.bf16 %v1092_v49, %v1091_v18  ;;  %v1168_v20 = vld [vmem:[%s11369_s11 + $0x60] sm:$0xff] }
 0x284   :  { %v6390_v18 = vld [vmem:[%s11267_s10] ss:$0 sm:$0xff] }
 0x285   :  { %v873_v21 = vrot.slane %v872_v40, 2 }
 0x287   :  { %v874_v48 = vadd.f32 %v873_v21, %v872_v40  ;;  %v1169_v40 = vld [vmem:[%s11369_s11 + $0x68] sm:$0xff] }
 0x288   :  { %v7757_v21 = vpack.c.bf16 %v1169_v40, %v1168_v20  ;;  %v1450_v20 = vld [vmem:[%s11372_s5 + $0x80] sm:$0xff]  ;;  %v1451_v40 = vld [vmem:[%s11372_s5 + $0x88] sm:$0xff] }
 0x289   :  { %v875_v22 = vrot.slane %v874_v48, 1 }
 0x28b   :  { %v876_v45 = vadd.f32 %v875_v22, %v874_v48  ;;  %v1170_v48 = vld [vmem:[%s11369_s11 + $0x70] sm:$0xff]  ;;  %v1171_v22 = vld [vmem:[%s11369_s11 + $0x78] sm:$0xff] }
 0x28d   :  { %v878_v23 = vmul.f32 0.03125, %v876_v45 }
 0x28f   :  { %v879_v50 = vsub.f32 %v840_v14, %v878_v23  ;;  %v880_v24 = vsub.f32 %v7062_v46, %v878_v23  ;;  %v881_v51 = vsub.f32 %v850_v47, %v878_v23  ;;  %v882_v25 = vsub.f32 %v7065_v17, %v878_v23  ;;  %v935_v46 = vld [vmem:[%s11369_s11 + $0x10] sm:$0xff]  ;;  %v1090_v17 = vld [vmem:[%s11369_s11 + $0x48] sm:$0xff] }
 0x290   :  { %v7748_v15 = vpack.c.bf16 %v936_v13, %v935_v46  ;;  %v7751_v47 = vpack.c.bf16 %v1090_v17, %v1089_v16  ;;  %v7760_v23 = vpack.c.bf16 %v1171_v22, %v1170_v48  ;;  %v1534_v48 = vld [vmem:[%s11372_s5 + $0xc8] sm:$0xff]  ;;  %v7787_v22 = vpack.c.bf16 %v1451_v40, %v1450_v20  ;;  %v1639_v40 = vld [vmem:[%s11268_s1 + $0x50] sm:$0xff] }
 0x291   :  { %v883_v26 = vmul.f32 %v879_v50, %v879_v50  ;;  %v884_v27 = vmul.f32 %v880_v24, %v880_v24  ;;  %v885_v28 = vmul.f32 %v881_v51, %v881_v51  ;;  %v886_v29 = vmul.f32 %v882_v25, %v882_v25  ;;  %v1638_v20 = vld [vmem:[%s11268_s1 + $0x48] sm:$0xff] }
 0x293   :  { %v887_v30 = vsel %vm863_vm2, %v883_v26, 0.0  ;;  %v888_v31 = vsel %vm863_vm2, %v884_v27, 0.0  ;;  %v890_v33 = vsel %vm863_vm2, %v885_v28, 0.0  ;;  %v892_v35 = vsel %vm863_vm2, %v886_v29, 0.0  ;;  %v1287_v27 = vld [vmem:[%s11372_s5 + $0x8] sm:$0xff]  ;;  %v1297_v29 = vld [vmem:[%s11372_s5 + $0x50] sm:$0xff] }
 0x294   :  { %v889_v32 = vadd.f32 %v888_v31, %v887_v30  ;;  %v1298_v30 = vld [vmem:[%s11372_s5 + $0x58] sm:$0xff] }
 0x295   :  { %v7766_v31 = vpack.c.bf16 %v1298_v30, %v1297_v29  ;;  %v1454_v29 = vld [vmem:[%s11372_s5 + $0xa0] sm:$0xff]  ;;  %v1455_v30 = vld [vmem:[%s11372_s5 + $0xa8] sm:$0xff] }
 0x296   :  { %v891_v34 = vadd.f32 %v890_v33, %v889_v32  ;;  %v1288_v32 = vld [vmem:[%s11372_s5 + $0x10] sm:$0xff]  ;;  %v1289_v33 = vld [vmem:[%s11372_s5 + $0x18] sm:$0xff] }
 0x298   :  { %v893_v52 = vadd.f32 %v892_v35, %v891_v34  ;;  %v7778_v34 = vpack.c.bf16 %v1289_v33, %v1288_v32  ;;  %v1299_v35 = vld [vmem:[%s11372_s5 + $0x60] sm:$0xff]  ;;  %v1538_v32 = vld [vmem:[%s11372_s5 + $0xe8] sm:$0xff]  ;;  %v7793_v33 = vpack.c.bf16 %v1455_v30, %v1454_v29 }
 0x29a   :  { %v894_v53 = vrot.slane %v893_v52, 4 }
 0x29c   :  { %v895_v54 = vadd.f32 %v894_v53, %v893_v52  ;;  %v1300_v52 = vld [vmem:[%s11372_s5 + $0x68] sm:$0xff]  ;;  %v1290_v53 = vld [vmem:[%s11372_s5 + $0x20] sm:$0xff] }
 0x29e   :  { %v896_v55 = vrot.slane %v895_v54, 2 }
 0x2a0   :  { %v897_v56 = vadd.f32 %v896_v55, %v895_v54  ;;  %v7769_v54 = vpack.c.bf16 %v1300_v52, %v1299_v35  ;;  %v1291_v55 = vld [vmem:[%s11372_s5 + $0x28] sm:$0xff]  ;;  %v1456_v35 = vld [vmem:[%s11372_s5 + $0xb0] sm:$0xff]  ;;  %v1457_v52 = vld [vmem:[%s11372_s5 + $0xb8] sm:$0xff] }
 0x2a2   :  { %v898_v57 = vrot.slane %v897_v56, 1 }
 0x2a4   :  { %v899_v58 = vadd.f32 %v898_v57, %v897_v56  ;;  %v1301_v56 = vld [vmem:[%s11372_s5 + $0x70] sm:$0xff]  ;;  %v1302_v57 = vld [vmem:[%s11372_s5 + $0x78] sm:$0xff] }
 0x2a6   :  { %v900_v59 = vmul.f32 0.03125, %v899_v58  ;;  %v7781_v58 = vpack.c.bf16 %v1291_v55, %v1290_v53  ;;  %v1539_v53 = vld [vmem:[%s11372_s5 + $0xf0] sm:$0xff]  ;;  %v1645_v55 = vld [vmem:[%s11363_s27] sm:$0xff] }
 0x2a8   :  { %v901_v60 = vadd.f32 1e-05, %v900_v59  ;;  %v1292_v59 = vld [vmem:[%s11372_s5 + $0x30] sm:$0xff] }
 0x2aa   :  { %8228 = vrsqrt.f32 %v901_v60  ;;  %v7772_v60 = vpack.c.bf16 %v1302_v57, %v1301_v56  ;;  %v1646_v56 = vld [vmem:[%s11363_s27 + $0x8] sm:$0xff]  ;;  %v7796_v57 = vpack.c.bf16 %v1457_v52, %v1456_v35 }
 0x2b4   :  { %v8229_v62 = vpop.eup %8228 }
 0x2b5   :  { %v904_v0 = vmul.f32 %v8229_v62, %v903_v61  ;;  %v1293_v61 = vld [vmem:[%s11372_s5 + $0x38] sm:$0xff] }
 0x2b6   :  { %v7784_v62 = vpack.c.bf16 %v1293_v61, %v1292_v59  ;;  %v7810_v59 = vpack.c.bf16 %v1646_v56, %v1645_v55  ;;  %v1648_v61 = vld [vmem:[%s11363_s27 + $0x18] sm:$0xff]  ;;  %v2003_v55 = vld [vmem:[%s11365_s26 + $0x10] sm:$0xff] }
 0x2b7   :  { %v908_v2 = vrot.slane %v904_v0, %v8874_v63  ;;  %v2004_v56 = vld [vmem:[%s11365_s26 + $0x18] sm:$0xff] }
 0x2b9   :  { %v909_v3 = vmul.f32 %v908_v2, %v879_v50  ;;  %v910_v4 = vmul.f32 %v908_v2, %v880_v24  ;;  %v911_v5 = vmul.f32 %v908_v2, %v881_v51  ;;  %v912_v6 = vmul.f32 %v908_v2, %v882_v25  ;;  %v1295_v24 = vld [vmem:[%s11372_s5 + $0x40] sm:$0xff]  ;;  %v1296_v51 = vld [vmem:[%s11372_s5 + $0x48] sm:$0xff] }
 0x2ba   :  { %v1286_v25 = vld [vmem:[%s11372_s5] sm:$0xff]  ;;  %v7763_v26 = vpack.c.bf16 %v1296_v51, %v1295_v24  ;;  %v1535_v24 = vld [vmem:[%s11372_s5 + $0xd0] sm:$0xff]  ;;  %v1536_v51 = vld [vmem:[%s11372_s5 + $0xd8] sm:$0xff] }
 0x2bb   :  { %v920_v7 = vadd.f32 %v6385_v1, %v909_v3  ;;  %v921_v8 = vadd.f32 %v6385_v1, %v910_v4  ;;  %v922_v9 = vadd.f32 %v6385_v1, %v911_v5  ;;  %v923_v10 = vadd.f32 %v6385_v1, %v912_v6 }
 0x2bc   :  { %v7775_v28 = vpack.c.bf16 %v1287_v27, %v1286_v25  ;;  %7764 = vmatpush3.bf16.msra.mxu0 %v7763_v26 }
 0x2bd   :  { %v924_v11 = vmax.f32 %v920_v7, 0.0  ;;  %v925_v12 = vmax.f32 %v921_v8, 0.0  ;;  %v926_v36 = vmax.f32 %v922_v9, 0.0  ;;  %v927_v37 = vmax.f32 %v923_v10, 0.0  ;;  %7765 = vmatprep.subr.bf16.mxu0 %v8524_v38 }
 0x2bf   :  { %928 = vst.msk [vmem:[#allocation3] sm:$0xff] %vm863_vm2, %v924_v11  ;;  %929 = vst.msk [vmem:[#allocation3 + $0x8] sm:$0xff] %vm863_vm2, %v925_v12 }
 0x2c0   :  { %930 = vst.msk [vmem:[#allocation3 + $0x10] sm:$0xff] %vm863_vm2, %v926_v36  ;;  %931 = vst.msk [vmem:[#allocation3 + $0x18] sm:$0xff] %vm863_vm2, %v927_v37  ;;  %7767 = vmatpush3.bf16.msra.mxu0 %v7766_v31  ;;  %v1537_v31 = vld [vmem:[%s11372_s5 + $0xe0] sm:$0xff] }
 0x2c1   :  { %7768 = vmatprep.subr.bf16.mxu0 %v8524_v38 }
 0x2c4   :  { %7770 = vmatpush3.bf16.msra.mxu0 %v7769_v54  ;;  %v1540_v54 = vld [vmem:[%s11372_s5 + $0xf8] sm:$0xff] }
 0x2c5   :  { %7771 = vmatprep.subr.bf16.mxu0 %v8524_v38 }
 0x2c6   :  { %v937_v14 = vld [vmem:[#allocation3 + $0x8] sm:$0xff]  ;;  %v932_v19 = vld [vmem:[#allocation3] sm:$0xff] }
 0x2c7   :  { %7075 = vmatmul.mubr.msk.f32.vlgmr.msra.gmra.mrb[4].mxu1 %vm863_vm2, %v937_v14  ;;  %v1088_v45 = vld [vmem:[#allocation3 + $0x10] sm:$0xff]  ;;  %v1167_v50 = vld [vmem:[#allocation3 + $0x18] sm:$0xff] }
 0x2c8   :  { %7746 = vmatpush3.bf16.msra.mxu1 %v7745_v43  ;;  %7085 = vmatprep.mubr.msk.f32.mxu1 %vm8525_vm1, %v8526_v44 }
 0x2c9   :  { %7747 = vmatprep.subr.bf16.mxu1 %v8524_v38  ;;  %7773 = vmatpush3.bf16.msra.mxu0 %v7772_v60  ;;  %v1647_v60 = vld [vmem:[%s11363_s27 + $0x10] sm:$0xff] }
 0x2ca   :  { %7786 = vmatprep.subr.bf16.mxu0 %v8524_v38 }
 0x2cc   :  { %7749 = vmatpush3.bf16.msra.mxu1 %v7748_v15  ;;  %v1268_v15 = vld [vmem:[%s11266_s9] sm:$0x1] }
 0x2cd   :  { %7750 = vmatprep.subr.bf16.mxu1 %v8524_v38 }
 0x2cf   :  { %7086 = vmatmul.mubr.msk.f32.vlgmr.msra.gmra.mrb[4].mxu1 %vm863_vm2, %v932_v19 }
 0x2d0   :  { %7752 = vmatpush3.bf16.msra.mxu1 %v7751_v47  ;;  %7096 = vmatprep.mubr.msk.f32.mxu1 %vm8525_vm1, %v8526_v44 }
 0x2d1   :  { %7753 = vmatprep.subr.bf16.mxu1 %v8524_v38 }
 0x2d4   :  { %7755 = vmatpush3.bf16.msra.mxu1 %v7754_v42 }
 0x2d5   :  { %7756 = vmatprep.subr.bf16.mxu1 %v8524_v38 }
 0x2d7   :  { %7097 = vmatmul.mubr.msk.f32.vlgmr.msra.gmra.mrb[4].mxu1 %vm863_vm2, %v1088_v45 }
 0x2d8   :  { %7758 = vmatpush3.bf16.msra.mxu1 %v7757_v21  ;;  %7107 = vmatprep.mubr.msk.f32.mxu1 %vm8525_vm1, %v8526_v44  ;;  %v1533_v21 = vld [vmem:[%s11372_s5 + $0xc0] sm:$0xff] }
 0x2d9   :  { %7759 = vmatprep.subr.bf16.mxu1 %v8524_v38  ;;  %v7799_v45 = vpack.c.bf16 %v1534_v48, %v1533_v21  ;;  %v1640_v21 = vld [vmem:[%s11268_s1 + $0x58] sm:$0xff]  ;;  %v1641_v48 = vld [vmem:[%s11268_s1 + $0x60] sm:$0xff] }
 0x2dc   :  { %7761 = vmatpush3.bf16.msra.mxu1 %v7760_v23  ;;  %v1452_v23 = vld [vmem:[%s11372_s5 + $0x90] sm:$0xff] }
 0x2dd   :  { %7774 = vmatprep.subr.bf16.mxu1 %v8524_v38 }
 0x2df   :  { %7108 = vmatmul.mubr.msk.f32.vlgmr.msra.gmra.mrb[4].mxu1 %vm863_vm2, %v1167_v50  ;;  %v1453_v50 = vld [vmem:[%s11372_s5 + $0x98] sm:$0xff] }
 0x2e0   :  { %7145 = vmatprep.mubr.msk.f32.mxu1 %vm8525_vm1, %v8526_v44  ;;  %7776 = vmatpush3.bf16.msra.mxu1 %v7775_v28  ;;  %v7790_v27 = vpack.c.bf16 %v1453_v50, %v1452_v23  ;;  %v7802_v28 = vpack.c.bf16 %v1536_v51, %v1535_v24  ;;  %v1644_v23 = vld [vmem:[%s11268_s1 + $0x78] sm:$0xff] }
 0x2e1   :  { %7777 = vmatprep.subr.bf16.mxu1 %v8524_v38 }
 0x2e4   :  { %7779 = vmatpush3.bf16.msra.mxu1 %v7778_v34  ;;  %v7805_v34 = vpack.c.bf16 %v1538_v32, %v1537_v31 }
 0x2e5   :  { %7780 = vmatprep.subr.bf16.mxu1 %v8524_v38 }
 0x2e8   :  { %7782 = vmatpush3.bf16.msra.mxu1 %v7781_v58  ;;  %v7808_v58 = vpack.c.bf16 %v1540_v54, %v1539_v53 }
 0x2e9   :  { %7783 = vmatprep.subr.bf16.mxu1 %v8524_v38 }
 0x2ec   :  { %7785 = vmatpush3.bf16.msra.mxu1 %v7784_v62  ;;  %v7814_v62 = vpack.c.bf16 %v1648_v61, %v1647_v60 }
 0x2ed   :  { %7798 = vmatprep.subr.bf16.mxu1 %v8524_v38 }
 0x3b2   :  { %v1241_v0 = vpop.f32.mrb[4].mxu1 }
 0x3b3   :  { %v1247_v2 = vsel %vm1246_vm3, %v1241_v0, 0.0  ;;  %v7109_v1 = vpop.f32.mrb[5].mxu1 }
 0x3b4   :  { %v1248_v3 = vrot.slane %v1247_v2, 4 }
 0x3b6   :  { %v1249_v4 = vadd.f32 %v1248_v3, %v1247_v2  ;;  %v1629_v2 = vld [vmem:[%s11268_s1] sm:$0xff] }
 0x3b8   :  { %v1250_v5 = vrot.slane %v1249_v4, 2 }
 0x3ba   :  { %v1251_v6 = vadd.f32 %v1250_v5, %v1249_v4  ;;  %v1650_v4 = vld [vmem:[%s11363_s27 + $0x28] sm:$0xff] }
 0x3bc   :  { %v1252_v7 = vrot.slane %v1251_v6, 1 }
 0x3be   :  { %v1253_v8 = vadd.f32 %v1252_v7, %v1251_v6  ;;  %v1651_v6 = vld [vmem:[%s11363_s27 + $0x30] sm:$0xff]  ;;  %v1652_v7 = vld [vmem:[%s11363_s27 + $0x38] sm:$0xff] }
 0x3c0   :  { %v1255_v9 = vmul.f32 0.125, %v1253_v8  ;;  %v7822_v8 = vpack.c.bf16 %v1652_v7, %v1651_v6 }
 0x3c2   :  { %v1256_v10 = vsub.f32 %v1241_v0, %v1255_v9  ;;  %v1649_v0 = vld [vmem:[%s11363_s27 + $0x20] sm:$0xff] }
 0x3c3   :  { %v7818_v5 = vpack.c.bf16 %v1650_v4, %v1649_v0  ;;  %v1653_v9 = vld [vmem:[%s11363_s27 + $0x40] sm:$0xff]  ;;  %v1998_v4 = vld [vmem:[%s11365_s26 + $0x8] sm:$0xff] }
 0x3c4   :  { %v1257_v11 = vmul.f32 %v1256_v10, %v1256_v10 }
 0x3c6   :  { %v1258_v12 = vsel %vm1246_vm3, %v1257_v11, 0.0 }
 0x3c7   :  { %v1259_v36 = vrot.slane %v1258_v12, 4 }
 0x3c9   :  { %v1260_v37 = vadd.f32 %v1259_v36, %v1258_v12  ;;  %v1655_v12 = vld [vmem:[%s11363_s27 + $0x50] sm:$0xff]  ;;  %v1656_v36 = vld [vmem:[%s11363_s27 + $0x58] sm:$0xff] }
 0x3cb   :  { %v1261_v39 = vrot.slane %v1260_v37, 2 }
 0x3cd   :  { %v1262_v41 = vadd.f32 %v1261_v39, %v1260_v37  ;;  %v7830_v37 = vpack.c.bf16 %v1656_v36, %v1655_v12  ;;  %v1657_v39 = vld [vmem:[%s11363_s27 + $0x60] sm:$0xff] }
 0x3cf   :  { %v1263_v43 = vrot.slane %v1262_v41, 1 }
 0x3d1   :  { %v1264_v46 = vadd.f32 %v1263_v43, %v1262_v41  ;;  %v1658_v41 = vld [vmem:[%s11363_s27 + $0x68] sm:$0xff] }
 0x3d2   :  { %v7834_v43 = vpack.c.bf16 %v1658_v41, %v1657_v39 }
 0x3d3   :  { %v1265_v13 = vmul.f32 0.125, %v1264_v46  ;;  %v1659_v46 = vld [vmem:[%s11363_s27 + $0x70] sm:$0xff] }
 0x3d5   :  { %v1266_v14 = vadd.f32 1e-05, %v1265_v13  ;;  %v1660_v13 = vld [vmem:[%s11363_s27 + $0x78] sm:$0xff] }
 0x3d7   :  { %8230 = vrsqrt.f32 %v1266_v14  ;;  %v7838_v14 = vpack.c.bf16 %v1660_v13, %v1659_v46 }
 0x3e1   :  { %v8231_v16 = vpop.eup %8230 }
 0x3e2   :  { %v1269_v17 = vmul.f32 %v8231_v16, %v1268_v15  ;;  %v1630_v15 = vld [vmem:[%s11268_s1 + $0x8] sm:$0xff]  ;;  %v1631_v16 = vld [vmem:[%s11268_s1 + $0x10] sm:$0xff] }
 0x3e4   :  { %v1273_v47 = vrot.slane %v1269_v17, %v8874_v63  ;;  %v1632_v17 = vld [vmem:[%s11268_s1 + $0x18] sm:$0xff] }
 0x3e6   :  { %v1274_v49 = vmul.f32 %v1273_v47, %v1256_v10  ;;  %v1654_v10 = vld [vmem:[%s11363_s27 + $0x48] sm:$0xff]  ;;  %v1633_v47 = vld [vmem:[%s11268_s1 + $0x20] sm:$0xff]  ;;  %s8534_s27 = smov 119  }
 0x3e7   :  { %v7826_v11 = vpack.c.bf16 %v1654_v10, %v1653_v9 }
 0x3e8   :  { %v1282_v19 = vadd.f32 %v6390_v18, %v1274_v49  ;;  %v1634_v18 = vld [vmem:[%s11268_s1 + $0x28] sm:$0xff]  ;;  %v1635_v49 = vld [vmem:[%s11268_s1 + $0x30] sm:$0xff] }
 0x3ea   :  { %v1283_v42 = vmax.f32 %v1282_v19, 0.0  ;;  %v1636_v19 = vld [vmem:[%s11268_s1 + $0x38] sm:$0xff] }
 0x3ec   :  { %1284 = vst.msk [vmem:[#allocation4] sm:$0xff] %vm1246_vm3, %v1283_v42  ;;  %v1637_v42 = vld [vmem:[%s11268_s1 + $0x40] sm:$0xff] }
 0x3f3   :  { %v1294_v25 = vld [vmem:[#allocation4 + $0x2] sm:$0x3]  ;;  %v1285_v26 = vld [vmem:[#allocation4] sm:$0x3]  ;;  %v1449_v1 = vld [vmem:[#allocation4 + $0x4] sm:$0x3] }
 0x3f4   :  { %7127 = vmatmul.mubr.msk.f32.vlgmr.msra.gmra.mrb[16].mxu0 %vm1246_vm3, %v1294_v25  ;;  %7146 = vmatmul.mubr.msk.f32.vlgmr.msra.gmra.mrb[6].mxu1 %vm1246_vm3, %v1285_v26  ;;  %v1532_v3 = vld [vmem:[#allocation4 + $0x6] sm:$0x3] }
 0x3f5   :  { %7788 = vmatpush3.bf16.msra.mxu0 %v7787_v22  ;;  %7800 = vmatpush3.bf16.msra.mxu1 %v7799_v45  ;;  %v1642_v22 = vld [vmem:[%s11268_s1 + $0x68] sm:$0xff]  ;;  %v1643_v45 = vld [vmem:[%s11268_s1 + $0x70] sm:$0xff] }
 0x3f6   :  { %7789 = vmatprep.subr.bf16.mxu0 %v8524_v38  ;;  %7801 = vmatprep.subr.bf16.mxu1 %v8524_v38 }
 0x3f7   :  { %7164 = vmatprep.mubr.msk.f32.mxu0 %vm8525_vm1, %v8526_v44  ;;  %7183 = vmatprep.mubr.msk.f32.mxu1 %vm8525_vm1, %v8526_v44 }
 0x3f9   :  { %7791 = vmatpush3.bf16.msra.mxu0 %v7790_v27  ;;  %7803 = vmatpush3.bf16.msra.mxu1 %v7802_v28 }
 0x3fa   :  { %7792 = vmatprep.subr.bf16.mxu0 %v8524_v38  ;;  %7804 = vmatprep.subr.bf16.mxu1 %v8524_v38 }
 0x3fd   :  { %7794 = vmatpush3.bf16.msra.mxu0 %v7793_v33  ;;  %7806 = vmatpush3.bf16.msra.mxu1 %v7805_v34 }
 0x3fe   :  { %7795 = vmatprep.subr.bf16.mxu0 %v8524_v38  ;;  %7807 = vmatprep.subr.bf16.mxu1 %v8524_v38 }
 0x401   :  { %7797 = vmatpush3.bf16.msra.mxu0 %v7796_v57  ;;  %7809 = vmatpush3.bf16.msra.mxu1 %v7808_v58  ;;  %v7842_v58 = vpack.c.bf16 %v2004_v56, %v2003_v55 }
 0x402   :  { %7811 = vmatprep.subr.bf16.mxu0 %v7810_v59 }
 0x403   :  { %7843 = vmatprep.subr.bf16.mxu1 %v7842_v58 }
 0x404   :  { %7165 = vmatmul.mubr.msk.f32.vlgmr.msra.gmra.mrb[18].mxu0 %vm1246_vm3, %v1449_v1  ;;  %7184 = vmatmul.mubr.msk.f32.vlgmr.msra.gmra.mrb[8].mxu1 %vm1246_vm3, %v1532_v3  ;;  %v1997_v3 = vld [vmem:[%s11365_s26] sm:$0xff] }
 0x405   :  { %7813 = vmatpush3.bf16.msra.mxu0 %v7810_v59  ;;  %7218 = vmatprep.mubr.f32.mxu0 %v1629_v2  ;;  %v9283_v6 = vpack.c.bf16 %v1998_v4, %v1997_v3 }
 0x406   :  { %7815 = vmatprep.subr.bf16.mxu0 %v7814_v62  ;;  %7845 = vmatpush3.bf16.msra.mxu1 %v7842_v58 }
 0x407   :  { %7847 = vmatprep.subr.bf16.mxu1 %v9283_v6 }
 0x409   :  { %7817 = vmatpush3.bf16.msra.mxu0 %v7814_v62 }
 0x40a   :  { %7819 = vmatprep.subr.bf16.mxu0 %v7818_v5 }
 0x40d   :  { %7821 = vmatpush3.bf16.msra.mxu0 %v7818_v5 }
 0x40e   :  { %7823 = vmatprep.subr.bf16.mxu0 %v7822_v8 }
 0x411   :  { %7825 = vmatpush3.bf16.msra.mxu0 %v7822_v8 }
 0x412   :  { %7827 = vmatprep.subr.bf16.mxu0 %v7826_v11 }
 0x415   :  { %7829 = vmatpush3.bf16.msra.mxu0 %v7826_v11 }
 0x416   :  { %7831 = vmatprep.subr.bf16.mxu0 %v7830_v37 }
 0x419   :  { %7833 = vmatpush3.bf16.msra.mxu0 %v7830_v37 }
 0x41a   :  { %7835 = vmatprep.subr.bf16.mxu0 %v7834_v43 }
 0x41d   :  { %7837 = vmatpush3.bf16.msra.mxu0 %v7834_v43 }
 0x41e   :  { %7839 = vmatprep.subr.bf16.mxu0 %v7838_v14 }
 0x421   :  { %7841 = vmatpush3.bf16.msra.mxu0 %v7838_v14 }
 0x422   :  { %7882 = vmatprep.subr.bf16.mxu0 %v8524_v38 }
 0x424   :  { %7219 = vmatmul.mubr.f32.vlgmr.msra.gmra.mrb[20].mxu0 %v1630_v15 }
 0x425   :  { %7221 = vmatprep.mubr.f32.mxu0 %v1631_v16 }
 0x428   :  { %7222 = vmatmul.mubr.f32.gmra.mrb[22].mxu0 %v1632_v17 }
 0x429   :  { %7224 = vmatprep.mubr.f32.mxu0 %v1633_v47 }
 0x42c   :  { %7225 = vmatmul.mubr.f32.gmra.mrb[24].mxu0 %v1634_v18 }
 0x42d   :  { %7227 = vmatprep.mubr.f32.mxu0 %v1635_v49 }
 0x430   :  { %7228 = vmatmul.mubr.f32.gmra.mrb[26].mxu0 %v1636_v19 }
 0x431   :  { %7230 = vmatprep.mubr.f32.mxu0 %v1637_v42 }
 0x434   :  { %7231 = vmatmul.mubr.f32.gmra.mrb[28].mxu0 %v1638_v20 }
 0x435   :  { %7233 = vmatprep.mubr.f32.mxu0 %v1639_v40 }
 0x438   :  { %7234 = vmatmul.mubr.f32.gmra.mrb[30].mxu0 %v1640_v21 }
 0x439   :  { %7236 = vmatprep.mubr.f32.mxu0 %v1641_v48 }
 0x43c   :  { %7237 = vmatmul.mubr.f32.gmra.mrb[32].mxu0 %v1642_v22 }
 0x43d   :  { %7239 = vmatprep.mubr.f32.mxu0 %v1643_v45 }
 0x440   :  { %7240 = vmatmul.mubr.f32.gmra.mrb[34].mxu0 %v1644_v23 }
 0x441   :  { %7342 = vmatprep.mubr.msk.f32.mxu0 %vm8525_vm1, %v8526_v44 }
 0x4c7   :  { %v1372_v50 = vpop.f32.mrb[16].mxu0  ;;  %v1445_v24 = vpop.f32.mrb[6].mxu1 }
 0x4c8   :  { %v1446_v51 = vadd.f32 %v1445_v24, %v1372_v50  ;;  %v7128_v25 = vpop.f32.mrb[17].mxu0  ;;  %v7147_v26 = vpop.f32.mrb[7].mxu1 }
 0x4d7   :  { %v1527_v27 = vpop.f32.mrb[18].mxu0  ;;  %v1610_v28 = vpop.f32.mrb[8].mxu1 }
 0x4d8   :  { %v1531_v29 = vadd.f32 %v1527_v27, %v1446_v51  ;;  %v7166_v30 = vpop.f32.mrb[19].mxu0  ;;  %v7185_v31 = vpop.f32.mrb[9].mxu1 }
 0x4da   :  { %v9261_v32 = vadd.f32 %v1610_v28, %v1531_v29 }
 0x4f7   :  { %v9263_v33 = vpop.f32.mrb[20].mxu0 }
 0x4f8   :  { %v1807_v34 = vsel %vm254_vm0, %v9263_v33, 0.0  ;;  %v1727_v35 = vpop.f32.mrb[21].mxu0 }
 0x4f9   :  { %v1806_v52 = vsel %vm254_vm0, %v1727_v35, 0.0 }
 0x4fa   :  { %v1808_v53 = vadd.f32 %v1807_v34, %v1806_v52 }
 0x4fb   :  { %v7223_v54 = vpop.f32.mrb[22].mxu0 }
 0x4fc   :  { %v1737_v57 = vpop.f32.mrb[23].mxu0  ;;  %v1811_v61 = vsel %vm254_vm0, %v7223_v54, 0.0 }
 0x4fd   :  { %v1809_v59 = vsel %vm254_vm0, %v1737_v57, 0.0 }
 0x4fe   :  { %v1810_v60 = vadd.f32 %v1809_v59, %v1808_v53 }
 0x4ff   :  { %v7226_v62 = vpop.f32.mrb[24].mxu0 }
 0x500   :  { %v1747_v0 = vpop.f32.mrb[25].mxu0  ;;  %v1812_v2 = vadd.f32 %v1811_v61, %v1810_v60  ;;  %v1815_v7 = vsel %vm254_vm0, %v7226_v62, 0.0 }
 0x501   :  { %v1813_v1 = vsel %vm254_vm0, %v1747_v0, 0.0 }
 0x502   :  { %v1814_v5 = vadd.f32 %v1813_v1, %v1812_v2 }
 0x503   :  { %v7229_v8 = vpop.f32.mrb[26].mxu0 }
 0x504   :  { %v1757_v9 = vpop.f32.mrb[27].mxu0  ;;  %v1816_v10 = vadd.f32 %v1815_v7, %v1814_v5  ;;  %v1819_v36 = vsel %vm254_vm0, %v7229_v8, 0.0 }
 0x505   :  { %v1817_v11 = vsel %vm254_vm0, %v1757_v9, 0.0 }
 0x506   :  { %v1818_v12 = vadd.f32 %v1817_v11, %v1816_v10 }
 0x507   :  { %v7232_v37 = vpop.f32.mrb[28].mxu0 }
 0x508   :  { %v1767_v39 = vpop.f32.mrb[29].mxu0  ;;  %v1820_v41 = vadd.f32 %v1819_v36, %v1818_v12  ;;  %v1823_v13 = vsel %vm254_vm0, %v7232_v37, 0.0 }
 0x509   :  { %v1821_v43 = vsel %vm254_vm0, %v1767_v39, 0.0 }
 0x50a   :  { %v1822_v46 = vadd.f32 %v1821_v43, %v1820_v41 }
 0x50b   :  { %v7235_v14 = vpop.f32.mrb[30].mxu0 }
 0x50c   :  { %v1777_v15 = vpop.f32.mrb[31].mxu0  ;;  %v1824_v16 = vadd.f32 %v1823_v13, %v1822_v46  ;;  %v1827_v18 = vsel %vm254_vm0, %v7235_v14, 0.0 }
 0x50d   :  { %v1825_v17 = vsel %vm254_vm0, %v1777_v15, 0.0 }
 0x50e   :  { %v1826_v47 = vadd.f32 %v1825_v17, %v1824_v16 }
 0x50f   :  { %v7238_v49 = vpop.f32.mrb[32].mxu0 }
 0x510   :  { %v1787_v19 = vpop.f32.mrb[33].mxu0  ;;  %v1828_v42 = vadd.f32 %v1827_v18, %v1826_v47  ;;  %v1831_v21 = vsel %vm254_vm0, %v7238_v49, 0.0 }
 0x511   :  { %v1829_v20 = vsel %vm254_vm0, %v1787_v19, 0.0 }
 0x512   :  { %v1830_v40 = vadd.f32 %v1829_v20, %v1828_v42 }
 0x513   :  { %v7241_v48 = vpop.f32.mrb[34].mxu0 }
 0x514   :  { %v1797_v22 = vpop.f32.mrb[35].mxu0  ;;  %v1832_v45 = vadd.f32 %v1831_v21, %v1830_v40  ;;  %v1835_v24 = vsel %vm254_vm0, %v7241_v48, 0.0 }
 0x515   :  { %v1833_v23 = vsel %vm254_vm0, %v1797_v22, 0.0 }
 0x516   :  { %v1834_v50 = vadd.f32 %v1833_v23, %v1832_v45 }
 0x518   :  { %v1836_v51 = vadd.f32 %v1835_v24, %v1834_v50 }
 0x51a   :  { %v1837_v25 = vrot.slane %v1836_v51, 4 }
 0x51c   :  { %v1838_v26 = vadd.f32 %v1837_v25, %v1836_v51 }
 0x51e   :  { %v1839_v27 = vrot.slane %v1838_v26, 2 }
 0x520   :  { %v1840_v28 = vadd.f32 %v1839_v27, %v1838_v26 }
 0x522   :  { %v1841_v29 = vrot.slane %v1840_v28, 1 }
 0x524   :  { %v1842_v30 = vadd.f32 %v1841_v29, %v1840_v28 }
 0x526   :  { %v1843_v31 = vmul.f32 0.0078125, %v1842_v30 }
 0x528   :  { %v9297_v34 = vsub.f32 %v1727_v35, %v1843_v31  ;;  %v9300_v52 = vsub.f32 %v9263_v33, %v1843_v31  ;;  %v9302_v53 = vsub.f32 %v1737_v57, %v1843_v31  ;;  %v9304_v55 = vsub.f32 %v7223_v54, %v1843_v31 }
 0x529   :  { %v9306_v56 = vsub.f32 %v1747_v0, %v1843_v31  ;;  %v9308_v58 = vsub.f32 %v7226_v62, %v1843_v31  ;;  %v9310_v59 = vsub.f32 %v1757_v9, %v1843_v31  ;;  %v9312_v60 = vsub.f32 %v7229_v8, %v1843_v31 }
 0x52a   :  { %v9314_v61 = vsub.f32 %v1767_v39, %v1843_v31  ;;  %v9316_v2 = vsub.f32 %v7232_v37, %v1843_v31  ;;  %v9318_v35 = vsub.f32 %v1777_v15, %v1843_v31  ;;  %v9320_v33 = vsub.f32 %v7235_v14, %v1843_v31 }
 0x52b   :  { %v9322_v57 = vsub.f32 %v1787_v19, %v1843_v31  ;;  %v9324_v54 = vsub.f32 %v7238_v49, %v1843_v31  ;;  %v9326_v0 = vsub.f32 %v1797_v22, %v1843_v31  ;;  %v9328_v62 = vsub.f32 %v7241_v48, %v1843_v31 }
 0x52c   :  { %v1860_v1 = vmul.f32 %v9297_v34, %v9297_v34  ;;  %v1861_v3 = vmul.f32 %v9300_v52, %v9300_v52  ;;  %v1862_v4 = vmul.f32 %v9302_v53, %v9302_v53  ;;  %v1863_v5 = vmul.f32 %v9304_v55, %v9304_v55 }
 0x52d   :  { %v1864_v10 = vmul.f32 %v9306_v56, %v9306_v56  ;;  %v1865_v36 = vmul.f32 %v9308_v58, %v9308_v58  ;;  %v1866_v41 = vmul.f32 %v9310_v59, %v9310_v59  ;;  %v1867_v13 = vmul.f32 %v9312_v60, %v9312_v60 }
 0x52e   :  { %v1876_v7 = vsel %vm254_vm0, %v1860_v1, 0.0  ;;  %v1877_v8 = vsel %vm254_vm0, %v1861_v3, 0.0  ;;  %v1879_v11 = vsel %vm254_vm0, %v1862_v4, 0.0  ;;  %v1881_v37 = vsel %vm254_vm0, %v1863_v5, 0.0 }
 0x52f   :  { %v1878_v9 = vadd.f32 %v1877_v8, %v1876_v7  ;;  %v1883_v43 = vsel %vm254_vm0, %v1864_v10, 0.0  ;;  %v1885_v14 = vsel %vm254_vm0, %v1865_v36, 0.0  ;;  %v1868_v16 = vmul.f32 %v9314_v61, %v9314_v61 }
 0x530   :  { %v1887_v17 = vsel %vm254_vm0, %v1866_v41, 0.0  ;;  %v1869_v18 = vmul.f32 %v9316_v2, %v9316_v2  ;;  %v1889_v49 = vsel %vm254_vm0, %v1867_v13, 0.0  ;;  %v1870_v42 = vmul.f32 %v9318_v35, %v9318_v35 }
 0x531   :  { %v1880_v12 = vadd.f32 %v1879_v11, %v1878_v9  ;;  %v1891_v20 = vsel %vm254_vm0, %v1868_v16, 0.0  ;;  %v1871_v21 = vmul.f32 %v9320_v33, %v9320_v33  ;;  %v1872_v45 = vmul.f32 %v9322_v57, %v9322_v57 }
 0x532   :  { %v1893_v48 = vsel %vm254_vm0, %v1869_v18, 0.0  ;;  %v1895_v23 = vsel %vm254_vm0, %v1870_v42, 0.0  ;;  %v1873_v24 = vmul.f32 %v9324_v54, %v9324_v54  ;;  %v1874_v26 = vmul.f32 %v9326_v0, %v9326_v0 }
 0x533   :  { %v1882_v39 = vadd.f32 %v1881_v37, %v1880_v12  ;;  %v1897_v51 = vsel %vm254_vm0, %v1871_v21, 0.0  ;;  %v1899_v27 = vsel %vm254_vm0, %v1872_v45, 0.0  ;;  %v1875_v29 = vmul.f32 %v9328_v62, %v9328_v62 }
 0x534   :  { %v1901_v30 = vsel %vm254_vm0, %v1873_v24, 0.0  ;;  %v1903_v1 = vsel %vm254_vm0, %v1874_v26, 0.0 }
 0x535   :  { %v1884_v46 = vadd.f32 %v1883_v43, %v1882_v39  ;;  %v1905_v4 = vsel %vm254_vm0, %v1875_v29, 0.0  ;;  %v1916_v39 = vld [vmem:[%s11366_s3] sm:$0x1] }
 0x537   :  { %v1886_v15 = vadd.f32 %v1885_v14, %v1884_v46 }
 0x539   :  { %v1888_v47 = vadd.f32 %v1887_v17, %v1886_v15 }
 0x53b   :  { %v1890_v19 = vadd.f32 %v1889_v49, %v1888_v47 }
 0x53d   :  { %v1892_v40 = vadd.f32 %v1891_v20, %v1890_v19  ;;  %v6397_v19 = vld [vmem:[%s11368_s4] ss:$0 sm:$0xff]  ;;  %s8528_s4 = smov 96  }
 0x53f   :  { %v1894_v22 = vadd.f32 %v1893_v48, %v1892_v40 }
 0x541   :  { %v1896_v50 = vadd.f32 %v1895_v23, %v1894_v22 }
 0x543   :  { %v1898_v25 = vadd.f32 %v1897_v51, %v1896_v50 }
 0x545   :  { %v1900_v28 = vadd.f32 %v1899_v27, %v1898_v25 }
 0x547   :  { %v1902_v31 = vadd.f32 %v1901_v30, %v1900_v28 }
 0x549   :  { %v1904_v3 = vadd.f32 %v1903_v1, %v1902_v31 }
 0x54b   :  { %v1906_v5 = vadd.f32 %v1905_v4, %v1904_v3 }
 0x54d   :  { %v1907_v7 = vrot.slane %v1906_v5, 4 }
 0x54f   :  { %v1908_v8 = vadd.f32 %v1907_v7, %v1906_v5 }
 0x551   :  { %v1909_v9 = vrot.slane %v1908_v8, 2 }
 0x553   :  { %v1910_v10 = vadd.f32 %v1909_v9, %v1908_v8  ;;  %v2203_v9 = vld [vmem:[%s11365_s26 + $0x20] sm:$0xff] }
 0x555   :  { %v1911_v11 = vrot.slane %v1910_v10, 1 }
 0x557   :  { %v1912_v12 = vadd.f32 %v1911_v11, %v1910_v10  ;;  %v2204_v10 = vld [vmem:[%s11365_s26 + $0x28] sm:$0xff] }
 0x559   :  { %v1913_v36 = vmul.f32 0.0078125, %v1912_v12 }
 0x55b   :  { %v1914_v37 = vadd.f32 1e-05, %v1913_v36  ;;  %v7850_v36 = vpack.c.bf16 %v2204_v10, %v2203_v9 }
 0x55d   :  { %8232 = vrsqrt.f32 %v1914_v37 }
 0x567   :  { %v8233_v41 = vpop.eup %8232 }
 0x568   :  { %v1917_v43 = vmul.f32 %v8233_v41, %v1916_v39  ;;  %v2310_v41 = vld [vmem:[%s11365_s26 + $0x30] sm:$0xff] }
 0x56a   :  { %v1921_v46 = vrot.slane %v1917_v43, %v8874_v63  ;;  %v2311_v43 = vld [vmem:[%s11365_s26 + $0x38] sm:$0xff]  ;;  %s8530_s26 = smov 112  }
 0x56c   :  { %v1922_v13 = vmul.f32 %v1921_v46, %v9297_v34  ;;  %v1923_v14 = vmul.f32 %v1921_v46, %v9300_v52  ;;  %v1924_v15 = vmul.f32 %v1921_v46, %v9302_v53  ;;  %v1925_v16 = vmul.f32 %v1921_v46, %v9304_v55 }
 0x56d   :  { %v1926_v17 = vmul.f32 %v1921_v46, %v9306_v56  ;;  %v1927_v47 = vmul.f32 %v1921_v46, %v9308_v58  ;;  %v1928_v18 = vmul.f32 %v1921_v46, %v9310_v59  ;;  %v1929_v49 = vmul.f32 %v1921_v46, %v9312_v60 }
 0x56e   :  { %v1930_v34 = vmul.f32 %v1921_v46, %v9314_v61  ;;  %v1931_v52 = vmul.f32 %v1921_v46, %v9316_v2  ;;  %v1932_v53 = vmul.f32 %v1921_v46, %v9318_v35  ;;  %v1933_v55 = vmul.f32 %v1921_v46, %v9320_v33 }
 0x56f   :  { %v1934_v56 = vmul.f32 %v1921_v46, %v9322_v57  ;;  %v1935_v58 = vmul.f32 %v1921_v46, %v9324_v54  ;;  %v1936_v59 = vmul.f32 %v1921_v46, %v9326_v0  ;;  %v1937_v60 = vmul.f32 %v1921_v46, %v9328_v62 }
 0x570   :  { %v1945_v42 = vadd.f32 %v6397_v19, %v1922_v13  ;;  %v1946_v20 = vadd.f32 %v6397_v19, %v1923_v14  ;;  %v1947_v40 = vadd.f32 %v6397_v19, %v1924_v15  ;;  %v1948_v21 = vadd.f32 %v6397_v19, %v1925_v16 }
 0x571   :  { %v1949_v48 = vadd.f32 %v6397_v19, %v1926_v17  ;;  %v1950_v61 = vadd.f32 %v6397_v19, %v1927_v47  ;;  %v1951_v22 = vadd.f32 %v6397_v19, %v1928_v18  ;;  %v1952_v2 = vadd.f32 %v6397_v19, %v1929_v49 }
 0x572   :  { %v1953_v45 = vadd.f32 %v6397_v19, %v1930_v34  ;;  %v1954_v35 = vadd.f32 %v6397_v19, %v1931_v52  ;;  %v1955_v23 = vadd.f32 %v6397_v19, %v1932_v53  ;;  %v1956_v33 = vadd.f32 %v6397_v19, %v1933_v55  ;;  %v2486_v53 = vld [vmem:[%s11369_s11 + $0x20] sm:$0xff]  ;;  %v2487_v55 = vld [vmem:[%s11369_s11 + $0x28] sm:$0xff] }
 0x573   :  { %v1957_v50 = vadd.f32 %v6397_v19, %v1934_v56  ;;  %v1958_v57 = vadd.f32 %v6397_v19, %v1935_v58  ;;  %v1959_v24 = vadd.f32 %v6397_v19, %v1936_v59  ;;  %v1960_v54 = vadd.f32 %v6397_v19, %v1937_v60  ;;  %v2488_v56 = vld [vmem:[%s11369_s11 + $0x30] sm:$0xff]  ;;  %v2489_v59 = vld [vmem:[%s11369_s11 + $0x38] sm:$0xff] }
 0x574   :  { %v1961_v51 = vmax.f32 %v1945_v42, 0.0  ;;  %v1962_v0 = vmax.f32 %v1946_v20, 0.0  ;;  %v1963_v25 = vmax.f32 %v1947_v40, 0.0  ;;  %v1964_v62 = vmax.f32 %v1948_v21, 0.0 }
 0x575   :  { %v1965_v26 = vmax.f32 %v1949_v48, 0.0  ;;  %v1966_v27 = vmax.f32 %v1950_v61, 0.0  ;;  %v1967_v28 = vmax.f32 %v1951_v22, 0.0  ;;  %v1968_v29 = vmax.f32 %v1952_v2, 0.0 }
 0x576   :  { %v1969_v30 = vmax.f32 %v1953_v45, 0.0  ;;  %v1970_v31 = vmax.f32 %v1954_v35, 0.0  ;;  %v1971_v1 = vmax.f32 %v1955_v23, 0.0  ;;  %v1972_v3 = vmax.f32 %v1956_v33, 0.0  ;;  %1977 = vst.msk [vmem:[#allocation2] sm:$0xff] %vm254_vm0, %v1961_v51  ;;  %1978 = vst.msk [vmem:[#allocation2 + $0x8] sm:$0xff] %vm254_vm0, %v1962_v0 }
 0x577   :  { %1979 = vst.msk [vmem:[#allocation2 + $0x10] sm:$0xff] %vm254_vm0, %v1963_v25  ;;  %1980 = vst.msk [vmem:[#allocation2 + $0x18] sm:$0xff] %vm254_vm0, %v1964_v62  ;;  %v1973_v4 = vmax.f32 %v1957_v50, 0.0  ;;  %v1974_v5 = vmax.f32 %v1958_v57, 0.0  ;;  %v1975_v7 = vmax.f32 %v1959_v24, 0.0  ;;  %v1976_v8 = vmax.f32 %v1960_v54, 0.0 }
 0x578   :  { %1981 = vst.msk [vmem:[#allocation2 + $0x20] sm:$0xff] %vm254_vm0, %v1965_v26  ;;  %1982 = vst.msk [vmem:[#allocation2 + $0x28] sm:$0xff] %vm254_vm0, %v1966_v27  ;;  %v7854_v13 = vpack.c.bf16 %v2311_v43, %v2310_v41  ;;  %v7859_v58 = vpack.c.bf16 %v2487_v55, %v2486_v53  ;;  %v7862_v60 = vpack.c.bf16 %v2489_v59, %v2488_v56  ;;  %v2481_v59 = vld [vmem:[%s11369_s11] sm:$0xff] }
 0x579   :  { %1983 = vst.msk [vmem:[#allocation2 + $0x30] sm:$0xff] %vm254_vm0, %v1967_v28  ;;  %1984 = vst.msk [vmem:[#allocation2 + $0x38] sm:$0xff] %vm254_vm0, %v1968_v29 }
 0x57a   :  { %1986 = vst.msk [vmem:[#allocation2 + $0x48] sm:$0xff] %vm254_vm0, %v1970_v31  ;;  %1987 = vst.msk [vmem:[#allocation2 + $0x50] sm:$0xff] %vm254_vm0, %v1971_v1 }
 0x57b   :  { %1988 = vst.msk [vmem:[#allocation2 + $0x58] sm:$0xff] %vm254_vm0, %v1972_v3  ;;  %1985 = vst.msk [vmem:[#allocation2 + $0x40] sm:$0xff] %vm254_vm0, %v1969_v30 }
 0x57c   :  { %1989 = vst.msk [vmem:[#allocation2 + $0x60] sm:$0xff] %vm254_vm0, %v1973_v4  ;;  %1990 = vst.msk [vmem:[#allocation2 + $0x68] sm:$0xff] %vm254_vm0, %v1974_v5 }
 0x57d   :  { %1991 = vst.msk [vmem:[#allocation2 + $0x70] sm:$0xff] %vm254_vm0, %v1975_v7  ;;  %1992 = vst.msk [vmem:[#allocation2 + $0x78] sm:$0xff] %vm254_vm0, %v1976_v8  ;;  %v1993_v46 = vld [vmem:[#allocation2] sm:$0xff]  ;;  %v1994_v14 = vld [vmem:[#allocation2 + $0x8] sm:$0xff] }
 0x57e   :  { %v1996_v15 = vld [vmem:[#allocation2 + $0x18] sm:$0xff] }
 0x57f   :  { %v1999_v11 = vld [vmem:[#allocation2 + $0x20] sm:$0xff]  ;;  %v2000_v12 = vld [vmem:[#allocation2 + $0x28] sm:$0xff] }
 0x580   :  { %7246 = vmatprep.mubr.msk.f32.mxu1 %vm254_vm0, %v1999_v11  ;;  %v2001_v37 = vld [vmem:[#allocation2 + $0x30] sm:$0xff]  ;;  %v2002_v39 = vld [vmem:[#allocation2 + $0x38] sm:$0xff] }
 0x581   :  { %7247 = vmatmul.mubr.msk.f32.vlgmr.msra.gmra.mrb[10].mxu1 %vm254_vm0, %v2000_v12  ;;  %v2200_v17 = vld [vmem:[#allocation2 + $0x48] sm:$0xff]  ;;  %v2201_v47 = vld [vmem:[#allocation2 + $0x50] sm:$0xff] }
 0x582   :  { %7849 = vmatpush3.bf16.msra.mxu1 %v9283_v6  ;;  %7249 = vmatprep.mubr.msk.f32.mxu1 %vm254_vm0, %v2001_v37  ;;  %v1995_v6 = vld [vmem:[#allocation2 + $0x10] sm:$0xff]  ;;  %v2199_v16 = vld [vmem:[#allocation2 + $0x40] sm:$0xff]  ;;  %v2202_v18 = vld [vmem:[#allocation2 + $0x58] sm:$0xff] }
 0x583   :  { %7851 = vmatprep.subr.bf16.mxu1 %v7850_v36  ;;  %v2306_v49 = vld [vmem:[#allocation2 + $0x60] sm:$0xff]  ;;  %v2307_v19 = vld [vmem:[#allocation2 + $0x68] sm:$0xff] }
 0x584   :  { %v2308_v34 = vld [vmem:[#allocation2 + $0x70] sm:$0xff]  ;;  %v2309_v52 = vld [vmem:[#allocation2 + $0x78] sm:$0xff] }
 0x585   :  { %7250 = vmatmul.mubr.msk.f32.gmra.mrb[12].mxu1 %vm254_vm0, %v2002_v39 }
 0x586   :  { %7256 = vmatprep.mubr.msk.f32.mxu1 %vm254_vm0, %v1993_v46  ;;  %v2451_v46 = vld [vmem:[%s11370_s30] sm:$0x1] }
 0x589   :  { %7257 = vmatmul.mubr.msk.f32.vlgmr.msra.gmra.mrb[10].mxu1 %vm254_vm0, %v1994_v14 }
 0x58a   :  { %7853 = vmatpush3.bf16.msra.mxu1 %v7850_v36  ;;  %7259 = vmatprep.mubr.msk.f32.mxu1 %vm254_vm0, %v1995_v6 }
 0x58b   :  { %7855 = vmatprep.subr.bf16.mxu1 %v7854_v13 }
 0x58d   :  { %7260 = vmatmul.mubr.msk.f32.gmra.mrb[12].mxu1 %vm254_vm0, %v1996_v15  ;;  %v6414_v15 = vld [vmem:[%s11371_s28] ss:$0 sm:$0xff]  ;;  %s8527_s28 = smov 64  }
 0x58e   :  { %7266 = vmatprep.mubr.msk.f32.mxu1 %vm254_vm0, %v2199_v16 }
 0x591   :  { %7267 = vmatmul.mubr.msk.f32.vlgmr.msra.gmra.mrb[10].mxu1 %vm254_vm0, %v2200_v17 }
 0x592   :  { %7857 = vmatpush3.bf16.msra.mxu1 %v7854_v13  ;;  %7269 = vmatprep.mubr.msk.f32.mxu1 %vm254_vm0, %v2201_v47 }
 0x593   :  { %7858 = vmatprep.subr.bf16.mxu1 %v8524_v38 }
 0x595   :  { %7270 = vmatmul.mubr.msk.f32.gmra.mrb[12].mxu1 %vm254_vm0, %v2202_v18 }
 0x596   :  { %7276 = vmatprep.mubr.msk.f32.mxu1 %vm254_vm0, %v2306_v49 }
 0x599   :  { %7277 = vmatmul.mubr.msk.f32.vlgmr.msra.gmra.mrb[10].mxu1 %vm254_vm0, %v2307_v19 }
 0x59a   :  { %7279 = vmatprep.mubr.msk.f32.mxu1 %vm254_vm0, %v2308_v34  ;;  %7860 = vmatpush3.bf16.msra.mxu1 %v7859_v58 }
 0x59b   :  { %7861 = vmatprep.subr.bf16.mxu1 %v8524_v38 }
 0x59d   :  { %7280 = vmatmul.mubr.msk.f32.gmra.mrb[12].mxu1 %vm254_vm0, %v2309_v52 }
 0x59e   :  { %7290 = vmatprep.mubr.msk.f32.mxu1 %vm8525_vm1, %v8526_v44  ;;  %7863 = vmatpush3.bf16.msra.mxu1 %v7862_v60  ;;  %v2482_v60 = vld [vmem:[%s11369_s11 + $0x8] sm:$0xff] }
 0x59f   :  { %7864 = vmatprep.subr.bf16.mxu1 %v8524_v38 }
 0x66c   :  { %v7278_v42 = vpop.f32.mrb[10].mxu1 }
 0x66d   :  { %v2414_v20 = vsel %vm863_vm2, %v7278_v42, 0.0  ;;  %v2390_v40 = vpop.f32.mrb[11].mxu1 }
 0x66e   :  { %v2413_v21 = vsel %vm863_vm2, %v2390_v40, 0.0 }
 0x66f   :  { %v2415_v48 = vadd.f32 %v2414_v20, %v2413_v21  ;;  %v2483_v20 = vld [vmem:[%s11369_s11 + $0x10] sm:$0xff] }
 0x670   :  { %v7281_v61 = vpop.f32.mrb[12].mxu1 }
 0x671   :  { %v2400_v22 = vpop.f32.mrb[13].mxu1  ;;  %v2418_v35 = vsel %vm863_vm2, %v7281_v61, 0.0 }
 0x672   :  { %v2416_v2 = vsel %vm863_vm2, %v2400_v22, 0.0 }
 0x673   :  { %v2417_v45 = vadd.f32 %v2416_v2, %v2415_v48 }
 0x675   :  { %v2419_v23 = vadd.f32 %v2418_v35, %v2417_v45  ;;  %v2639_v45 = vld [vmem:[%s11369_s11 + $0x50] sm:$0xff]  ;;  %v2640_v35 = vld [vmem:[%s11369_s11 + $0x58] sm:$0xff] }
 0x677   :  { %v2420_v33 = vrot.slane %v2419_v23, 4 }
 0x679   :  { %v2421_v50 = vadd.f32 %v2420_v33, %v2419_v23  ;;  %v7874_v33 = vpack.c.bf16 %v2640_v35, %v2639_v45 }
 0x67b   :  { %v2422_v57 = vrot.slane %v2421_v50, 2 }
 0x67d   :  { %v2423_v24 = vadd.f32 %v2422_v57, %v2421_v50  ;;  %v2716_v50 = vld [vmem:[%s11369_s11 + $0x60] sm:$0xff]  ;;  %v2717_v57 = vld [vmem:[%s11369_s11 + $0x68] sm:$0xff] }
 0x67f   :  { %v2424_v54 = vrot.slane %v2423_v24, 1 }
 0x681   :  { %v2425_v51 = vadd.f32 %v2424_v54, %v2423_v24  ;;  %v7877_v24 = vpack.c.bf16 %v2717_v57, %v2716_v50  ;;  %v2718_v54 = vld [vmem:[%s11369_s11 + $0x70] sm:$0xff] }
 0x683   :  { %v2426_v0 = vmul.f32 0.03125, %v2425_v51  ;;  %v2719_v51 = vld [vmem:[%s11369_s11 + $0x78] sm:$0xff] }
 0x685   :  { %v2427_v25 = vsub.f32 %v2390_v40, %v2426_v0  ;;  %v2428_v62 = vsub.f32 %v7278_v42, %v2426_v0  ;;  %v2429_v26 = vsub.f32 %v2400_v22, %v2426_v0  ;;  %v2430_v27 = vsub.f32 %v7281_v61, %v2426_v0  ;;  %v2484_v40 = vld [vmem:[%s11369_s11 + $0x18] sm:$0xff]  ;;  %v2637_v61 = vld [vmem:[%s11369_s11 + $0x40] sm:$0xff]  ;;  %v2638_v22 = vld [vmem:[%s11369_s11 + $0x48] sm:$0xff] }
 0x686   :  { %v7865_v42 = vpack.c.bf16 %v2482_v60, %v2481_v59  ;;  %v7868_v48 = vpack.c.bf16 %v2484_v40, %v2483_v20  ;;  %v7871_v2 = vpack.c.bf16 %v2638_v22, %v2637_v61 }
 0x687   :  { %v2431_v28 = vmul.f32 %v2427_v25, %v2427_v25  ;;  %v2432_v29 = vmul.f32 %v2428_v62, %v2428_v62  ;;  %v2433_v30 = vmul.f32 %v2429_v26, %v2429_v26  ;;  %v2434_v31 = vmul.f32 %v2430_v27, %v2430_v27 }
 0x689   :  { %v2435_v1 = vsel %vm863_vm2, %v2431_v28, 0.0  ;;  %v2436_v3 = vsel %vm863_vm2, %v2432_v29, 0.0  ;;  %v2438_v5 = vsel %vm863_vm2, %v2433_v30, 0.0  ;;  %v2440_v8 = vsel %vm863_vm2, %v2434_v31, 0.0  ;;  %v2996_v29 = vld [vmem:[%s11372_s5 + $0x80] sm:$0xff]  ;;  %v2997_v30 = vld [vmem:[%s11372_s5 + $0x88] sm:$0xff] }
 0x68a   :  { %v2437_v4 = vadd.f32 %v2436_v3, %v2435_v1  ;;  %v7907_v31 = vpack.c.bf16 %v2997_v30, %v2996_v29  ;;  %v2843_v1 = vld [vmem:[%s11372_s5 + $0x50] sm:$0xff]  ;;  %v2844_v3 = vld [vmem:[%s11372_s5 + $0x58] sm:$0xff] }
 0x68c   :  { %v2439_v7 = vadd.f32 %v2438_v5, %v2437_v4  ;;  %v7886_v4 = vpack.c.bf16 %v2844_v3, %v2843_v1  ;;  %v2998_v5 = vld [vmem:[%s11372_s5 + $0x90] sm:$0xff]  ;;  %v2833_v1 = vld [vmem:[%s11372_s5 + $0x8] sm:$0xff] }
 0x68e   :  { %v2441_v9 = vadd.f32 %v2440_v8, %v2439_v7  ;;  %v2999_v7 = vld [vmem:[%s11372_s5 + $0x98] sm:$0xff] }
 0x68f   :  { %v7910_v8 = vpack.c.bf16 %v2999_v7, %v2998_v5  ;;  %v2835_v5 = vld [vmem:[%s11372_s5 + $0x18] sm:$0xff] }
 0x690   :  { %v2442_v10 = vrot.slane %v2441_v9, 4 }
 0x692   :  { %v2443_v11 = vadd.f32 %v2442_v10, %v2441_v9  ;;  %v2845_v9 = vld [vmem:[%s11372_s5 + $0x60] sm:$0xff]  ;;  %v2846_v10 = vld [vmem:[%s11372_s5 + $0x68] sm:$0xff] }
 0x694   :  { %v2444_v12 = vrot.slane %v2443_v11, 2 }
 0x696   :  { %v2445_v36 = vadd.f32 %v2444_v12, %v2443_v11  ;;  %v2847_v11 = vld [vmem:[%s11372_s5 + $0x70] sm:$0xff]  ;;  %v7889_v12 = vpack.c.bf16 %v2846_v10, %v2845_v9  ;;  %v2836_v10 = vld [vmem:[%s11372_s5 + $0x20] sm:$0xff] }
 0x698   :  { %v2446_v37 = vrot.slane %v2445_v36, 1 }
 0x69a   :  { %v2447_v39 = vadd.f32 %v2446_v37, %v2445_v36  ;;  %v2848_v36 = vld [vmem:[%s11372_s5 + $0x78] sm:$0xff]  ;;  %v3000_v37 = vld [vmem:[%s11372_s5 + $0xa0] sm:$0xff] }
 0x69c   :  { %v2448_v41 = vmul.f32 0.03125, %v2447_v39  ;;  %v3001_v39 = vld [vmem:[%s11372_s5 + $0xa8] sm:$0xff] }
 0x69e   :  { %v2449_v43 = vadd.f32 1e-05, %v2448_v41  ;;  %v7913_v41 = vpack.c.bf16 %v3001_v39, %v3000_v37  ;;  %v2839_v37 = vld [vmem:[%s11372_s5 + $0x38] sm:$0xff] }
 0x6a0   :  { %8234 = vrsqrt.f32 %v2449_v43  ;;  %v3002_v43 = vld [vmem:[%s11372_s5 + $0xb0] sm:$0xff] }
 0x6aa   :  { %v8235_v13 = vpop.eup %8234 }
 0x6ab   :  { %v2452_v14 = vmul.f32 %v8235_v13, %v2451_v46  ;;  %v3003_v46 = vld [vmem:[%s11372_s5 + $0xb8] sm:$0xff]  ;;  %v7892_v13 = vpack.c.bf16 %v2848_v36, %v2847_v11  ;;  %v2837_v11 = vld [vmem:[%s11372_s5 + $0x28] sm:$0xff]  ;;  %v2838_v36 = vld [vmem:[%s11372_s5 + $0x30] sm:$0xff] }
 0x6ac   :  { %v7904_v39 = vpack.c.bf16 %v2839_v37, %v2838_v36 }
 0x6ad   :  { %v2456_v6 = vrot.slane %v2452_v14, %v8874_v63  ;;  %v7916_v14 = vpack.c.bf16 %v3003_v46, %v3002_v43  ;;  %v3080_v43 = vld [vmem:[%s11372_s5 + $0xc8] sm:$0xff] }
 0x6af   :  { %v2457_v16 = vmul.f32 %v2456_v6, %v2427_v25  ;;  %v2458_v17 = vmul.f32 %v2456_v6, %v2428_v62  ;;  %v2459_v47 = vmul.f32 %v2456_v6, %v2429_v26  ;;  %v2460_v18 = vmul.f32 %v2456_v6, %v2430_v27  ;;  %v2841_v26 = vld [vmem:[%s11372_s5 + $0x40] sm:$0xff]  ;;  %v2842_v27 = vld [vmem:[%s11372_s5 + $0x48] sm:$0xff] }
 0x6b0   :  { %v7880_v25 = vpack.c.bf16 %v2719_v51, %v2718_v54  ;;  %v7883_v28 = vpack.c.bf16 %v2842_v27, %v2841_v26  ;;  %v9595_v6 = vld [vmem:[%s11269_s13] sm:$0xff] }
 0x6b1   :  { %v2468_v49 = vadd.f32 %v6414_v15, %v2457_v16  ;;  %v2469_v19 = vadd.f32 %v6414_v15, %v2458_v17  ;;  %v2470_v34 = vadd.f32 %v6414_v15, %v2459_v47  ;;  %v2471_v52 = vadd.f32 %v6414_v15, %v2460_v18  ;;  %v9600_v15 = vld [vmem:[%s11269_s13 + $0x10] sm:$0xff]  ;;  %v9605_v16 = vld [vmem:[%s11269_s13 + $0x20] sm:$0xff]  ;;  %v9617_v18 = vld [vmem:[%s11269_s13 + $0x8] sm:$0xff] }
 0x6b2   :  { %7884 = vmatpush3.bf16.msra.mxu0 %v7883_v28  ;;  %v8101_v17 = vpack.i.bf16 %v9600_v15, %v9595_v6  ;;  %v9612_v47 = vld [vmem:[%s11269_s13 + $0x30] sm:$0xff]  ;;  %v6419_v27 = vld [vmem:[%s11267_s10] ss:$0 sm:$0xff] }
 0x6b3   :  { %v2472_v53 = vmax.f32 %v2468_v49, 0.0  ;;  %v2473_v55 = vmax.f32 %v2469_v19, 0.0  ;;  %v2474_v56 = vmax.f32 %v2470_v34, 0.0  ;;  %v2475_v58 = vmax.f32 %v2471_v52, 0.0  ;;  %7885 = vmatprep.subr.bf16.mxu0 %v8524_v38  ;;  %v9622_v49 = vld [vmem:[%s11269_s13 + $0x18] sm:$0xff]  ;;  %v9629_v34 = vld [vmem:[%s11269_s13 + $0x28] sm:$0xff] }
 0x6b4   :  { %v8111_v19 = vpack.i.bf16 %v9622_v49, %v9617_v18  ;;  %v9634_v52 = vld [vmem:[%s11269_s13 + $0x38] sm:$0xff]  ;;  %8102 = vrot.lane.b32.xlu0 %v8101_v17, %s8527_s28 }
 0x6b5   :  { %2476 = vst.msk [vmem:[#allocation3] sm:$0xff] %vm863_vm2, %v2472_v53  ;;  %2477 = vst.msk [vmem:[#allocation3 + $0x8] sm:$0xff] %vm863_vm2, %v2473_v55  ;;  %v8106_v53 = vpack.i.bf16 %v9612_v47, %v9605_v16  ;;  %v8116_v55 = vpack.i.bf16 %v9634_v52, %v9629_v34 }
 0x6b6   :  { %2478 = vst.msk [vmem:[#allocation3 + $0x10] sm:$0xff] %vm863_vm2, %v2474_v56  ;;  %2479 = vst.msk [vmem:[#allocation3 + $0x18] sm:$0xff] %vm863_vm2, %v2475_v58  ;;  %7887 = vmatpush3.bf16.msra.mxu0 %v7886_v4  ;;  %8112 = vrot.lane.b32.xlu1 %v8111_v19, %s8527_s28  ;;  %v2834_v4 = vld [vmem:[%s11372_s5 + $0x10] sm:$0xff] }
 0x6b7   :  { %7888 = vmatprep.subr.bf16.mxu0 %v8524_v38  ;;  %v7898_v9 = vpack.c.bf16 %v2835_v5, %v2834_v4  ;;  %v6395_v5 = vld [vmem:[%s11272_s12] ss:$0 sm:$0xff] }
 0x6b8   :  { %8107 = vrot.lane.b32.xlu0 %v8106_v53, %s8527_s28  ;;  %v3083_v53 = vld [vmem:[%s11372_s5 + $0xe0] sm:$0xff] }
 0x6ba   :  { %7890 = vmatpush3.bf16.msra.mxu0 %v7889_v12  ;;  %8117 = vrot.lane.b32.xlu1 %v8116_v55, %s8527_s28  ;;  %v7901_v12 = vpack.c.bf16 %v2837_v11, %v2836_v10  ;;  %v3084_v55 = vld [vmem:[%s11372_s5 + $0xe8] sm:$0xff]  ;;  %v6424_v10 = vld [vmem:[%s11272_s12] ss:$0 sm:$0xff] }
 0x6bb   :  { %7891 = vmatprep.subr.bf16.mxu0 %v8524_v38 }
 0x6bc   :  { %v2485_v21 = vld [vmem:[#allocation3 + $0x8] sm:$0xff]  ;;  %v2480_v23 = vld [vmem:[#allocation3] sm:$0xff] }
 0x6bd   :  { %7291 = vmatmul.mubr.msk.f32.vlgmr.msra.gmra.mrb[14].mxu1 %vm863_vm2, %v2485_v21  ;;  %v2636_v0 = vld [vmem:[#allocation3 + $0x10] sm:$0xff]  ;;  %v2715_v62 = vld [vmem:[#allocation3 + $0x18] sm:$0xff] }
 0x6be   :  { %7866 = vmatpush3.bf16.msra.mxu1 %v7865_v42  ;;  %7301 = vmatprep.mubr.msk.f32.mxu1 %vm8525_vm1, %v8526_v44 }
 0x6bf   :  { %7867 = vmatprep.subr.bf16.mxu1 %v8524_v38  ;;  %7893 = vmatpush3.bf16.msra.mxu0 %v7892_v13  ;;  %v3081_v13 = vld [vmem:[%s11372_s5 + $0xd0] sm:$0xff] }
 0x6c0   :  { %7894 = vmatprep.subr.bf16.mxu0 %v8524_v38 }
 0x6c2   :  { %7869 = vmatpush3.bf16.msra.mxu1 %v7868_v48 }
 0x6c3   :  { %7870 = vmatprep.subr.bf16.mxu1 %v8524_v38 }
 0x6c5   :  { %7302 = vmatmul.mubr.msk.f32.vlgmr.msra.gmra.mrb[14].mxu1 %vm863_vm2, %v2480_v23 }
 0x6c6   :  { %7872 = vmatpush3.bf16.msra.mxu1 %v7871_v2  ;;  %7312 = vmatprep.mubr.msk.f32.mxu1 %vm8525_vm1, %v8526_v44 }
 0x6c7   :  { %7873 = vmatprep.subr.bf16.mxu1 %v8524_v38 }
 0x6ca   :  { %7875 = vmatpush3.bf16.msra.mxu1 %v7874_v33 }
 0x6cb   :  { %7876 = vmatprep.subr.bf16.mxu1 %v8524_v38 }
 0x6cd   :  { %7313 = vmatmul.mubr.msk.f32.vlgmr.msra.gmra.mrb[14].mxu1 %vm863_vm2, %v2636_v0  ;;  %v2814_v0 = vld [vmem:[%s11266_s9] sm:$0x1]  ;;  %s8532_s9 = smov 125  }
 0x6ce   :  { %7878 = vmatpush3.bf16.msra.mxu1 %v7877_v24  ;;  %7323 = vmatprep.mubr.msk.f32.mxu1 %vm8525_vm1, %v8526_v44 }
 0x6cf   :  { %7879 = vmatprep.subr.bf16.mxu1 %v8524_v38 }
 0x6d2   :  { %7881 = vmatpush3.bf16.msra.mxu1 %v7880_v25 }
 0x6d3   :  { %7906 = vmatprep.subr.bf16.mxu1 %v8524_v38 }
 0x6d5   :  { %7324 = vmatmul.mubr.msk.f32.vlgmr.msra.gmra.mrb[14].mxu1 %vm863_vm2, %v2715_v62 }
 0x6d6   :  { %7380 = vmatprep.mubr.msk.f32.mxu1 %vm8525_vm1, %v8526_v44  ;;  %7908 = vmatpush3.bf16.msra.mxu1 %v7907_v31  ;;  %v2832_v31 = vld [vmem:[%s11372_s5] sm:$0xff] }
 0x6d7   :  { %7909 = vmatprep.subr.bf16.mxu1 %v8524_v38  ;;  %v7895_v3 = vpack.c.bf16 %v2833_v1, %v2832_v31 }
 0x6da   :  { %7911 = vmatpush3.bf16.msra.mxu1 %v7910_v8 }
 0x6db   :  { %7912 = vmatprep.subr.bf16.mxu1 %v8524_v38 }
 0x6de   :  { %7914 = vmatpush3.bf16.msra.mxu1 %v7913_v41  ;;  %v3079_v41 = vld [vmem:[%s11372_s5 + $0xc0] sm:$0xff] }
 0x6df   :  { %7915 = vmatprep.subr.bf16.mxu1 %v8524_v38  ;;  %v7919_v46 = vpack.c.bf16 %v3080_v43, %v3079_v41 }
 0x6e2   :  { %7917 = vmatpush3.bf16.msra.mxu1 %v7916_v14  ;;  %v3082_v14 = vld [vmem:[%s11372_s5 + $0xd8] sm:$0xff] }
 0x6e3   :  { %7930 = vmatprep.subr.bf16.mxu1 %v8524_v38  ;;  %v7922_v19 = vpack.c.bf16 %v3082_v14, %v3081_v13 }
 0x728   :  { %v8113_v13 = vpop.permute.xlu1 %8112 }
 0x729   :  { %v8114_v14 = vunpack.i.l.bf16 %v8113_v13 }
 0x7a8   :  { %v2789_v56 = vpop.f32.mrb[14].mxu1 }
 0x7a9   :  { %v2794_v58 = vsel %vm1246_vm3, %v2789_v56, 0.0  ;;  %v7325_v59 = vpop.f32.mrb[15].mxu1 }
 0x7aa   :  { %v2795_v60 = vrot.slane %v2794_v58, 4  ;;  %v3086_v59 = vld [vmem:[%s11372_s5 + $0xf8] sm:$0xff] }
 0x7ac   :  { %v2796_v42 = vadd.f32 %v2795_v60, %v2794_v58  ;;  %v3085_v58 = vld [vmem:[%s11372_s5 + $0xf0] sm:$0xff] }
 0x7ad   :  { %v7928_v60 = vpack.c.bf16 %v3086_v59, %v3085_v58 }
 0x7ae   :  { %v2797_v20 = vrot.slane %v2796_v42, 2 }
 0x7b0   :  { %v2798_v40 = vadd.f32 %v2797_v20, %v2796_v42  ;;  %v8103_v20 = vpop.permute.xlu0 %8102 }
 0x7b2   :  { %v2799_v21 = vrot.slane %v2798_v40, 1 }
 0x7b4   :  { %v2800_v48 = vadd.f32 %v2799_v21, %v2798_v40  ;;  %v7931_v40 = vpack.c.bf16 %v9600_v15, %v9595_v6  ;;  %v8105_v21 = vunpack.i.h.bf16 %v8103_v20  ;;  %v9733_v6 = vld [vmem:[%s11270_s14] ss:$0 sm:$0xff]  ;;  %v9738_v15 = vld [vmem:[%s11270_s14 + $0x1] ss:$0 sm:$0xff]  ;;  %s8531_s14 = smov 80  }
 0x7b5   :  { %3295 = vrot.lane.b32.xlu0 %v9733_v6, %s8527_s28  ;;  %3489 = vrot.lane.b32.xlu1 %v9738_v15, %s8527_s28 }
 0x7b6   :  { %v2801_v61 = vmul.f32 0.125, %v2800_v48  ;;  %v8104_v48 = vunpack.i.l.bf16 %v8103_v20 }
 0x7b8   :  { %v2802_v22 = vsub.f32 %v2789_v56, %v2801_v61  ;;  %v7925_v56 = vpack.c.bf16 %v3084_v55, %v3083_v53  ;;  %v7934_v61 = vpack.c.bf16 %v9612_v47, %v9605_v16  ;;  %v9743_v16 = vld [vmem:[%s11271_s15] sm:$0xff]  ;;  %v9752_v47 = vld [vmem:[%s11271_s15 + $0x8] sm:$0xff] }
 0x7ba   :  { %v2803_v2 = vmul.f32 %v2802_v22, %v2802_v22 }
 0x7bc   :  { %v2804_v45 = vsel %vm1246_vm3, %v2803_v2, 0.0  ;;  %v8108_v2 = vpop.permute.xlu0 %8107 }
 0x7bd   :  { %v2805_v35 = vrot.slane %v2804_v45, 4 }
 0x7bf   :  { %v2806_v23 = vadd.f32 %v2805_v35, %v2804_v45  ;;  %v8110_v45 = vunpack.i.h.bf16 %v8108_v2  ;;  %v8109_v35 = vunpack.i.l.bf16 %v8108_v2 }
 0x7c1   :  { %v2807_v33 = vrot.slane %v2806_v23, 2 }
 0x7c3   :  { %v2808_v50 = vadd.f32 %v2807_v33, %v2806_v23  ;;  %v7940_v23 = vpack.c.bf16 %v8110_v45, %v8109_v35  ;;  %v9757_v33 = vld [vmem:[%s11271_s15 + $0x10] sm:$0xff] }
 0x7c5   :  { %v2809_v57 = vrot.slane %v2808_v50, 1 }
 0x7c7   :  { %v2810_v24 = vadd.f32 %v2809_v57, %v2808_v50  ;;  %v8121_v50 = vpack.i.bf16 %v9752_v47, %v9743_v16  ;;  %v9764_v57 = vld [vmem:[%s11271_s15 + $0x18] sm:$0xff] }
 0x7c9   :  { %v2811_v54 = vmul.f32 0.125, %v2810_v24  ;;  %v9769_v24 = vld [vmem:[%s11271_s15 + $0x20] sm:$0xff]  ;;  %8122 = vrot.lane.b32.xlu0 %v8121_v50, %s8528_s4 }
 0x7cb   :  { %v2812_v51 = vadd.f32 1e-05, %v2811_v54  ;;  %v9774_v54 = vld [vmem:[%s11271_s15 + $0x28] sm:$0xff] }
 0x7cd   :  { %8236 = vrsqrt.f32 %v2812_v51  ;;  %v8126_v51 = vpack.i.bf16 %v9764_v57, %v9757_v33 }
 0x7cf   :  { %8127 = vrot.lane.b32.xlu1 %v8126_v51, %s8528_s4 }
 0x7d7   :  { %v8237_v25 = vpop.eup %8236 }
 0x7d8   :  { %v2815_v62 = vmul.f32 %v8237_v25, %v2814_v0  ;;  %v9781_v0 = vld [vmem:[%s11271_s15 + $0x30] sm:$0xff]  ;;  %v9786_v25 = vld [vmem:[%s11271_s15 + $0x38] sm:$0xff]  ;;  %s11430_s15 = sld [smem:[#allocation53_spill]] }
 0x7da   :  { %v2819_v26 = vrot.slane %v2815_v62, %v8874_v63  ;;  %v8131_v62 = vpack.i.bf16 %v9774_v54, %v9769_v24 }
 0x7dc   :  { %v2820_v28 = vmul.f32 %v2819_v26, %v2802_v22  ;;  %v7937_v22 = vpack.c.bf16 %v8105_v21, %v8104_v48  ;;  %v8136_v26 = vpack.i.bf16 %v9786_v25, %v9781_v0  ;;  %8132 = vrot.lane.b32.xlu0 %v8131_v62, %s8528_s4 }
 0x7de   :  { %v2828_v29 = vadd.f32 %v6419_v27, %v2820_v28  ;;  %8137 = vrot.lane.b32.xlu1 %v8136_v26, %s8528_s4 }
 0x7e0   :  { %v2829_v30 = vmax.f32 %v2828_v29, 0.0  ;;  %8142 = vrot.lane.b32.xlu0 %v8121_v50, %s8527_s28 }
 0x7e2   :  { %2830 = vst.msk [vmem:[#allocation4] sm:$0xff] %vm1246_vm3, %v2829_v30  ;;  %8147 = vrot.lane.b32.xlu1 %v8121_v50, %s8529_s6 }
 0x7e4   :  { %8152 = vrot.lane.b32.xlu0 %v8126_v51, %s8527_s28 }
 0x7e6   :  { %8157 = vrot.lane.b32.xlu1 %v8126_v51, %s8529_s6 }
 0x7e8   :  { %8162 = vrot.lane.b32.xlu0 %v8131_v62, %s8527_s28 }
 0x7e9   :  { %v2840_v7 = vld [vmem:[#allocation4 + $0x2] sm:$0x3]  ;;  %v2995_v8 = vld [vmem:[#allocation4 + $0x4] sm:$0x3]  ;;  %v2831_v17 = vld [vmem:[#allocation4] sm:$0x3] }
 0x7ea   :  { %7343 = vmatmul.mubr.msk.f32.vlgmr.msra.gmra.mrb[36].mxu0 %vm1246_vm3, %v2840_v7  ;;  %7381 = vmatmul.mubr.msk.f32.vlgmr.msra.gmra.mrb[16].mxu1 %vm1246_vm3, %v2995_v8  ;;  %v3078_v42 = vld [vmem:[#allocation4 + $0x6] sm:$0x3]  ;;  %v1622_v7 = vadd.f32 %v6395_v5, %v9261_v32  ;;  %v8115_v32 = vunpack.i.h.bf16 %v8113_v13 }
 0x7eb   :  { %7896 = vmatpush3.bf16.msra.mxu0 %v7895_v3  ;;  %7361 = vmatprep.mubr.msk.f32.mxu0 %vm8525_vm1, %v8526_v44 }
 0x7ec   :  { %7897 = vmatprep.subr.bf16.mxu0 %v8524_v38  ;;  %7410 = vmatprep.mubr.msk.f32.mxu1 %vm8525_vm1, %v8526_v44  ;;  %v6396_v8 = vmul.f32 -1.442695, %v1622_v7 }
 0x7ed   :  { %7932 = vmatpush3.bf16.msra.mxu1 %v7931_v40  ;;  %8167 = vrot.lane.b32.xlu1 %v8131_v62, %s8529_s6  ;;  %v7946_v40 = vpack.c.bf16 %v9634_v52, %v9629_v34 }
 0x7ee   :  { %7933 = vmatprep.subr.bf16.mxu1 %v8524_v38  ;;  %8172 = vrot.lane.b32.xlu0 %v8136_v26, %s8527_s28  ;;  %8238 = vpow2.f32 %v6396_v8 }
 0x7ef   :  { %7899 = vmatpush3.bf16.msra.mxu0 %v7898_v9 }
 0x7f0   :  { %7900 = vmatprep.subr.bf16.mxu0 %v8524_v38 }
 0x7f1   :  { %7935 = vmatpush3.bf16.msra.mxu1 %v7934_v61  ;;  %8177 = vrot.lane.b32.xlu1 %v8136_v26, %s8529_s6  ;;  %v7955_v61 = vpack.c.bf16 %v9752_v47, %v9743_v16  ;;  %v7961_v47 = vpack.c.bf16 %v9774_v54, %v9769_v24  ;;  %v9848_v24 = vld [vmem:[%s11273_s18] sm:$0xff]  ;;  %v9853_v54 = vld [vmem:[%s11273_s18 + $0x8] sm:$0xff] }
 0x7f2   :  { %7942 = vmatprep.subr.bf16.mxu1 %v8524_v38 }
 0x7f3   :  { %7902 = vmatpush3.bf16.msra.mxu0 %v7901_v12 }
 0x7f4   :  { %7903 = vmatprep.subr.bf16.mxu0 %v8524_v38 }
 0x7f7   :  { %7905 = vmatpush3.bf16.msra.mxu0 %v7904_v39 }
 0x7f8   :  { %7918 = vmatprep.subr.bf16.mxu0 %v8524_v38  ;;  %v8239_v39 = vpop.eup %8238 }
 0x7f9   :  { %v1626_v41 = vadd.f32 1.0, %v8239_v39 }
 0x7fa   :  { %7362 = vmatmul.mubr.msk.f32.vlgmr.msra.gmra.mrb[38].mxu0 %vm1246_vm3, %v2831_v17 }
 0x7fb   :  { %7920 = vmatpush3.bf16.msra.mxu0 %v7919_v46  ;;  %7399 = vmatprep.mubr.msk.f32.mxu0 %vm8525_vm1, %v8526_v44 }
 0x7fc   :  { %7921 = vmatprep.subr.bf16.mxu0 %v8524_v38 }
 0x7ff   :  { %7923 = vmatpush3.bf16.msra.mxu0 %v7922_v19  ;;  %v8118_v19 = vpop.permute.xlu1 %8117 }
 0x800   :  { %7924 = vmatprep.subr.bf16.mxu0 %v8524_v38  ;;  %v8120_v58 = vunpack.i.h.bf16 %v8118_v19  ;;  %v8119_v59 = vunpack.i.l.bf16 %v8118_v19 }
 0x802   :  { %v7952_v20 = vpack.c.bf16 %v8120_v58, %v8119_v59 }
 0x803   :  { %7926 = vmatpush3.bf16.msra.mxu0 %v7925_v56  ;;  %v7949_v56 = vpack.c.bf16 %v8115_v32, %v8114_v14 }
 0x804   :  { %7927 = vmatprep.subr.bf16.mxu0 %v8524_v38 }
 0x807   :  { %7929 = vmatpush3.bf16.msra.mxu0 %v7928_v60  ;;  %v7943_v60 = vpack.c.bf16 %v9622_v49, %v9617_v18 }
 0x808   :  { %7936 = vmatprep.subr.bf16.mxu0 %v8524_v38 }
 0x80a   :  { %7400 = vmatmul.mubr.msk.f32.vlgmr.msra.gmra.mrb[40].mxu0 %vm1246_vm3, %v3078_v42 }
 0x80b   :  { %7421 = vmatprep.mubr.msk.f32.mxu0 %vm8525_vm1, %v8526_v44  ;;  %7938 = vmatpush3.bf16.msra.mxu0 %v7937_v22 }
 0x80c   :  { %7939 = vmatprep.subr.bf16.mxu0 %v8524_v38 }
 0x80f   :  { %7941 = vmatpush3.bf16.msra.mxu0 %v7940_v23  ;;  %v7958_v23 = vpack.c.bf16 %v9764_v57, %v9757_v33  ;;  %v7964_v33 = vpack.c.bf16 %v9786_v25, %v9781_v0  ;;  %v9858_v0 = vld [vmem:[%s11273_s18 + $0x10] sm:$0xff]  ;;  %v8181_v25 = vpack.i.bf16 %v9853_v54, %v9848_v24 }
 0x810   :  { %7948 = vmatprep.subr.bf16.mxu0 %v8524_v38 }
 0x811   :  { %8182 = vrot.lane.b32.xlu0 %v8181_v25, %s8530_s26  ;;  %8187 = vrot.lane.b32.xlu1 %v8181_v25, %s8528_s4 }
 0x827   :  { %v3296_v18 = vpop.permute.xlu0 %3295  ;;  %v9827_v49 = vpop.permute.xlu1 %3489 }
 0x83b   :  { %v8123_v34 = vpop.permute.xlu0 %8122 }
 0x83c   :  { %v8125_v52 = vunpack.i.h.bf16 %v8123_v34  ;;  %v8124_v21 = vunpack.i.l.bf16 %v8123_v34 }
 0x83e   :  { %v7967_v48 = vpack.c.bf16 %v8125_v52, %v8124_v21 }
 0x841   :  { %v8128_v22 = vpop.permute.xlu1 %8127 }
 0x842   :  { %v8130_v2 = vunpack.i.h.bf16 %v8128_v22  ;;  %v8129_v45 = vunpack.i.l.bf16 %v8128_v22 }
 0x844   :  { %v7970_v35 = vpack.c.bf16 %v8130_v2, %v8129_v45 }
 0x84e   :  { %v8133_v50 = vpop.permute.xlu0 %8132 }
 0x84f   :  { %v8135_v51 = vunpack.i.h.bf16 %v8133_v50  ;;  %v8134_v62 = vunpack.i.l.bf16 %v8133_v50 }
 0x850   :  { %v8138_v26 = vpop.permute.xlu1 %8137 }
 0x851   :  { %v7973_v16 = vpack.c.bf16 %v8135_v51, %v8134_v62 }
 0x854   :  { %v8148_v58 = vpop.permute.xlu1 %8147 }
 0x855   :  { %v8149_v34 = vunpack.i.l.bf16 %v8148_v58 }
 0x8bd   :  { %v2918_v27 = vpop.f32.mrb[36].mxu0  ;;  %v3073_v28 = vpop.f32.mrb[16].mxu1 }
 0x8be   :  { %v7344_v29 = vpop.f32.mrb[37].mxu0  ;;  %v7382_v30 = vpop.f32.mrb[17].mxu1 }
 0x8bf   :  { %v9865_v29 = vld [vmem:[%s11273_s18 + $0x18] sm:$0xff] }
 0x8c0   :  { %v8191_v30 = vpack.i.bf16 %v9865_v29, %v9858_v0 }
 0x8c2   :  { %8192 = vrot.lane.b32.xlu0 %v8191_v30, %s8530_s26  ;;  %8197 = vrot.lane.b32.xlu1 %v8191_v30, %s8528_s4 }
 0x8c6   :  { %8202 = vrot.lane.b32.xlu0 %v8181_v25, %s8531_s14  ;;  %8207 = vrot.lane.b32.xlu1 %v8191_v30, %s8531_s14 }
 0x8cd   :  { %v2991_v31 = vpop.f32.mrb[38].mxu0 }
 0x8ce   :  { %v2992_v1 = vadd.f32 %v2991_v31, %v2918_v27  ;;  %v7363_v3 = vpop.f32.mrb[39].mxu0  ;;  %v8140_v27 = vunpack.i.h.bf16 %v8138_v26 }
 0x8d0   :  { %v3077_v4 = vadd.f32 %v3073_v28, %v2992_v1  ;;  %v8139_v28 = vunpack.i.l.bf16 %v8138_v26 }
 0x8d2   :  { %v7976_v57 = vpack.c.bf16 %v8140_v27, %v8139_v28 }
 0x8dd   :  { %v3156_v9 = vpop.f32.mrb[40].mxu0 }
 0x8de   :  { %v3160_v11 = vadd.f32 %v3156_v9, %v3077_v4  ;;  %v7401_v12 = vpop.f32.mrb[41].mxu0 }
 0x8e0   :  { %v3168_v36 = vadd.f32 %v6424_v10, %v3160_v11 }
 0x8e2   :  { %v6425_v37 = vmul.f32 -1.442695, %v3168_v36 }
 0x8e4   :  { %8240 = vpow2.f32 %v6425_v37 }
 0x8e5   :  { %8242 = vrcp.f32 %v1626_v41 }
 0x8ee   :  { %v8241_v43 = vpop.eup %8240 }
 0x8ef   :  { %v3172_v46 = vadd.f32 1.0, %v8241_v43  ;;  %v8243_v17 = vpop.eup %8242 }
 0x8f1   :  { %8244 = vrcp.f32 %v3172_v46 }
 0x8fb   :  { %v8245_v53 = vpop.eup %8244 }
 0x8fc   :  { %v3175_v55 = vadd.f32 %v8245_v53, %v8243_v17 }
 0x8fe   :  { %v3176_v42 = vmul.f32 0.4, %v3175_v55 }
 0x900   :  { %7411 = vmatmul.mubr.msk.f32.vlgmr.msra.gmra.mrb[18].mxu1 %vm863_vm2, %v3176_v42  ;;  %7422 = vmatmul.mubr.msk.f32.vlgmr.msra.gmra.mrb[42].mxu0 %vm863_vm2, %v3176_v42 }
 0x901   :  { %7944 = vmatpush3.bf16.msra.mxu1 %v7943_v60  ;;  %7950 = vmatpush3.bf16.msra.mxu0 %v7949_v56  ;;  %v8143_v56 = vpop.permute.xlu0 %8142 }
 0x902   :  { %7945 = vmatprep.subr.bf16.mxu1 %v8524_v38  ;;  %7951 = vmatprep.subr.bf16.mxu0 %v8524_v38 }
 0x903   :  { %7432 = vmatprep.mubr.msk.f32.mxu1 %vm8525_vm1, %v8526_v44  ;;  %7443 = vmatprep.mubr.msk.f32.mxu0 %vm8525_vm1, %v8526_v44 }
 0x905   :  { %7947 = vmatpush3.bf16.msra.mxu1 %v7946_v40  ;;  %7953 = vmatpush3.bf16.msra.mxu0 %v7952_v20  ;;  %v8153_v59 = vpop.permute.xlu0 %8152  ;;  %v8145_v40 = vunpack.i.h.bf16 %v8143_v56 }
 0x906   :  { %7954 = vmatprep.subr.bf16.mxu1 %v8524_v38  ;;  %7966 = vmatprep.subr.bf16.mxu0 %v8524_v38 }
 0x908   :  { %7433 = vmatmul.mubr.msk.f32.vlgmr.msra.gmra.mrb[20].mxu1 %vm863_vm2, %v3176_v42  ;;  %7444 = vmatmul.mubr.msk.f32.vlgmr.msra.gmra.mrb[44].mxu0 %vm863_vm2, %v3176_v42  ;;  %v8158_v42 = vpop.permute.xlu1 %8157 }
 0x909   :  { %7462 = vmatprep.mubr.msk.f32.mxu1 %vm8525_vm1, %v8526_v44  ;;  %7481 = vmatprep.mubr.msk.f32.mxu0 %vm8525_vm1, %v8526_v44  ;;  %v8163_v52 = vpop.permute.xlu0 %8162  ;;  %v8160_v2 = vunpack.i.h.bf16 %v8158_v42  ;;  %v8159_v45 = vunpack.i.l.bf16 %v8158_v42 }
 0x90a   :  { %7956 = vmatpush3.bf16.msra.mxu1 %v7955_v61  ;;  %7968 = vmatpush3.bf16.msra.mxu0 %v7967_v48  ;;  %v8155_v48 = vunpack.i.h.bf16 %v8153_v59  ;;  %v8165_v50 = vunpack.i.h.bf16 %v8163_v52  ;;  %v8164_v51 = vunpack.i.l.bf16 %v8163_v52 }
 0x90b   :  { %7957 = vmatprep.subr.bf16.mxu1 %v8524_v38  ;;  %7969 = vmatprep.subr.bf16.mxu0 %v8524_v38  ;;  %v7994_v62 = vpack.c.bf16 %v8160_v2, %v8159_v45 }
 0x90c   :  { %v8168_v61 = vpop.permute.xlu1 %8167 }
 0x90d   :  { %v8169_v26 = vunpack.i.l.bf16 %v8168_v61  ;;  %v8173_v27 = vpop.permute.xlu0 %8172 }
 0x90e   :  { %7959 = vmatpush3.bf16.msra.mxu1 %v7958_v23  ;;  %7971 = vmatpush3.bf16.msra.mxu0 %v7970_v35  ;;  %v8154_v35 = vunpack.i.l.bf16 %v8153_v59 }
 0x90f   :  { %7960 = vmatprep.subr.bf16.mxu1 %v8524_v38  ;;  %7972 = vmatprep.subr.bf16.mxu0 %v8524_v38 }
 0x910   :  { %v8178_v28 = vpop.permute.xlu1 %8177 }
 0x911   :  { %v8180_v30 = vunpack.i.h.bf16 %v8178_v28 }
 0x912   :  { %7962 = vmatpush3.bf16.msra.mxu1 %v7961_v47  ;;  %7974 = vmatpush3.bf16.msra.mxu0 %v7973_v16  ;;  %v7982_v16 = vpack.c.bf16 %v8155_v48, %v8154_v35  ;;  %v8170_v47 = vunpack.i.h.bf16 %v8168_v61 }
 0x913   :  { %7963 = vmatprep.subr.bf16.mxu1 %v8524_v38  ;;  %7975 = vmatprep.subr.bf16.mxu0 %v8524_v38 }
 0x914   :  { %v7997_v25 = vpack.c.bf16 %v8170_v47, %v8169_v26 }
 0x916   :  { %7965 = vmatpush3.bf16.msra.mxu1 %v7964_v33  ;;  %7977 = vmatpush3.bf16.msra.mxu0 %v7976_v57  ;;  %v7985_v33 = vpack.c.bf16 %v8165_v50, %v8164_v51  ;;  %v8175_v57 = vunpack.i.h.bf16 %v8173_v27 }
 0x917   :  { %7978 = vmatprep.subr.bf16.mxu1 %v8524_v38  ;;  %7990 = vmatprep.subr.bf16.mxu0 %v8524_v38 }
 0x9d3   :  { %v3257_v31 = vpop.f32.mrb[18].mxu1  ;;  %v3364_v1 = vpop.f32.mrb[42].mxu0 }
 0x9d4   :  { %v3258_v3 = vadd.f32 %v9733_v6, %v3257_v31  ;;  %v3365_v4 = vadd.f32 %v3364_v1, %v3296_v18  ;;  %v7412_v5 = vpop.f32.mrb[19].mxu1  ;;  %v7423_v7 = vpop.f32.mrb[43].mxu0  ;;  %v8144_v18 = vunpack.i.l.bf16 %v8143_v56  ;;  %v8179_v31 = vunpack.i.l.bf16 %v8178_v28 }
 0x9d5   :  { %v8174_v1 = vunpack.i.l.bf16 %v8173_v27 }
 0x9d6   :  { %v6428_v8 = vmul.f32 -1.442695, %v3258_v3  ;;  %v6431_v9 = vmul.f32 -1.442695, %v3365_v4  ;;  %v7979_v21 = vpack.c.bf16 %v8145_v40, %v8144_v18  ;;  %v8000_v3 = vpack.c.bf16 %v8180_v30, %v8179_v31 }
 0x9d7   :  { %v7988_v4 = vpack.c.bf16 %v8175_v57, %v8174_v1 }
 0x9d8   :  { %8246 = vpow2.f32 %v6428_v8  ;;  %v8002_v8 = vpack.c.bf16 %v9853_v54, %v9848_v24 }
 0x9d9   :  { %8248 = vpow2.f32 %v6431_v9 }
 0x9db   :  { %v3452_v10 = vpop.f32.mrb[20].mxu1  ;;  %v3558_v11 = vpop.f32.mrb[44].mxu0 }
 0x9dc   :  { %v3453_v12 = vadd.f32 %v9738_v15, %v3452_v10  ;;  %v3559_v36 = vadd.f32 %v3558_v11, %v9827_v49  ;;  %v7434_v37 = vpop.f32.mrb[21].mxu1  ;;  %v7445_v39 = vpop.f32.mrb[45].mxu0  ;;  %v8150_v49 = vunpack.i.h.bf16 %v8148_v58  ;;  %v8006_v11 = vpack.c.bf16 %v9865_v29, %v9858_v0  ;;  %v9901_v29 = vld [vmem:[%s11274_s21] sm:$0xff] }
 0x9dd   :  { %v8188_v10 = vpop.permute.xlu1 %8187 }
 0x9de   :  { %v6434_v41 = vmul.f32 -1.442695, %v3453_v12  ;;  %v6437_v43 = vmul.f32 -1.442695, %v3559_v36  ;;  %v7991_v22 = vpack.c.bf16 %v8150_v49, %v8149_v34  ;;  %v8190_v12 = vunpack.i.h.bf16 %v8188_v10 }
 0x9df   :  { %v8189_v36 = vunpack.i.l.bf16 %v8188_v10 }
 0x9e0   :  { %8250 = vpow2.f32 %v6434_v41 }
 0x9e1   :  { %8252 = vpow2.f32 %v6437_v43  ;;  %v9892_v41 = vpack.c.bf16 %v8190_v12, %v8189_v36 }
 0x9e2   :  { %v8247_v6 = vpop.eup %8246 }
 0x9e3   :  { %v8249_v46 = vpop.eup %8248  ;;  %v3264_v13 = vadd.f32 1.0, %v8247_v6 }
 0x9e4   :  { %v3371_v32 = vadd.f32 1.0, %v8249_v46  ;;  %v9906_v46 = vld [vmem:[%s11274_s21 + $0x8] sm:$0xff] }
 0x9e5   :  { %8254 = vrcp.f32 %v3264_v13  ;;  %v8211_v13 = vpack.i.bf16 %v9906_v46, %v9901_v29 }
 0x9e6   :  { %8256 = vrcp.f32 %v3371_v32 }
 0x9e7   :  { %8212 = vrot.lane.b32.xlu0 %v8211_v13, %s8532_s9  ;;  %8217 = vrot.lane.b32.xlu1 %v8211_v13, %s8533_s23 }
 0x9ea   :  { %v8251_v14 = vpop.eup %8250 }
 0x9eb   :  { %v8253_v17 = vpop.eup %8252  ;;  %v3459_v19 = vadd.f32 1.0, %v8251_v14  ;;  %8222 = vrot.lane.b32.xlu0 %v8211_v13, %s8534_s27 }
 0x9ec   :  { %v3565_v53 = vadd.f32 1.0, %v8253_v17 }
 0x9ed   :  { %8258 = vrcp.f32 %v3459_v19 }
 0x9ee   :  { %8260 = vrcp.f32 %v3565_v53 }
 0x9ef   :  { %v8255_v15 = vpop.eup %8254 }
 0x9f0   :  { %v8257_v55 = vpop.eup %8256  ;;  %3268 = vst.msk [vmem:[#allocation5] sm:$0x3] %vm3267_vm4, %v8255_v15 }
 0x9f1   :  { %3374 = vst.msk [vmem:[#allocation5 + $0x2] sm:$0x3] %vm3267_vm4, %v8257_v55 }
 0x9f7   :  { %v8259_v60 = vpop.eup %8258 }
 0x9f8   :  { %v8261_v20 = vpop.eup %8260  ;;  %3462 = vst.msk [vmem:[#allocation5 + $0x4] sm:$0x3] %vm3267_vm4, %v8259_v60 }
 0x9f9   :  { %3568 = vst.msk [vmem:[#allocation5 + $0x6] sm:$0x3] %vm3267_vm4, %v8261_v20 }
 0xa00   :  { %v3569_v23 = vld [vmem:[#allocation5] sm:$0xff] }
 0xa01   :  { %7463 = vmatmul.mubr.msk.f32.vlgmr.msra.gmra.mrb[22].mxu1 %vm1246_vm3, %v3569_v23  ;;  %7482 = vmatmul.mubr.msk.f32.vlgmr.msra.gmra.mrb[46].mxu0 %vm1246_vm3, %v3569_v23 }
 0xa02   :  { %7980 = vmatpush3.bf16.msra.mxu1 %v7979_v21  ;;  %7992 = vmatpush3.bf16.msra.mxu0 %v7991_v22 }
 0xa03   :  { %7981 = vmatprep.subr.bf16.mxu1 %v8524_v38  ;;  %7993 = vmatprep.subr.bf16.mxu0 %v8524_v38 }
 0xa04   :  { %7500 = vmatprep.mubr.msk.f32.mxu1 %vm8525_vm1, %v8526_v44  ;;  %7519 = vmatprep.mubr.msk.f32.mxu0 %vm8525_vm1, %v8526_v44  ;;  %v8183_v44 = vpop.permute.xlu0 %8182 }
 0xa05   :  { %v8185_v5 = vunpack.i.h.bf16 %v8183_v44  ;;  %v8184_v7 = vunpack.i.l.bf16 %v8183_v44 }
 0xa06   :  { %7983 = vmatpush3.bf16.msra.mxu1 %v7982_v16  ;;  %7995 = vmatpush3.bf16.msra.mxu0 %v7994_v62 }
 0xa07   :  { %7984 = vmatprep.subr.bf16.mxu1 %v8524_v38  ;;  %7996 = vmatprep.subr.bf16.mxu0 %v8524_v38  ;;  %v8010_v9 = vpack.c.bf16 %v8185_v5, %v8184_v7 }
 0xa0a   :  { %7986 = vmatpush3.bf16.msra.mxu1 %v7985_v33  ;;  %7998 = vmatpush3.bf16.msra.mxu0 %v7997_v25 }
 0xa0b   :  { %7987 = vmatprep.subr.bf16.mxu1 %v8524_v38  ;;  %7999 = vmatprep.subr.bf16.mxu0 %v8524_v38  ;;  %v8193_v38 = vpop.permute.xlu0 %8192 }
 0xa0c   :  { %v8195_v37 = vunpack.i.h.bf16 %v8193_v38  ;;  %v8194_v39 = vunpack.i.l.bf16 %v8193_v38 }
 0xa0e   :  { %7989 = vmatpush3.bf16.msra.mxu1 %v7988_v4  ;;  %8001 = vmatpush3.bf16.msra.mxu0 %v8000_v3  ;;  %v8014_v43 = vpack.c.bf16 %v8195_v37, %v8194_v39 }
 0xa0f   :  { %8003 = vmatprep.subr.bf16.mxu1 %v8002_v8  ;;  %8011 = vmatprep.subr.bf16.mxu0 %v8010_v9  ;;  %v8203_v6 = vpop.permute.xlu0 %8202 }
 0xa10   :  { %v8205_v24 = vunpack.i.h.bf16 %v8203_v6  ;;  %v8204_v54 = vunpack.i.l.bf16 %v8203_v6 }
 0xa11   :  { %7501 = vmatmul.mubr.msk.f32.vlgmr.msra.gmra.mrb[24].mxu1 %vm1246_vm3, %v3569_v23  ;;  %7520 = vmatmul.mubr.msk.f32.vlgmr.msra.gmra.mrb[48].mxu0 %vm1246_vm3, %v3569_v23 }
 0xa12   :  { %8005 = vmatpush3.bf16.msra.mxu1 %v8002_v8  ;;  %8013 = vmatpush3.bf16.msra.mxu0 %v8010_v9  ;;  %v9895_v0 = vpack.c.bf16 %v8205_v24, %v8204_v54 }
 0xa13   :  { %8007 = vmatprep.subr.bf16.mxu1 %v8006_v11  ;;  %8015 = vmatprep.subr.bf16.mxu0 %v8014_v43 }
 0xa16   :  { %8009 = vmatpush3.bf16.msra.mxu1 %v8006_v11  ;;  %8017 = vmatpush3.bf16.msra.mxu0 %v8014_v43 }
 0xa17   :  { %8019 = vmatprep.subr.bf16.mxu1 %v9892_v41  ;;  %8027 = vmatprep.subr.bf16.mxu0 %v9895_v0 }
 0xad4   :  { %v9910_v32 = vpop.f32.mrb[22].mxu1  ;;  %v9912_v14 = vpop.f32.mrb[46].mxu0 }
 0xad5   :  { %v3941_v17 = vsel %vm863_vm2, %v9910_v32, 0.0  ;;  %v3948_v19 = vsel %vm863_vm2, %v9912_v14, 0.0  ;;  %v7464_v53 = vpop.f32.mrb[23].mxu1  ;;  %v7483_v15 = vpop.f32.mrb[47].mxu0 }
 0xad6   :  { %v3942_v55 = vrot.slane %v3941_v17, 4  ;;  %v3949_v56 = vrot.slane %v3948_v19, 4 }
 0xad8   :  { %v3943_v58 = vadd.f32 %v3942_v55, %v3941_v17  ;;  %v3950_v59 = vadd.f32 %v3949_v56, %v3948_v19 }
 0xada   :  { %v3944_v60 = vrot.slane %v3943_v58, 2  ;;  %v3951_v42 = vrot.slane %v3950_v59, 2 }
 0xadc   :  { %v3945_v20 = vadd.f32 %v3944_v60, %v3943_v58  ;;  %v3952_v40 = vadd.f32 %v3951_v42, %v3950_v59 }
 0xade   :  { %v3946_v18 = vrot.slane %v3945_v20, 1  ;;  %v3953_v49 = vrot.slane %v3952_v40, 1 }
 0xae0   :  { %v3947_v34 = vadd.f32 %v3946_v18, %v3945_v20  ;;  %v3954_v52 = vadd.f32 %v3953_v49, %v3952_v40 }
 0xae2   :  { %v3955_v21 = vadd.f32 %v3954_v52, %v3947_v34 }
 0xae4   :  { %v9918_v48 = vpop.f32.mrb[24].mxu1  ;;  %v9920_v61 = vpop.f32.mrb[48].mxu0 }
 0xae5   :  { %v3956_v22 = vsel %vm863_vm2, %v9918_v48, 0.0  ;;  %v3964_v2 = vsel %vm863_vm2, %v9920_v61, 0.0  ;;  %v7502_v45 = vpop.f32.mrb[25].mxu1  ;;  %v7521_v35 = vpop.f32.mrb[49].mxu0 }
 0xae6   :  { %v3957_v23 = vrot.slane %v3956_v22, 4  ;;  %v3965_v50 = vrot.slane %v3964_v2, 4 }
 0xae8   :  { %v3958_v51 = vadd.f32 %v3957_v23, %v3956_v22  ;;  %v3966_v62 = vadd.f32 %v3965_v50, %v3964_v2  ;;  %v4015_v50 = vld [vmem:[%s11275_s16] sm:$0x1] }
 0xaea   :  { %v3959_v16 = vrot.slane %v3958_v51, 2  ;;  %v3967_v47 = vrot.slane %v3966_v62, 2 }
 0xaec   :  { %v3960_v26 = vadd.f32 %v3959_v16, %v3958_v51  ;;  %v3968_v27 = vadd.f32 %v3967_v47, %v3966_v62  ;;  %v4017_v16 = vld [vmem:[%s11276_s17] sm:$0x1] }
 0xaee   :  { %v3961_v28 = vrot.slane %v3960_v26, 1  ;;  %v3969_v33 = vrot.slane %v3968_v27, 1 }
 0xaf0   :  { %v3962_v57 = vadd.f32 %v3961_v28, %v3960_v26  ;;  %v3970_v30 = vadd.f32 %v3969_v33, %v3968_v27 }
 0xaf2   :  { %v3963_v25 = vadd.f32 %v3962_v57, %v3955_v21 }
 0xaf4   :  { %v3971_v31 = vadd.f32 %v3970_v30, %v3963_v25 }
 0xaf6   :  { %v3972_v1 = vmul.f32 0.03125, %v3971_v31  ;;  %v8198_v31 = vpop.permute.xlu1 %8197 }
 0xaf8   :  { %v3973_v3 = vsub.f32 %v9910_v32, %v3972_v1  ;;  %v3982_v4 = vsub.f32 %v9912_v14, %v3972_v1  ;;  %v3992_v44 = vsub.f32 %v9918_v48, %v3972_v1  ;;  %v4002_v5 = vsub.f32 %v9920_v61, %v3972_v1 }
 0xafa   :  { %v3974_v7 = vmul.f32 %v3973_v3, %v3973_v3  ;;  %v3983_v8 = vmul.f32 %v3982_v4, %v3982_v4  ;;  %v3993_v9 = vmul.f32 %v3992_v44, %v3992_v44  ;;  %v4003_v10 = vmul.f32 %v4002_v5, %v4002_v5 }
 0xafc   :  { %v3975_v11 = vsel %vm863_vm2, %v3974_v7, 0.0  ;;  %v3984_v12 = vsel %vm863_vm2, %v3983_v8, 0.0  ;;  %v3994_v36 = vsel %vm863_vm2, %v3993_v9, 0.0  ;;  %v4004_v38 = vsel %vm863_vm2, %v4003_v10, 0.0 }
 0xafd   :  { %v3976_v37 = vrot.slane %v3975_v11, 4  ;;  %v3985_v39 = vrot.slane %v3984_v12, 4  ;;  %v3995_v43 = vrot.slane %v3994_v36, 4  ;;  %v4005_v6 = vrot.slane %v4004_v38, 4 }
 0xaff   :  { %v3977_v24 = vadd.f32 %v3976_v37, %v3975_v11  ;;  %v3986_v54 = vadd.f32 %v3985_v39, %v3984_v12  ;;  %v3996_v13 = vadd.f32 %v3995_v43, %v3994_v36  ;;  %v4006_v17 = vadd.f32 %v4005_v6, %v4004_v38 }
 0xb00   :  { %v8034_v6 = vpack.c.bf16 %v9906_v46, %v9901_v29 }
 0xb01   :  { %v3978_v19 = vrot.slane %v3977_v24, 2  ;;  %v3987_v53 = vrot.slane %v3986_v54, 2  ;;  %v3997_v15 = vrot.slane %v3996_v13, 2  ;;  %v4007_v55 = vrot.slane %v4006_v17, 2 }
 0xb03   :  { %v3979_v56 = vadd.f32 %v3978_v19, %v3977_v24  ;;  %v3988_v58 = vadd.f32 %v3987_v53, %v3986_v54  ;;  %v3998_v59 = vadd.f32 %v3997_v15, %v3996_v13  ;;  %v4008_v60 = vadd.f32 %v4007_v55, %v4006_v17 }
 0xb05   :  { %v3980_v42 = vrot.slane %v3979_v56, 1  ;;  %v3989_v20 = vrot.slane %v3988_v58, 1  ;;  %v3999_v40 = vrot.slane %v3998_v59, 1  ;;  %v4009_v34 = vrot.slane %v4008_v60, 1 }
 0xb07   :  { %v3981_v18 = vadd.f32 %v3980_v42, %v3979_v56  ;;  %v3990_v49 = vadd.f32 %v3989_v20, %v3988_v58  ;;  %v4000_v21 = vadd.f32 %v3999_v40, %v3998_v59  ;;  %v4010_v2 = vadd.f32 %v4009_v34, %v4008_v60 }
 0xb09   :  { %v3991_v52 = vadd.f32 %v3990_v49, %v3981_v18 }
 0xb0b   :  { %v4001_v22 = vadd.f32 %v4000_v21, %v3991_v52 }
 0xb0d   :  { %v4011_v45 = vadd.f32 %v4010_v2, %v4001_v22 }
 0xb0f   :  { %v4012_v35 = vmul.f32 0.03125, %v4011_v45 }
 0xb11   :  { %v4013_v23 = vadd.f32 1e-05, %v4012_v35 }
 0xb13   :  { %8262 = vrsqrt.f32 %v4013_v23 }
 0xb1d   :  { %v8263_v51 = vpop.eup %8262 }
 0xb1e   :  { %v4016_v62 = vmul.f32 %v8263_v51, %v4015_v50 }
 0xb20   :  { %v4018_v47 = vmul.f32 %v4016_v62, %v3972_v1  ;;  %v4023_v26 = vrot.slane %v4016_v62, %v8874_v63 }
 0xb22   :  { %v4019_v27 = vsub.f32 %v4017_v16, %v4018_v47  ;;  %v4024_v28 = vmul.f32 %v4023_v26, %v9910_v32  ;;  %v4034_v33 = vmul.f32 %v4023_v26, %v9912_v14  ;;  %v4038_v57 = vmul.f32 %v4023_v26, %v9918_v48  ;;  %v8208_v32 = vpop.permute.xlu1 %8207 }
 0xb23   :  { %v4042_v25 = vmul.f32 %v4023_v26, %v9920_v61  ;;  %v8200_v14 = vunpack.i.h.bf16 %v8198_v31  ;;  %v8199_v48 = vunpack.i.l.bf16 %v8198_v31  ;;  %v8210_v61 = vunpack.i.h.bf16 %v8208_v32 }
 0xb24   :  { %v4029_v30 = vrot.slane %v4019_v27, %v8874_v63  ;;  %v8209_v10 = vunpack.i.l.bf16 %v8208_v32 }
 0xb25   :  { %v8022_v36 = vpack.c.bf16 %v8200_v14, %v8199_v48 }
 0xb26   :  { %v4031_v3 = vadd.f32 %v4029_v30, %v4024_v28  ;;  %v4035_v4 = vadd.f32 %v4034_v33, %v4029_v30  ;;  %v4039_v44 = vadd.f32 %v4038_v57, %v4029_v30  ;;  %v4043_v5 = vadd.f32 %v4042_v25, %v4029_v30  ;;  %v8218_v43 = vpop.permute.xlu1 %8217 }
 0xb27   :  { %v8030_v38 = vpack.c.bf16 %v8210_v61, %v8209_v10  ;;  %v8219_v13 = vunpack.i.l.bf16 %v8218_v43 }
 0xb28   :  { %v4032_v7 = vmax.f32 %v4031_v3, 0.0  ;;  %v4036_v1 = vmax.f32 %v4035_v4, 0.0  ;;  %v4040_v8 = vmax.f32 %v4039_v44, 0.0  ;;  %v4044_v9 = vmax.f32 %v4043_v5, 0.0 }
 0xb2a   :  { %4033 = vst.msk [vmem:[#allocation6] sm:$0xff] %vm863_vm2, %v4032_v7  ;;  %4037 = vst.msk [vmem:[#allocation6 + $0x8] sm:$0xff] %vm863_vm2, %v4036_v1 }
 0xb2b   :  { %4041 = vst.msk [vmem:[#allocation6 + $0x10] sm:$0xff] %vm863_vm2, %v4040_v8  ;;  %4045 = vst.msk [vmem:[#allocation6 + $0x18] sm:$0xff] %vm863_vm2, %v4044_v9 }
 0xb31   :  { %v4046_v11 = vld [vmem:[#allocation6] sm:$0xff]  ;;  %v4047_v12 = vld [vmem:[#allocation6 + $0x8] sm:$0xff] }
 0xb32   :  { %7530 = vmatprep.mubr.msk.f32.mxu1 %vm863_vm2, %v4046_v11  ;;  %7544 = vmatprep.mubr.msk.f32.mxu0 %vm863_vm2, %v4046_v11  ;;  %v4048_v37 = vld [vmem:[#allocation6 + $0x10] sm:$0xff]  ;;  %v4049_v39 = vld [vmem:[#allocation6 + $0x18] sm:$0xff] }
 0xb33   :  { %7531 = vmatmul.mubr.msk.f32.vlgmr.msra.gmra.mrb[26].mxu1 %vm863_vm2, %v4047_v12  ;;  %7545 = vmatmul.mubr.msk.f32.vlgmr.msra.gmra.mrb[50].mxu0 %vm863_vm2, %v4047_v12 }
 0xb34   :  { %8021 = vmatpush3.bf16.msra.mxu1 %v9892_v41  ;;  %7533 = vmatprep.mubr.msk.f32.mxu1 %vm863_vm2, %v4048_v37  ;;  %v8213_v41 = vpop.permute.xlu0 %8212 }
 0xb35   :  { %7547 = vmatprep.mubr.msk.f32.mxu0 %vm863_vm2, %v4048_v37  ;;  %8029 = vmatpush3.bf16.msra.mxu0 %v9895_v0  ;;  %v8215_v24 = vunpack.i.h.bf16 %v8213_v41  ;;  %v8214_v54 = vunpack.i.l.bf16 %v8213_v41 }
 0xb36   :  { %8023 = vmatprep.subr.bf16.mxu1 %v8022_v36  ;;  %8031 = vmatprep.subr.bf16.mxu0 %v8030_v38 }
 0xb37   :  { %7534 = vmatmul.mubr.msk.f32.gmra.mrb[28].mxu1 %vm863_vm2, %v4049_v39  ;;  %7548 = vmatmul.mubr.msk.f32.gmra.mrb[52].mxu0 %vm863_vm2, %v4049_v39  ;;  %v8038_v17 = vpack.c.bf16 %v8215_v24, %v8214_v54 }
 0xb38   :  { %8025 = vmatpush3.bf16.msra.mxu1 %v8022_v36  ;;  %7558 = vmatprep.mubr.msk.f32.mxu1 %vm863_vm2, %v4046_v11  ;;  %v8223_v53 = vpop.permute.xlu0 %8222 }
 0xb39   :  { %8050 = vmatprep.subr.bf16.mxu1 %v9895_v0  ;;  %8033 = vmatpush3.bf16.msra.mxu0 %v8030_v38  ;;  %v8225_v15 = vunpack.i.h.bf16 %v8223_v53  ;;  %v8224_v55 = vunpack.i.l.bf16 %v8223_v53 }
 0xb3a   :  { %7572 = vmatprep.mubr.msk.f32.mxu0 %vm863_vm2, %v4046_v11  ;;  %8039 = vmatprep.subr.bf16.mxu0 %v8038_v17 }
 0xb3b   :  { %7559 = vmatmul.mubr.msk.f32.vlgmr.msra.gmra.mrb[30].mxu1 %vm863_vm2, %v4047_v12  ;;  %v9975_v56 = vpack.c.bf16 %v8225_v15, %v8224_v55 }
 0xb3c   :  { %8052 = vmatpush3.bf16.msra.mxu1 %v9895_v0  ;;  %7573 = vmatmul.mubr.msk.f32.vlgmr.msra.gmra.mrb[54].mxu0 %vm863_vm2, %v4047_v12  ;;  %v8220_v0 = vunpack.i.h.bf16 %v8218_v43 }
 0xb3d   :  { %7561 = vmatprep.mubr.msk.f32.mxu1 %vm863_vm2, %v4048_v37  ;;  %8051 = vmatprep.subr.bf16.mxu1 %v8030_v38 }
 0xb3e   :  { %v9972_v19 = vpack.c.bf16 %v8220_v0, %v8219_v13  ;;  %8041 = vmatpush3.bf16.msra.mxu0 %v8038_v17 }
 0xb3f   :  { %7562 = vmatmul.mubr.msk.f32.gmra.mrb[32].mxu1 %vm863_vm2, %v4049_v39  ;;  %8047 = vmatprep.subr.bf16.mxu0 %v9975_v56 }
 0xb40   :  { %8053 = vmatpush3.bf16.msra.mxu1 %v8030_v38  ;;  %7575 = vmatprep.mubr.msk.f32.mxu1 %vm863_vm2, %v4048_v37 }
 0xb41   :  { %8035 = vmatprep.subr.bf16.mxu1 %v8034_v6 }
 0xb43   :  { %7576 = vmatmul.mubr.msk.f32.vlgmr.msra.gmra.mrb[34].mxu1 %vm863_vm2, %v4049_v39 }
 0xb44   :  { %8037 = vmatpush3.bf16.msra.mxu1 %v8034_v6 }
 0xb45   :  { %8043 = vmatprep.subr.bf16.mxu1 %v9972_v19 }
 0xc06   :  { %v9978_v29 = vpop.f32.mrb[26].mxu1  ;;  %v9980_v46 = vpop.f32.mrb[50].mxu0 }
 0xc07   :  { %v4447_v58 = vsel %vm254_vm0, %v9978_v29, 0.0  ;;  %v4460_v59 = vsel %vm254_vm0, %v9980_v46, 0.0  ;;  %v9986_v60 = vpop.f32.mrb[27].mxu1  ;;  %v9988_v42 = vpop.f32.mrb[51].mxu0 }
 0xc08   :  { %v4446_v20 = vsel %vm254_vm0, %v9986_v60, 0.0  ;;  %v4459_v40 = vsel %vm254_vm0, %v9988_v42, 0.0 }
 0xc09   :  { %v4448_v18 = vadd.f32 %v4447_v58, %v4446_v20  ;;  %v4461_v49 = vadd.f32 %v4460_v59, %v4459_v40 }
 0xc0a   :  { %v9994_v34 = vpop.f32.mrb[28].mxu1  ;;  %v9996_v52 = vpop.f32.mrb[52].mxu0 }
 0xc0b   :  { %v9998_v21 = vpop.f32.mrb[29].mxu1  ;;  %v10000_v22 = vpop.f32.mrb[53].mxu0  ;;  %v4451_v50 = vsel %vm254_vm0, %v9994_v34, 0.0  ;;  %v4464_v51 = vsel %vm254_vm0, %v9996_v52, 0.0 }
 0xc0c   :  { %v4449_v2 = vsel %vm254_vm0, %v9998_v21, 0.0  ;;  %v4462_v45 = vsel %vm254_vm0, %v10000_v22, 0.0 }
 0xc0d   :  { %v4450_v35 = vadd.f32 %v4449_v2, %v4448_v18  ;;  %v4463_v23 = vadd.f32 %v4462_v45, %v4461_v49 }
 0xc0e   :  { %v10010_v62 = vpop.f32.mrb[30].mxu1 }
 0xc0f   :  { %v4452_v16 = vadd.f32 %v4451_v50, %v4450_v35  ;;  %v4465_v47 = vadd.f32 %v4464_v51, %v4463_v23  ;;  %v4474_v26 = vsel %vm254_vm0, %v10010_v62, 0.0  ;;  %v10014_v27 = vpop.f32.mrb[54].mxu0  ;;  %v10016_v28 = vpop.f32.mrb[31].mxu1 }
 0xc10   :  { %v4488_v33 = vsel %vm254_vm0, %v10014_v27, 0.0  ;;  %v4473_v57 = vsel %vm254_vm0, %v10016_v28, 0.0  ;;  %v10022_v25 = vpop.f32.mrb[55].mxu0 }
 0xc11   :  { %v4453_v30 = vrot.slane %v4452_v16, 4  ;;  %v4466_v31 = vrot.slane %v4465_v47, 4  ;;  %v4475_v3 = vadd.f32 %v4474_v26, %v4473_v57  ;;  %v4487_v4 = vsel %vm254_vm0, %v10022_v25, 0.0 }
 0xc12   :  { %v4489_v44 = vadd.f32 %v4488_v33, %v4487_v4  ;;  %v10026_v5 = vpop.f32.mrb[32].mxu1 }
 0xc13   :  { %v4454_v7 = vadd.f32 %v4453_v30, %v4452_v16  ;;  %v4467_v1 = vadd.f32 %v4466_v31, %v4465_v47  ;;  %v10028_v8 = vpop.f32.mrb[33].mxu1  ;;  %v4478_v61 = vsel %vm254_vm0, %v10026_v5, 0.0 }
 0xc14   :  { %v4476_v9 = vsel %vm254_vm0, %v10028_v8, 0.0 }
 0xc15   :  { %v4455_v32 = vrot.slane %v4454_v7, 2  ;;  %v4468_v14 = vrot.slane %v4467_v1, 2  ;;  %v4477_v48 = vadd.f32 %v4476_v9, %v4475_v3 }
 0xc16   :  { %v10034_v10 = vpop.f32.mrb[34].mxu1 }
 0xc17   :  { %v4456_v11 = vadd.f32 %v4455_v32, %v4454_v7  ;;  %v4469_v12 = vadd.f32 %v4468_v14, %v4467_v1  ;;  %v4479_v36 = vadd.f32 %v4478_v61, %v4477_v48  ;;  %v10036_v38 = vpop.f32.mrb[35].mxu1  ;;  %v4492_v24 = vsel %vm254_vm0, %v10034_v10, 0.0 }
 0xc18   :  { %v4490_v37 = vsel %vm254_vm0, %v10036_v38, 0.0 }
 0xc19   :  { %v4457_v39 = vrot.slane %v4456_v11, 1  ;;  %v4470_v41 = vrot.slane %v4469_v12, 1  ;;  %v4480_v43 = vrot.slane %v4479_v36, 4  ;;  %v4491_v6 = vadd.f32 %v4490_v37, %v4489_v44 }
 0xc1b   :  { %v4458_v54 = vadd.f32 %v4457_v39, %v4456_v11  ;;  %v4471_v0 = vadd.f32 %v4470_v41, %v4469_v12  ;;  %v4481_v13 = vadd.f32 %v4480_v43, %v4479_v36  ;;  %v4493_v17 = vadd.f32 %v4492_v24, %v4491_v6 }
 0xc1d   :  { %v4472_v53 = vadd.f32 %v4471_v0, %v4458_v54  ;;  %v4482_v15 = vrot.slane %v4481_v13, 2  ;;  %v4494_v55 = vrot.slane %v4493_v17, 4 }
 0xc1f   :  { %v4483_v58 = vadd.f32 %v4482_v15, %v4481_v13  ;;  %v4495_v59 = vadd.f32 %v4494_v55, %v4493_v17 }
 0xc21   :  { %v4484_v20 = vrot.slane %v4483_v58, 1  ;;  %v4496_v40 = vrot.slane %v4495_v59, 2 }
 0xc23   :  { %v4485_v18 = vadd.f32 %v4484_v20, %v4483_v58  ;;  %v4497_v49 = vadd.f32 %v4496_v40, %v4495_v59 }
 0xc25   :  { %v4486_v2 = vadd.f32 %v4485_v18, %v4472_v53  ;;  %v4498_v45 = vrot.slane %v4497_v49, 1 }
 0xc27   :  { %v4499_v35 = vadd.f32 %v4498_v45, %v4497_v49 }
 0xc29   :  { %v4500_v23 = vadd.f32 %v4499_v35, %v4486_v2 }
 0xc2b   :  { %v10042_v50 = vmul.f32 0.0078125, %v4500_v23 }
 0xc2d   :  { %v4502_v51 = vsub.f32 %v9986_v60, %v10042_v50  ;;  %v4503_v16 = vsub.f32 %v9978_v29, %v10042_v50  ;;  %v4504_v47 = vsub.f32 %v9998_v21, %v10042_v50  ;;  %v4505_v26 = vsub.f32 %v9994_v34, %v10042_v50 }
 0xc2e   :  { %v4523_v33 = vsub.f32 %v9988_v42, %v10042_v50  ;;  %v4524_v57 = vsub.f32 %v9980_v46, %v10042_v50  ;;  %v4525_v30 = vsub.f32 %v10000_v22, %v10042_v50  ;;  %v4526_v31 = vsub.f32 %v9996_v52, %v10042_v50 }
 0xc2f   :  { %v4506_v3 = vmul.f32 %v4502_v51, %v4502_v51  ;;  %v4507_v4 = vmul.f32 %v4503_v16, %v4503_v16  ;;  %v4508_v44 = vmul.f32 %v4504_v47, %v4504_v47  ;;  %v4509_v7 = vmul.f32 %v4505_v26, %v4505_v26 }
 0xc30   :  { %v4527_v1 = vmul.f32 %v4523_v33, %v4523_v33  ;;  %v4528_v9 = vmul.f32 %v4524_v57, %v4524_v57  ;;  %v4529_v32 = vmul.f32 %v4525_v30, %v4525_v30  ;;  %v4530_v14 = vmul.f32 %v4526_v31, %v4526_v31 }
 0xc31   :  { %v4510_v48 = vsel %vm254_vm0, %v4506_v3, 0.0  ;;  %v4511_v61 = vsel %vm254_vm0, %v4507_v4, 0.0  ;;  %v4513_v11 = vsel %vm254_vm0, %v4508_v44, 0.0  ;;  %v4515_v12 = vsel %vm254_vm0, %v4509_v7, 0.0 }
 0xc32   :  { %v4512_v36 = vadd.f32 %v4511_v61, %v4510_v48  ;;  %v4531_v37 = vsel %vm254_vm0, %v4527_v1, 0.0  ;;  %v4532_v39 = vsel %vm254_vm0, %v4528_v9, 0.0  ;;  %v4534_v41 = vsel %vm254_vm0, %v4529_v32, 0.0 }
 0xc33   :  { %v4533_v43 = vadd.f32 %v4532_v39, %v4531_v37  ;;  %v4536_v6 = vsel %vm254_vm0, %v4530_v14, 0.0  ;;  %v4545_v24 = vsub.f32 %v10016_v28, %v10042_v50  ;;  %v4546_v54 = vsub.f32 %v10010_v62, %v10042_v50 }
 0xc34   :  { %v4514_v0 = vadd.f32 %v4513_v11, %v4512_v36  ;;  %v4547_v13 = vsub.f32 %v10028_v8, %v10042_v50  ;;  %v4548_v17 = vsub.f32 %v10026_v5, %v10042_v50  ;;  %v4567_v53 = vsub.f32 %v10022_v25, %v10042_v50 }
 0xc35   :  { %v4535_v15 = vadd.f32 %v4534_v41, %v4533_v43  ;;  %v4549_v55 = vmul.f32 %v4545_v24, %v4545_v24  ;;  %v4550_v58 = vmul.f32 %v4546_v54, %v4546_v54  ;;  %v4568_v59 = vsub.f32 %v10014_v27, %v10042_v50 }
 0xc36   :  { %v4516_v20 = vadd.f32 %v4515_v12, %v4514_v0  ;;  %v4551_v40 = vmul.f32 %v4547_v13, %v4547_v13  ;;  %v4552_v18 = vmul.f32 %v4548_v17, %v4548_v17  ;;  %v4569_v49 = vsub.f32 %v10036_v38, %v10042_v50 }
 0xc37   :  { %v4537_v2 = vadd.f32 %v4536_v6, %v4535_v15  ;;  %v4553_v45 = vsel %vm254_vm0, %v4549_v55, 0.0  ;;  %v4554_v35 = vsel %vm254_vm0, %v4550_v58, 0.0  ;;  %v4570_v23 = vsub.f32 %v10034_v10, %v10042_v50 }
 0xc38   :  { %v4517_v51 = vrot.slane %v4516_v20, 4  ;;  %v4555_v16 = vadd.f32 %v4554_v35, %v4553_v45  ;;  %v4556_v47 = vsel %vm254_vm0, %v4551_v40, 0.0  ;;  %v4571_v33 = vmul.f32 %v4567_v53, %v4567_v53 }
 0xc39   :  { %v4538_v26 = vrot.slane %v4537_v2, 4  ;;  %v4572_v57 = vmul.f32 %v4568_v59, %v4568_v59  ;;  %v4573_v30 = vmul.f32 %v4569_v49, %v4569_v49  ;;  %v4558_v4 = vsel %vm254_vm0, %v4552_v18, 0.0 }
 0xc3a   :  { %v4518_v31 = vadd.f32 %v4517_v51, %v4516_v20  ;;  %v4557_v3 = vadd.f32 %v4556_v47, %v4555_v16  ;;  %v4574_v7 = vmul.f32 %v4570_v23, %v4570_v23  ;;  %v4575_v1 = vsel %vm254_vm0, %v4571_v33, 0.0  ;;  %v4592_v16 = vld [vmem:[%s11277_s19] sm:$0x1] }
 0xc3b   :  { %v4539_v44 = vadd.f32 %v4538_v26, %v4537_v2  ;;  %v4576_v9 = vsel %vm254_vm0, %v4572_v57, 0.0  ;;  %v4578_v11 = vsel %vm254_vm0, %v4573_v30, 0.0  ;;  %v4594_v33 = vld [vmem:[%s11278_s20] sm:$0x1] }
 0xc3c   :  { %v4519_v32 = vrot.slane %v4518_v31, 2  ;;  %v4559_v14 = vadd.f32 %v4558_v4, %v4557_v3  ;;  %v4577_v48 = vadd.f32 %v4576_v9, %v4575_v1  ;;  %v4580_v41 = vsel %vm254_vm0, %v4574_v7, 0.0 }
 0xc3d   :  { %v4540_v61 = vrot.slane %v4539_v44, 2 }
 0xc3e   :  { %v4520_v12 = vadd.f32 %v4519_v32, %v4518_v31  ;;  %v4560_v36 = vrot.slane %v4559_v14, 4  ;;  %v4579_v37 = vadd.f32 %v4578_v11, %v4577_v48 }
 0xc3f   :  { %v4541_v39 = vadd.f32 %v4540_v61, %v4539_v44 }
 0xc40   :  { %v4521_v43 = vrot.slane %v4520_v12, 1  ;;  %v4561_v6 = vadd.f32 %v4560_v36, %v4559_v14  ;;  %v4581_v24 = vadd.f32 %v4580_v41, %v4579_v37 }
 0xc41   :  { %v4542_v54 = vrot.slane %v4541_v39, 1 }
 0xc42   :  { %v4522_v0 = vadd.f32 %v4521_v43, %v4520_v12  ;;  %v4562_v13 = vrot.slane %v4561_v6, 2  ;;  %v4582_v17 = vrot.slane %v4581_v24, 4 }
 0xc43   :  { %v4543_v53 = vadd.f32 %v4542_v54, %v4541_v39 }
 0xc44   :  { %v4563_v15 = vadd.f32 %v4562_v13, %v4561_v6  ;;  %v4583_v55 = vadd.f32 %v4582_v17, %v4581_v24 }
 0xc45   :  { %v4544_v58 = vadd.f32 %v4543_v53, %v4522_v0 }
 0xc46   :  { %v4564_v59 = vrot.slane %v4563_v15, 1  ;;  %v4584_v20 = vrot.slane %v4583_v55, 2 }
 0xc48   :  { %v4565_v40 = vadd.f32 %v4564_v59, %v4563_v15  ;;  %v4585_v18 = vadd.f32 %v4584_v20, %v4583_v55 }
 0xc4a   :  { %v4566_v49 = vadd.f32 %v4565_v40, %v4544_v58  ;;  %v4586_v2 = vrot.slane %v4585_v18, 1 }
 0xc4c   :  { %v4587_v45 = vadd.f32 %v4586_v2, %v4585_v18 }
 0xc4e   :  { %v4588_v35 = vadd.f32 %v4587_v45, %v4566_v49 }
 0xc50   :  { %v4589_v23 = vmul.f32 0.0078125, %v4588_v35 }
 0xc52   :  { %v4590_v51 = vadd.f32 1e-05, %v4589_v23 }
 0xc54   :  { %8264 = vrsqrt.f32 %v4590_v51 }
 0xc5e   :  { %v8265_v47 = vpop.eup %8264 }
 0xc5f   :  { %v4593_v26 = vmul.f32 %v8265_v47, %v4592_v16 }
 0xc61   :  { %v4595_v57 = vmul.f32 %v4593_v26, %v10042_v50  ;;  %v4600_v30 = vrot.slane %v4593_v26, %v8874_v63 }
 0xc63   :  { %v4596_v31 = vsub.f32 %v4594_v33, %v4595_v57  ;;  %v4657_v3 = vmul.f32 %v4600_v30, %v10036_v38  ;;  %v4601_v4 = vmul.f32 %v4600_v30, %v9986_v60  ;;  %v4602_v44 = vmul.f32 %v9978_v29, %v4600_v30 }
 0xc64   :  { %v4603_v7 = vmul.f32 %v4600_v30, %v9998_v21  ;;  %v4604_v1 = vmul.f32 %v9994_v34, %v4600_v30  ;;  %v4623_v9 = vmul.f32 %v4600_v30, %v9988_v42  ;;  %v4624_v32 = vmul.f32 %v9980_v46, %v4600_v30 }
 0xc65   :  { %v4609_v14 = vrot.slane %v4596_v31, %v8874_v63  ;;  %v4625_v50 = vmul.f32 %v4600_v30, %v10000_v22  ;;  %v4626_v48 = vmul.f32 %v9996_v52, %v4600_v30  ;;  %v4639_v38 = vmul.f32 %v4600_v30, %v10016_v28 }
 0xc66   :  { %v4640_v60 = vmul.f32 %v10010_v62, %v4600_v30  ;;  %v4641_v29 = vmul.f32 %v4600_v30, %v10028_v8  ;;  %v4642_v21 = vmul.f32 %v10026_v5, %v4600_v30  ;;  %v4655_v34 = vmul.f32 %v4600_v30, %v10022_v25 }
 0xc67   :  { %v4661_v61 = vadd.f32 %v4657_v3, %v4609_v14  ;;  %v4611_v42 = vadd.f32 %v4609_v14, %v4601_v4  ;;  %v4612_v11 = vadd.f32 %v4609_v14, %v4602_v44  ;;  %v4613_v46 = vadd.f32 %v4609_v14, %v4603_v7 }
 0xc68   :  { %v4614_v12 = vadd.f32 %v4609_v14, %v4604_v1  ;;  %v4627_v36 = vadd.f32 %v4623_v9, %v4609_v14  ;;  %v4628_v37 = vadd.f32 %v4624_v32, %v4609_v14  ;;  %v4629_v22 = vadd.f32 %v4625_v50, %v4609_v14 }
 0xc69   :  { %v4665_v39 = vmax.f32 %v4661_v61, 0.0  ;;  %v4615_v52 = vmax.f32 %v4611_v42, 0.0  ;;  %v4616_v41 = vmax.f32 %v4612_v11, 0.0  ;;  %v4617_v28 = vmax.f32 %v4613_v46, 0.0 }
 0xc6a   :  { %v4618_v43 = vmax.f32 %v4614_v12, 0.0  ;;  %v4631_v62 = vmax.f32 %v4627_v36, 0.0  ;;  %v4632_v6 = vmax.f32 %v4628_v37, 0.0  ;;  %v4633_v8 = vmax.f32 %v4629_v22, 0.0 }
 0xc6b   :  { %4669 = vst.msk [vmem:[#allocation7 + $0x70] sm:$0xff] %vm254_vm0, %v4665_v39  ;;  %4619 = vst.msk [vmem:[#allocation7] sm:$0xff] %vm254_vm0, %v4615_v52  ;;  %v4630_v25 = vadd.f32 %v4626_v48, %v4609_v14  ;;  %v4643_v5 = vadd.f32 %v4639_v38, %v4609_v14  ;;  %v4644_v24 = vadd.f32 %v4640_v60, %v4609_v14 }
 0xc6c   :  { %4620 = vst.msk [vmem:[#allocation7 + $0x8] sm:$0xff] %vm254_vm0, %v4616_v41  ;;  %4621 = vst.msk [vmem:[#allocation7 + $0x10] sm:$0xff] %vm254_vm0, %v4617_v28  ;;  %v4645_v54 = vadd.f32 %v4641_v29, %v4609_v14  ;;  %v4646_v0 = vadd.f32 %v4642_v21, %v4609_v14  ;;  %v4659_v13 = vadd.f32 %v4655_v34, %v4609_v14 }
 0xc6d   :  { %4622 = vst.msk [vmem:[#allocation7 + $0x18] sm:$0xff] %vm254_vm0, %v4618_v43  ;;  %4635 = vst.msk [vmem:[#allocation7 + $0x20] sm:$0xff] %vm254_vm0, %v4631_v62  ;;  %v4656_v17 = vmul.f32 %v10014_v27, %v4600_v30  ;;  %v4658_v53 = vmul.f32 %v10034_v10, %v4600_v30  ;;  %v4634_v15 = vmax.f32 %v4630_v25, 0.0  ;;  %v4647_v55 = vmax.f32 %v4643_v5, 0.0 }
 0xc6e   :  { %4636 = vst.msk [vmem:[#allocation7 + $0x28] sm:$0xff] %vm254_vm0, %v4632_v6  ;;  %4637 = vst.msk [vmem:[#allocation7 + $0x30] sm:$0xff] %vm254_vm0, %v4633_v8  ;;  %v4648_v58 = vmax.f32 %v4644_v24, 0.0  ;;  %v4649_v59 = vmax.f32 %v4645_v54, 0.0  ;;  %v4650_v20 = vmax.f32 %v4646_v0, 0.0  ;;  %v4663_v40 = vmax.f32 %v4659_v13, 0.0 }
 0xc6f   :  { %v4660_v18 = vadd.f32 %v4656_v17, %v4609_v14  ;;  %v4662_v49 = vadd.f32 %v4658_v53, %v4609_v14  ;;  %4638 = vst.msk [vmem:[#allocation7 + $0x38] sm:$0xff] %vm254_vm0, %v4634_v15  ;;  %4651 = vst.msk [vmem:[#allocation7 + $0x40] sm:$0xff] %vm254_vm0, %v4647_v55 }
 0xc70   :  { %4652 = vst.msk [vmem:[#allocation7 + $0x48] sm:$0xff] %vm254_vm0, %v4648_v58  ;;  %4653 = vst.msk [vmem:[#allocation7 + $0x50] sm:$0xff] %vm254_vm0, %v4649_v59 }
 0xc71   :  { %4654 = vst.msk [vmem:[#allocation7 + $0x58] sm:$0xff] %vm254_vm0, %v4650_v20  ;;  %4667 = vst.msk [vmem:[#allocation7 + $0x60] sm:$0xff] %vm254_vm0, %v4663_v40  ;;  %v4664_v27 = vmax.f32 %v4660_v18, 0.0  ;;  %v4666_v10 = vmax.f32 %v4662_v49, 0.0 }
 0xc72   :  { %v4671_v2 = vld [vmem:[#allocation7] sm:$0xff]  ;;  %v4685_v3 = vld [vmem:[#allocation7 + $0x70] sm:$0xff] }
 0xc73   :  { %v4672_v45 = vld [vmem:[#allocation7 + $0x8] sm:$0xff]  ;;  %4668 = vst.msk [vmem:[#allocation7 + $0x68] sm:$0xff] %vm254_vm0, %v4664_v27  ;;  %4670 = vst.msk [vmem:[#allocation7 + $0x78] sm:$0xff] %vm254_vm0, %v4666_v10  ;;  %7582 = vmatprep.mubr.msk.f32.mxu1 %vm254_vm0, %v4671_v2  ;;  %7610 = vmatprep.mubr.msk.f32.mxu0 %vm254_vm0, %v4671_v2  ;;  %v4673_v35 = vld [vmem:[#allocation7 + $0x10] sm:$0xff] }
 0xc74   :  { %7583 = vmatmul.mubr.msk.f32.vlgmr.msra.gmra.mrb[36].mxu1 %vm254_vm0, %v4672_v45  ;;  %7611 = vmatmul.mubr.msk.f32.vlgmr.msra.gmra.mrb[56].mxu0 %vm254_vm0, %v4672_v45  ;;  %v4674_v23 = vld [vmem:[#allocation7 + $0x18] sm:$0xff]  ;;  %v4675_v51 = vld [vmem:[#allocation7 + $0x20] sm:$0xff] }
 0xc75   :  { %8045 = vmatpush3.bf16.msra.mxu1 %v9972_v19  ;;  %7585 = vmatprep.mubr.msk.f32.mxu1 %vm254_vm0, %v4673_v35  ;;  %v4676_v16 = vld [vmem:[#allocation7 + $0x28] sm:$0xff]  ;;  %v4677_v19 = vld [vmem:[#allocation7 + $0x30] sm:$0xff] }
 0xc76   :  { %7613 = vmatprep.mubr.msk.f32.mxu0 %vm254_vm0, %v4673_v35  ;;  %8049 = vmatpush3.bf16.msra.mxu0 %v9975_v56  ;;  %v4678_v56 = vld [vmem:[#allocation7 + $0x38] sm:$0xff]  ;;  %v4679_v47 = vld [vmem:[#allocation7 + $0x40] sm:$0xff] }
 0xc77   :  { %v4680_v26 = vld [vmem:[#allocation7 + $0x48] sm:$0xff]  ;;  %v4681_v33 = vld [vmem:[#allocation7 + $0x50] sm:$0xff] }
 0xc78   :  { %7586 = vmatmul.mubr.msk.f32.gmra.mrb[38].mxu1 %vm254_vm0, %v4674_v23  ;;  %7614 = vmatmul.mubr.msk.f32.gmra.mrb[58].mxu0 %vm254_vm0, %v4674_v23  ;;  %v4682_v57 = vld [vmem:[#allocation7 + $0x58] sm:$0xff]  ;;  %v4683_v30 = vld [vmem:[#allocation7 + $0x60] sm:$0xff] }
 0xc79   :  { %7588 = vmatprep.mubr.msk.f32.mxu1 %vm254_vm0, %v4675_v51  ;;  %7616 = vmatprep.mubr.msk.f32.mxu0 %vm254_vm0, %v4675_v51 }
 0xc7a   :  { %v4684_v31 = vld [vmem:[#allocation7 + $0x68] sm:$0xff]  ;;  %v4686_v4 = vld [vmem:[#allocation7 + $0x78] sm:$0xff] }
 0xc7c   :  { %7589 = vmatmul.mubr.msk.f32.gmra.mrb[40].mxu1 %vm254_vm0, %v4676_v16  ;;  %7617 = vmatmul.mubr.msk.f32.gmra.mrb[60].mxu0 %vm254_vm0, %v4676_v16 }
 0xc7d   :  { %7591 = vmatprep.mubr.msk.f32.mxu1 %vm254_vm0, %v4677_v19  ;;  %7619 = vmatprep.mubr.msk.f32.mxu0 %vm254_vm0, %v4677_v19 }
 0xc80   :  { %7592 = vmatmul.mubr.msk.f32.gmra.mrb[42].mxu1 %vm254_vm0, %v4678_v56  ;;  %7620 = vmatmul.mubr.msk.f32.gmra.mrb[62].mxu0 %vm254_vm0, %v4678_v56 }
 0xc81   :  { %7594 = vmatprep.mubr.msk.f32.mxu1 %vm254_vm0, %v4679_v47  ;;  %7622 = vmatprep.mubr.msk.f32.mxu0 %vm254_vm0, %v4679_v47 }
 0xc84   :  { %7595 = vmatmul.mubr.msk.f32.gmra.mrb[44].mxu1 %vm254_vm0, %v4680_v26  ;;  %7623 = vmatmul.mubr.msk.f32.gmra.mrb[64].mxu0 %vm254_vm0, %v4680_v26 }
 0xc85   :  { %7597 = vmatprep.mubr.msk.f32.mxu1 %vm254_vm0, %v4681_v33  ;;  %7625 = vmatprep.mubr.msk.f32.mxu0 %vm254_vm0, %v4681_v33 }
 0xc88   :  { %7598 = vmatmul.mubr.msk.f32.gmra.mrb[46].mxu1 %vm254_vm0, %v4682_v57  ;;  %7626 = vmatmul.mubr.msk.f32.gmra.mrb[66].mxu0 %vm254_vm0, %v4682_v57 }
 0xc89   :  { %7600 = vmatprep.mubr.msk.f32.mxu1 %vm254_vm0, %v4683_v30  ;;  %7628 = vmatprep.mubr.msk.f32.mxu0 %vm254_vm0, %v4683_v30 }
 0xc8c   :  { %7601 = vmatmul.mubr.msk.f32.gmra.mrb[48].mxu1 %vm254_vm0, %v4684_v31  ;;  %7629 = vmatmul.mubr.msk.f32.gmra.mrb[68].mxu0 %vm254_vm0, %v4684_v31 }
 0xc8d   :  { %7603 = vmatprep.mubr.msk.f32.mxu1 %vm254_vm0, %v4685_v3  ;;  %7631 = vmatprep.mubr.msk.f32.mxu0 %vm254_vm0, %v4685_v3 }
 0xc90   :  { %7604 = vmatmul.mubr.msk.f32.gmra.mrb[50].mxu1 %vm254_vm0, %v4686_v4  ;;  %7632 = vmatmul.mubr.msk.f32.gmra.mrb[70].mxu0 %vm254_vm0, %v4686_v4 }
 0xc91   :  { %7638 = vmatprep.mubr.msk.f32.mxu1 %vm254_vm0, %v4671_v2  ;;  %7666 = vmatprep.mubr.msk.f32.mxu0 %vm254_vm0, %v4671_v2 }
 0xc94   :  { %7639 = vmatmul.mubr.msk.f32.vlgmr.msra.gmra.mrb[52].mxu1 %vm254_vm0, %v4672_v45  ;;  %7667 = vmatmul.mubr.msk.f32.vlgmr.msra.gmra.mrb[72].mxu0 %vm254_vm0, %v4672_v45 }
 0xc95   :  { %7641 = vmatprep.mubr.msk.f32.mxu1 %vm254_vm0, %v4673_v35  ;;  %7669 = vmatprep.mubr.msk.f32.mxu0 %vm254_vm0, %v4673_v35 }
 0xc98   :  { %7642 = vmatmul.mubr.msk.f32.gmra.mrb[54].mxu1 %vm254_vm0, %v4674_v23  ;;  %7670 = vmatmul.mubr.msk.f32.gmra.mrb[74].mxu0 %vm254_vm0, %v4674_v23 }
 0xc99   :  { %7644 = vmatprep.mubr.msk.f32.mxu1 %vm254_vm0, %v4675_v51  ;;  %7672 = vmatprep.mubr.msk.f32.mxu0 %vm254_vm0, %v4675_v51 }
 0xc9c   :  { %7645 = vmatmul.mubr.msk.f32.gmra.mrb[56].mxu1 %vm254_vm0, %v4676_v16  ;;  %7673 = vmatmul.mubr.msk.f32.gmra.mrb[76].mxu0 %vm254_vm0, %v4676_v16 }
 0xc9d   :  { %7647 = vmatprep.mubr.msk.f32.mxu1 %vm254_vm0, %v4677_v19  ;;  %7675 = vmatprep.mubr.msk.f32.mxu0 %vm254_vm0, %v4677_v19 }
 0xca0   :  { %7648 = vmatmul.mubr.msk.f32.gmra.mrb[58].mxu1 %vm254_vm0, %v4678_v56  ;;  %7676 = vmatmul.mubr.msk.f32.gmra.mrb[78].mxu0 %vm254_vm0, %v4678_v56 }
 0xca1   :  { %7650 = vmatprep.mubr.msk.f32.mxu1 %vm254_vm0, %v4679_v47  ;;  %7678 = vmatprep.mubr.msk.f32.mxu0 %vm254_vm0, %v4679_v47 }
 0xca4   :  { %7651 = vmatmul.mubr.msk.f32.gmra.mrb[60].mxu1 %vm254_vm0, %v4680_v26  ;;  %7679 = vmatmul.mubr.msk.f32.gmra.mrb[80].mxu0 %vm254_vm0, %v4680_v26 }
 0xca5   :  { %7653 = vmatprep.mubr.msk.f32.mxu1 %vm254_vm0, %v4681_v33  ;;  %7681 = vmatprep.mubr.msk.f32.mxu0 %vm254_vm0, %v4681_v33 }
 0xca8   :  { %7654 = vmatmul.mubr.msk.f32.gmra.mrb[62].mxu1 %vm254_vm0, %v4682_v57  ;;  %7682 = vmatmul.mubr.msk.f32.gmra.mrb[82].mxu0 %vm254_vm0, %v4682_v57 }
 0xca9   :  { %7656 = vmatprep.mubr.msk.f32.mxu1 %vm254_vm0, %v4683_v30  ;;  %7684 = vmatprep.mubr.msk.f32.mxu0 %vm254_vm0, %v4683_v30 }
 0xcac   :  { %7657 = vmatmul.mubr.msk.f32.gmra.mrb[64].mxu1 %vm254_vm0, %v4684_v31  ;;  %7685 = vmatmul.mubr.msk.f32.gmra.mrb[84].mxu0 %vm254_vm0, %v4684_v31 }
 0xcad   :  { %7659 = vmatprep.mubr.msk.f32.mxu1 %vm254_vm0, %v4685_v3  ;;  %7687 = vmatprep.mubr.msk.f32.mxu0 %vm254_vm0, %v4685_v3 }
 0xcb0   :  { %7660 = vmatmul.mubr.msk.f32.gmra.mrb[66].mxu1 %vm254_vm0, %v4686_v4  ;;  %7688 = vmatmul.mubr.msk.f32.gmra.mrb[86].mxu0 %vm254_vm0, %v4686_v4 }
 0xd47   :  { %v10199_v44 = vpop.f32.mrb[36].mxu1  ;;  %v10201_v7 = vpop.f32.mrb[56].mxu0 }
 0xd48   :  { %11373 = vst [vmem:[#allocation9_spill] sm:$0xff] %v10201_v7  ;;  %v5339_v1 = vsel %vm5337_vm5, %v10199_v44, 0.0  ;;  %v5376_v9 = vsel %vm5337_vm5, %v10201_v7, 0.0  ;;  %v10207_v32 = vpop.f32.mrb[37].mxu1  ;;  %v10209_v14 = vpop.f32.mrb[57].mxu0 }
 0xd49   :  { %11374 = vst [vmem:[#allocation10_spill] sm:$0xff] %v10209_v14  ;;  %v5338_v50 = vsel %vm5337_vm5, %v10207_v32, 0.0  ;;  %v5375_v48 = vsel %vm5337_vm5, %v10209_v14, 0.0 }
 0xd4a   :  { %v5340_v38 = vadd.f32 %v5339_v1, %v5338_v50  ;;  %v5377_v60 = vadd.f32 %v5376_v9, %v5375_v48 }
 0xd4b   :  { %v10215_v29 = vpop.f32.mrb[38].mxu1  ;;  %v10217_v21 = vpop.f32.mrb[58].mxu0 }
 0xd4c   :  { %v10219_v34 = vpop.f32.mrb[39].mxu1  ;;  %v10221_v61 = vpop.f32.mrb[59].mxu0  ;;  %v5343_v36 = vsel %vm5337_vm5, %v10215_v29, 0.0  ;;  %v5380_v37 = vsel %vm5337_vm5, %v10217_v21, 0.0 }
 0xd4d   :  { %11375 = vst [vmem:[#allocation11_spill] sm:$0xff] %v10221_v61  ;;  %v5341_v42 = vsel %vm5337_vm5, %v10219_v34, 0.0  ;;  %v5378_v11 = vsel %vm5337_vm5, %v10221_v61, 0.0 }
 0xd4e   :  { %v5342_v46 = vadd.f32 %v5341_v42, %v5340_v38  ;;  %v5379_v12 = vadd.f32 %v5378_v11, %v5377_v60 }
 0xd4f   :  { %v10231_v22 = vpop.f32.mrb[40].mxu1  ;;  %v10233_v39 = vpop.f32.mrb[60].mxu0 }
 0xd50   :  { %v10235_v52 = vpop.f32.mrb[41].mxu1  ;;  %v5344_v41 = vadd.f32 %v5343_v36, %v5342_v46  ;;  %v10237_v28 = vpop.f32.mrb[61].mxu0  ;;  %v5381_v43 = vadd.f32 %v5380_v37, %v5379_v12  ;;  %v5347_v5 = vsel %vm5337_vm5, %v10231_v22, 0.0  ;;  %v5384_v24 = vsel %vm5337_vm5, %v10233_v39, 0.0 }
 0xd51   :  { %v5345_v62 = vsel %vm5337_vm5, %v10235_v52, 0.0  ;;  %v5382_v6 = vsel %vm5337_vm5, %v10237_v28, 0.0 }
 0xd52   :  { %v5346_v8 = vadd.f32 %v5345_v62, %v5344_v41  ;;  %v5383_v25 = vadd.f32 %v5382_v6, %v5381_v43 }
 0xd53   :  { %v10247_v54 = vpop.f32.mrb[42].mxu1  ;;  %v10249_v0 = vpop.f32.mrb[62].mxu0 }
 0xd54   :  { %v10251_v13 = vpop.f32.mrb[43].mxu1  ;;  %v5348_v17 = vadd.f32 %v5347_v5, %v5346_v8  ;;  %v10253_v53 = vpop.f32.mrb[63].mxu0  ;;  %v5385_v15 = vadd.f32 %v5384_v24, %v5383_v25  ;;  %v5351_v40 = vsel %vm5337_vm5, %v10247_v54, 0.0  ;;  %v5388_v18 = vsel %vm5337_vm5, %v10249_v0, 0.0 }
 0xd55   :  { %v5349_v55 = vsel %vm5337_vm5, %v10251_v13, 0.0  ;;  %v5386_v58 = vsel %vm5337_vm5, %v10253_v53, 0.0 }
 0xd56   :  { %v5350_v59 = vadd.f32 %v5349_v55, %v5348_v17  ;;  %v5387_v20 = vadd.f32 %v5386_v58, %v5385_v15 }
 0xd57   :  { %v10263_v49 = vpop.f32.mrb[44].mxu1  ;;  %v10265_v27 = vpop.f32.mrb[64].mxu0 }
 0xd58   :  { %v10267_v10 = vpop.f32.mrb[45].mxu1  ;;  %v5352_v2 = vadd.f32 %v5351_v40, %v5350_v59  ;;  %v10269_v45 = vpop.f32.mrb[65].mxu0  ;;  %v5389_v35 = vadd.f32 %v5388_v18, %v5387_v20  ;;  %v5355_v56 = vsel %vm5337_vm5, %v10263_v49, 0.0  ;;  %v5392_v47 = vsel %vm5337_vm5, %v10265_v27, 0.0 }
 0xd59   :  { %v5353_v23 = vsel %vm5337_vm5, %v10267_v10, 0.0  ;;  %v5390_v51 = vsel %vm5337_vm5, %v10269_v45, 0.0 }
 0xd5a   :  { %v5354_v16 = vadd.f32 %v5353_v23, %v5352_v2  ;;  %v5391_v19 = vadd.f32 %v5390_v51, %v5389_v35 }
 0xd5b   :  { %v10279_v26 = vpop.f32.mrb[46].mxu1  ;;  %v10281_v33 = vpop.f32.mrb[66].mxu0 }
 0xd5c   :  { %11376 = vst [vmem:[#allocation12_spill] sm:$0xff] %v10279_v26  ;;  %v10283_v57 = vpop.f32.mrb[47].mxu1  ;;  %v5356_v30 = vadd.f32 %v5355_v56, %v5354_v16  ;;  %v10285_v31 = vpop.f32.mrb[67].mxu0  ;;  %v5393_v3 = vadd.f32 %v5392_v47, %v5391_v19  ;;  %v5359_v48 = vsel %vm5337_vm5, %v10279_v26, 0.0  ;;  %v5396_v38 = vsel %vm5337_vm5, %v10281_v33, 0.0 }
 0xd5d   :  { %v5357_v4 = vsel %vm5337_vm5, %v10283_v57, 0.0  ;;  %v5394_v1 = vsel %vm5337_vm5, %v10285_v31, 0.0 }
 0xd5e   :  { %v5358_v9 = vadd.f32 %v5357_v4, %v5356_v30  ;;  %v5395_v50 = vadd.f32 %v5394_v1, %v5393_v3 }
 0xd5f   :  { %v10295_v60 = vpop.f32.mrb[48].mxu1  ;;  %v10297_v42 = vpop.f32.mrb[68].mxu0 }
 0xd60   :  { %11377 = vst [vmem:[#allocation13_spill] sm:$0xff] %v10295_v60  ;;  %v10299_v11 = vpop.f32.mrb[49].mxu1  ;;  %v5360_v46 = vadd.f32 %v5359_v48, %v5358_v9  ;;  %v10301_v12 = vpop.f32.mrb[69].mxu0  ;;  %v5397_v36 = vadd.f32 %v5396_v38, %v5395_v50  ;;  %v5363_v6 = vsel %vm5337_vm5, %v10295_v60, 0.0  ;;  %v5400_v8 = vsel %vm5337_vm5, %v10297_v42, 0.0 }
 0xd61   :  { %11378 = vst [vmem:[#allocation14_spill] sm:$0xff] %v10299_v11  ;;  %v5361_v37 = vsel %vm5337_vm5, %v10299_v11, 0.0  ;;  %v5398_v41 = vsel %vm5337_vm5, %v10301_v12, 0.0 }
 0xd62   :  { %v5362_v43 = vadd.f32 %v5361_v37, %v5360_v46  ;;  %v5399_v62 = vadd.f32 %v5398_v41, %v5397_v36 }
 0xd63   :  { %v10311_v25 = vpop.f32.mrb[50].mxu1  ;;  %v10313_v5 = vpop.f32.mrb[70].mxu0 }
 0xd64   :  { %11379 = vst [vmem:[#allocation15_spill] sm:$0xff] %v10311_v25  ;;  %v10315_v24 = vpop.f32.mrb[51].mxu1  ;;  %v5364_v17 = vadd.f32 %v5363_v6, %v5362_v43  ;;  %v10317_v15 = vpop.f32.mrb[71].mxu0  ;;  %v5401_v55 = vadd.f32 %v5400_v8, %v5399_v62  ;;  %v5367_v18 = vsel %vm5337_vm5, %v10311_v25, 0.0  ;;  %v5404_v2 = vsel %vm5337_vm5, %v10313_v5, 0.0 }
 0xd65   :  { %11380 = vst [vmem:[#allocation16_spill] sm:$0xff] %v10315_v24  ;;  %v5365_v58 = vsel %vm5337_vm5, %v10315_v24, 0.0  ;;  %v5402_v59 = vsel %vm5337_vm5, %v10317_v15, 0.0 }
 0xd66   :  { %v5366_v20 = vadd.f32 %v5365_v58, %v5364_v17  ;;  %v5403_v40 = vadd.f32 %v5402_v59, %v5401_v55 }
 0xd67   :  { %v10327_v35 = vpop.f32.mrb[52].mxu1  ;;  %v10329_v23 = vpop.f32.mrb[72].mxu0 }
 0xd68   :  { %11381 = vst [vmem:[#allocation17_spill] sm:$0xff] %v10327_v35  ;;  %11382 = vst [vmem:[#allocation18_spill] sm:$0xff] %v10329_v23  ;;  %v5368_v51 = vadd.f32 %v5367_v18, %v5366_v20  ;;  %v5405_v16 = vadd.f32 %v5404_v2, %v5403_v40  ;;  %v5414_v19 = vsel %vm5337_vm5, %v10327_v35, 0.0  ;;  %v5452_v56 = vsel %vm5337_vm5, %v10329_v23, 0.0  ;;  %v10335_v47 = vpop.f32.mrb[53].mxu1  ;;  %v10337_v30 = vpop.f32.mrb[73].mxu0 }
 0xd69   :  { %11383 = vst [vmem:[#allocation19_spill] sm:$0xff] %v10337_v30  ;;  %v5413_v3 = vsel %vm5337_vm5, %v10335_v47, 0.0  ;;  %v5451_v4 = vsel %vm5337_vm5, %v10337_v30, 0.0 }
 0xd6a   :  { %v5369_v1 = vrot.slane %v5368_v51, 4  ;;  %v5406_v9 = vrot.slane %v5405_v16, 4  ;;  %v5415_v50 = vadd.f32 %v5414_v19, %v5413_v3  ;;  %v5453_v48 = vadd.f32 %v5452_v56, %v5451_v4 }
 0xd6b   :  { %v10343_v38 = vpop.f32.mrb[54].mxu1  ;;  %v10345_v46 = vpop.f32.mrb[74].mxu0 }
 0xd6c   :  { %11384 = vst [vmem:[#allocation20_spill] sm:$0xff] %v10345_v46  ;;  %v5370_v36 = vadd.f32 %v5369_v1, %v5368_v51  ;;  %v5407_v37 = vadd.f32 %v5406_v9, %v5405_v16  ;;  %v10347_v41 = vpop.f32.mrb[55].mxu1  ;;  %v10349_v43 = vpop.f32.mrb[75].mxu0  ;;  %v5418_v2 = vsel %vm5337_vm5, %v10343_v38, 0.0  ;;  %v5456_v51 = vsel %vm5337_vm5, %v10345_v46, 0.0 }
 0xd6d   :  { %11385 = vst [vmem:[#allocation21_spill] sm:$0xff] %v10347_v41  ;;  %11386 = vst [vmem:[#allocation22_spill] sm:$0xff] %v10349_v43  ;;  %v5416_v62 = vsel %vm5337_vm5, %v10347_v41, 0.0  ;;  %v5454_v6 = vsel %vm5337_vm5, %v10349_v43, 0.0 }
 0xd6e   :  { %v5371_v8 = vrot.slane %v5370_v36, 2  ;;  %v5408_v17 = vrot.slane %v5407_v37, 2  ;;  %v5417_v55 = vadd.f32 %v5416_v62, %v5415_v50  ;;  %v5455_v58 = vadd.f32 %v5454_v6, %v5453_v48 }
 0xd6f   :  { %v10355_v59 = vpop.f32.mrb[56].mxu1  ;;  %v10357_v20 = vpop.f32.mrb[76].mxu0 }
 0xd70   :  { %11387 = vst [vmem:[#allocation23_spill] sm:$0xff] %v10357_v20  ;;  %v5372_v40 = vadd.f32 %v5371_v8, %v5370_v36  ;;  %v5409_v18 = vadd.f32 %v5408_v17, %v5407_v37  ;;  %v10363_v16 = vpop.f32.mrb[57].mxu1  ;;  %v10365_v19 = vpop.f32.mrb[77].mxu0  ;;  %v5419_v56 = vadd.f32 %v5418_v2, %v5417_v55  ;;  %v5457_v4 = vadd.f32 %v5456_v51, %v5455_v58 }
 0xd71   :  { %11388 = vst [vmem:[#allocation24_spill] sm:$0xff] %v10365_v19  ;;  %v5420_v3 = vsel %vm5337_vm5, %v10363_v16, 0.0  ;;  %v5458_v1 = vsel %vm5337_vm5, %v10365_v19, 0.0  ;;  %v5422_v17 = vsel %vm5337_vm5, %v10355_v59, 0.0  ;;  %v5460_v55 = vsel %vm5337_vm5, %v10357_v20, 0.0 }
 0xd72   :  { %v5373_v9 = vrot.slane %v5372_v40, 1  ;;  %v5410_v50 = vrot.slane %v5409_v18, 1  ;;  %v5421_v48 = vadd.f32 %v5420_v3, %v5419_v56  ;;  %v5459_v36 = vadd.f32 %v5458_v1, %v5457_v4 }
 0xd73   :  { %v10371_v37 = vpop.f32.mrb[58].mxu1  ;;  %v10373_v62 = vpop.f32.mrb[78].mxu0 }
 0xd74   :  { %11389 = vst [vmem:[#allocation25_spill] sm:$0xff] %v10371_v37  ;;  %11390 = vst [vmem:[#allocation26_spill] sm:$0xff] %v10373_v62  ;;  %v5374_v6 = vadd.f32 %v5373_v9, %v5372_v40  ;;  %v5411_v8 = vadd.f32 %v5410_v50, %v5409_v18  ;;  %v10379_v58 = vpop.f32.mrb[59].mxu1  ;;  %v10381_v2 = vpop.f32.mrb[79].mxu0  ;;  %v5423_v51 = vadd.f32 %v5422_v17, %v5421_v48  ;;  %v5426_v63 = vsel %vm5337_vm5, %v10371_v37, 0.0 }
 0xd75   :  { %11391 = vst [vmem:[#allocation27_spill] sm:$0xff] %v10381_v2  ;;  %v5424_v56 = vsel %vm5337_vm5, %v10379_v58, 0.0  ;;  %v5461_v3 = vadd.f32 %v5460_v55, %v5459_v36  ;;  %v5462_v4 = vsel %vm5337_vm5, %v10381_v2, 0.0  ;;  %v5464_v48 = vsel %vm5337_vm5, %v10373_v62, 0.0 }
 0xd76   :  { %v10387_v40 = vadd.f32 %v5411_v8, %v5374_v6  ;;  %v5425_v18 = vadd.f32 %v5424_v56, %v5423_v51 }
 0xd77   :  { %v5463_v1 = vadd.f32 %v5462_v4, %v5461_v3  ;;  %v10389_v9 = vpop.f32.mrb[60].mxu1  ;;  %v10391_v50 = vpop.f32.mrb[80].mxu0 }
 0xd78   :  { %11392 = vst [vmem:[#allocation28_spill] sm:$0xff] %v10389_v9  ;;  %11393 = vst [vmem:[#allocation29_spill] sm:$0xff] %v10391_v50  ;;  %v10397_v17 = vpop.f32.mrb[61].mxu1  ;;  %v10399_v36 = vpop.f32.mrb[81].mxu0  ;;  %v5427_v55 = vadd.f32 %v5426_v63, %v5425_v18  ;;  %v5430_v62 = vsel %vm5337_vm5, %v10389_v9, 0.0  ;;  %v5468_v20 = vsel %vm5337_vm5, %v10391_v50, 0.0 }
 0xd79   :  { %11394 = vst [vmem:[#allocation30_spill] sm:$0xff] %v10397_v17  ;;  %11395 = vst [vmem:[#allocation31_spill] sm:$0xff] %v10399_v36  ;;  %v5428_v6 = vsel %vm5337_vm5, %v10397_v17, 0.0  ;;  %v5465_v8 = vadd.f32 %v5464_v48, %v5463_v1  ;;  %v5466_v51 = vsel %vm5337_vm5, %v10399_v36, 0.0 }
 0xd7a   :  { %v5429_v56 = vadd.f32 %v5428_v6, %v5427_v55 }
 0xd7b   :  { %v5467_v3 = vadd.f32 %v5466_v51, %v5465_v8  ;;  %v10405_v4 = vpop.f32.mrb[62].mxu1  ;;  %v10407_v2 = vpop.f32.mrb[82].mxu0 }
 0xd7c   :  { %11396 = vst [vmem:[#allocation32_spill] sm:$0xff] %v10405_v4  ;;  %11397 = vst [vmem:[#allocation33_spill] sm:$0xff] %v10407_v2  ;;  %v10413_v63 = vpop.f32.mrb[63].mxu1  ;;  %v10415_v18 = vpop.f32.mrb[83].mxu0  ;;  %v5431_v1 = vadd.f32 %v5430_v62, %v5429_v56  ;;  %v5434_v50 = vsel %vm5337_vm5, %v10405_v4, 0.0  ;;  %v5472_v46 = vsel %vm5337_vm5, %v10407_v2, 0.0 }
 0xd7d   :  { %11398 = vst [vmem:[#allocation34_spill] sm:$0xff] %v10413_v63  ;;  %11399 = vst [vmem:[#allocation35_spill] sm:$0xff] %v10415_v18  ;;  %v5432_v48 = vsel %vm5337_vm5, %v10413_v63, 0.0  ;;  %v5469_v55 = vadd.f32 %v5468_v20, %v5467_v3  ;;  %v5470_v6 = vsel %vm5337_vm5, %v10415_v18, 0.0 }
 0xd7e   :  { %v5433_v8 = vadd.f32 %v5432_v48, %v5431_v1 }
 0xd7f   :  { %v5471_v51 = vadd.f32 %v5470_v6, %v5469_v55  ;;  %v10421_v36 = vpop.f32.mrb[64].mxu1  ;;  %v10423_v19 = vpop.f32.mrb[84].mxu0 }
 0xd80   :  { %11400 = vst [vmem:[#allocation36_spill] sm:$0xff] %v10421_v36  ;;  %11401 = vst [vmem:[#allocation37_spill] sm:$0xff] %v10423_v19  ;;  %v10429_v62 = vpop.f32.mrb[65].mxu1  ;;  %v10431_v56 = vpop.f32.mrb[85].mxu0  ;;  %v5435_v20 = vadd.f32 %v5434_v50, %v5433_v8  ;;  %v5438_v2 = vsel %vm5337_vm5, %v10421_v36, 0.0  ;;  %v5476_v23 = vsel %vm5337_vm5, %v10423_v19, 0.0 }
 0xd81   :  { %11402 = vst [vmem:[#allocation38_spill] sm:$0xff] %v10429_v62  ;;  %11403 = vst [vmem:[#allocation39_spill] sm:$0xff] %v10431_v56  ;;  %v5436_v3 = vsel %vm5337_vm5, %v10429_v62, 0.0  ;;  %v5473_v1 = vadd.f32 %v5472_v46, %v5471_v51  ;;  %v5474_v48 = vsel %vm5337_vm5, %v10431_v56, 0.0 }
 0xd82   :  { %v5437_v55 = vadd.f32 %v5436_v3, %v5435_v20 }
 0xd83   :  { %v5475_v6 = vadd.f32 %v5474_v48, %v5473_v1  ;;  %v10437_v18 = vpop.f32.mrb[66].mxu1  ;;  %v10439_v43 = vpop.f32.mrb[86].mxu0 }
 0xd84   :  { %11404 = vst [vmem:[#allocation40_spill] sm:$0xff] %v10437_v18  ;;  %11405 = vst [vmem:[#allocation41_spill] sm:$0xff] %v10439_v43  ;;  %v10445_v50 = vpop.f32.mrb[67].mxu1  ;;  %v10447_v8 = vpop.f32.mrb[87].mxu0  ;;  %v5439_v46 = vadd.f32 %v5438_v2, %v5437_v55  ;;  %v5442_v56 = vsel %vm5337_vm5, %v10437_v18, 0.0  ;;  %v5480_v19 = vsel %vm5337_vm5, %v10439_v43, 0.0 }
 0xd85   :  { %11406 = vst [vmem:[#allocation42_spill] sm:$0xff] %v10445_v50  ;;  %11407 = vst [vmem:[#allocation43_spill] sm:$0xff] %v10447_v8  ;;  %v5440_v51 = vsel %vm5337_vm5, %v10445_v50, 0.0  ;;  %v5477_v20 = vadd.f32 %v5476_v23, %v5475_v6  ;;  %v5478_v3 = vsel %vm5337_vm5, %v10447_v8, 0.0 }
 0xd86   :  { %v5441_v1 = vadd.f32 %v5440_v51, %v5439_v46 }
 0xd87   :  { %v5479_v48 = vadd.f32 %v5478_v3, %v5477_v20 }
 0xd88   :  { %v5443_v36 = vadd.f32 %v5442_v56, %v5441_v1 }
 0xd89   :  { %v5481_v30 = vadd.f32 %v5480_v19, %v5479_v48 }
 0xd8a   :  { %v5444_v62 = vrot.slane %v5443_v36, 4 }
 0xd8b   :  { %v5482_v4 = vrot.slane %v5481_v30, 4 }
 0xd8c   :  { %v5445_v2 = vadd.f32 %v5444_v62, %v5443_v36 }
 0xd8d   :  { %v5483_v55 = vadd.f32 %v5482_v4, %v5481_v30 }
 0xd8e   :  { %v5446_v63 = vrot.slane %v5445_v2, 2 }
 0xd8f   :  { %v5484_v50 = vrot.slane %v5483_v55, 2 }
 0xd90   :  { %v5447_v23 = vadd.f32 %v5446_v63, %v5445_v2 }
 0xd91   :  { %v5485_v6 = vadd.f32 %v5484_v50, %v5483_v55 }
 0xd92   :  { %v5448_v9 = vrot.slane %v5447_v23, 1 }
 0xd93   :  { %v5486_v8 = vrot.slane %v5485_v6, 1 }
 0xd94   :  { %v5449_v46 = vadd.f32 %v5448_v9, %v5447_v23 }
 0xd95   :  { %v5487_v20 = vadd.f32 %v5486_v8, %v5485_v6 }
 0xd96   :  { %v5450_v51 = vadd.f32 %v5449_v46, %v10387_v40 }
 0xd98   :  { %v5488_v3 = vadd.f32 %v5487_v20, %v5450_v51 }
 0xd9a   :  { %v10458_v18 = vmul.f32 0.001953125, %v5488_v3 }
 0xd9c   :  { %v5491_v19 = vsub.f32 %v10207_v32, %v10458_v18  ;;  %v5492_v36 = vsub.f32 %v10199_v44, %v10458_v18  ;;  %v5493_v30 = vsub.f32 %v10219_v34, %v10458_v18  ;;  %v5494_v4 = vsub.f32 %v10215_v29, %v10458_v18 }
 0xd9d   :  { %v5495_v40 = vsub.f32 %v10235_v52, %v10458_v18  ;;  %v5496_v56 = vsub.f32 %v10231_v22, %v10458_v18  ;;  %v5497_v2 = vsub.f32 %v10251_v13, %v10458_v18  ;;  %v5498_v46 = vsub.f32 %v10247_v54, %v10458_v18 }
 0xd9e   :  { %v5507_v63 = vmul.f32 %v5491_v19, %v5491_v19  ;;  %v5508_v9 = vmul.f32 %v5492_v36, %v5492_v36  ;;  %v5509_v62 = vmul.f32 %v5493_v30, %v5493_v30  ;;  %v5510_v50 = vmul.f32 %v5494_v4, %v5494_v4 }
 0xd9f   :  { %v5511_v55 = vmul.f32 %v5495_v40, %v5495_v40  ;;  %v5512_v51 = vmul.f32 %v5496_v56, %v5496_v56  ;;  %v5499_v3 = vsub.f32 %v10267_v10, %v10458_v18  ;;  %v5560_v36 = vsub.f32 %v10209_v14, %v10458_v18 }
 0xda0   :  { %v5523_v8 = vsel %vm5337_vm5, %v5507_v63, 0.0  ;;  %v5524_v1 = vsel %vm5337_vm5, %v5508_v9, 0.0  ;;  %v5526_v23 = vsel %vm5337_vm5, %v5509_v62, 0.0  ;;  %v5528_v20 = vsel %vm5337_vm5, %v5510_v50, 0.0 }
 0xda1   :  { %v5525_v48 = vadd.f32 %v5524_v1, %v5523_v8  ;;  %v5500_v30 = vsub.f32 %v10263_v49, %v10458_v18  ;;  %v5513_v4 = vmul.f32 %v5497_v2, %v5497_v2  ;;  %v5530_v63 = vsel %vm5337_vm5, %v5511_v55, 0.0 }
 0xda2   :  { %v5561_v9 = vsub.f32 %v10201_v7, %v10458_v18  ;;  %v5501_v40 = vsub.f32 %v10283_v57, %v10458_v18  ;;  %v5502_v62 = vsub.f32 %v10279_v26, %v10458_v18  ;;  %v5503_v56 = vsub.f32 %v10299_v11, %v10458_v18 }
 0xda3   :  { %v5527_v6 = vadd.f32 %v5526_v23, %v5525_v48  ;;  %v5504_v8 = vsub.f32 %v10295_v60, %v10458_v18  ;;  %v5514_v1 = vmul.f32 %v5498_v46, %v5498_v46  ;;  %v5532_v48 = vsel %vm5337_vm5, %v5512_v51, 0.0 }
 0xda4   :  { %v5562_v2 = vsub.f32 %v10221_v61, %v10458_v18  ;;  %v5505_v55 = vsub.f32 %v10315_v24, %v10458_v18  ;;  %v5506_v23 = vsub.f32 %v10311_v25, %v10458_v18  ;;  %v5515_v7 = vmul.f32 %v5499_v3, %v5499_v3 }
 0xda5   :  { %v5529_v19 = vadd.f32 %v5528_v20, %v5527_v6  ;;  %v5576_v20 = vmul.f32 %v5560_v36, %v5560_v36  ;;  %v5577_v46 = vmul.f32 %v5561_v9, %v5561_v9  ;;  %v5516_v14 = vmul.f32 %v5500_v30, %v5500_v30 }
 0xda6   :  { %v5517_v51 = vmul.f32 %v5501_v40, %v5501_v40  ;;  %v5518_v60 = vmul.f32 %v5502_v62, %v5502_v62  ;;  %v5519_v61 = vmul.f32 %v5503_v56, %v5503_v56  ;;  %v5536_v26 = vsel %vm5337_vm5, %v5514_v1, 0.0 }
 0xda7   :  { %v5531_v50 = vadd.f32 %v5530_v63, %v5529_v19  ;;  %v5534_v19 = vsel %vm5337_vm5, %v5513_v4, 0.0  ;;  %v5563_v63 = vsub.f32 %v10217_v21, %v10458_v18  ;;  %v5564_v24 = vsub.f32 %v10237_v28, %v10458_v18 }
 0xda8   :  { %v5578_v25 = vmul.f32 %v5562_v2, %v5562_v2  ;;  %v5521_v36 = vmul.f32 %v5505_v55, %v5505_v55  ;;  %v5592_v4 = vsel %vm5337_vm5, %v5576_v20, 0.0  ;;  %v5565_v30 = vsub.f32 %v10233_v39, %v10458_v18 }
 0xda9   :  { %v5533_v6 = vadd.f32 %v5532_v48, %v5531_v50  ;;  %v5520_v50 = vmul.f32 %v5504_v8, %v5504_v8  ;;  %v5538_v48 = vsel %vm5337_vm5, %v5515_v7, 0.0  ;;  %v5579_v9 = vmul.f32 %v5563_v63, %v5563_v63 }
 0xdaa   :  { %v5593_v40 = vsel %vm5337_vm5, %v5577_v46, 0.0  ;;  %v5522_v62 = vmul.f32 %v5506_v23, %v5506_v23  ;;  %v5540_v1 = vsel %vm5337_vm5, %v5516_v14, 0.0  ;;  %v5542_v2 = vsel %vm5337_vm5, %v5517_v51, 0.0 }
 0xdab   :  { %v5535_v11 = vadd.f32 %v5534_v19, %v5533_v6  ;;  %v5594_v6 = vadd.f32 %v5593_v40, %v5592_v4  ;;  %v5595_v8 = vsel %vm5337_vm5, %v5578_v25, 0.0  ;;  %v5544_v55 = vsel %vm5337_vm5, %v5518_v60, 0.0 }
 0xdac   :  { %v5546_v20 = vsel %vm5337_vm5, %v5519_v61, 0.0  ;;  %v5548_v23 = vsel %vm5337_vm5, %v5520_v50, 0.0  ;;  %v5567_v14 = vsub.f32 %v10249_v0, %v10458_v18  ;;  %v5581_v63 = vmul.f32 %v5565_v30, %v5565_v30 }
 0xdad   :  { %v5537_v3 = vadd.f32 %v5536_v26, %v5535_v11  ;;  %v5566_v26 = vsub.f32 %v10253_v53, %v10458_v18  ;;  %v5580_v11 = vmul.f32 %v5564_v24, %v5564_v24  ;;  %v5596_v19 = vadd.f32 %v5595_v8, %v5594_v6 }
 0xdae   :  { %v5597_v46 = vsel %vm5337_vm5, %v5579_v9, 0.0  ;;  %v5552_v24 = vsel %vm5337_vm5, %v5522_v62, 0.0  ;;  %v5568_v60 = vsub.f32 %v10269_v45, %v10458_v18  ;;  %v5569_v61 = vsub.f32 %v10265_v27, %v10458_v18 }
 0xdaf   :  { %v5539_v56 = vadd.f32 %v5538_v48, %v5537_v3  ;;  %v5550_v3 = vsel %vm5337_vm5, %v5521_v36, 0.0  ;;  %v5598_v25 = vadd.f32 %v5597_v46, %v5596_v19  ;;  %v5582_v4 = vmul.f32 %v5566_v26, %v5566_v26 }
 0xdb0   :  { %v5599_v50 = vsel %vm5337_vm5, %v5580_v11, 0.0  ;;  %v5570_v30 = vsub.f32 %v10285_v31, %v10458_v18  ;;  %v5630_v36 = vsub.f32 %v10335_v47, %v10458_v18  ;;  %v5571_v40 = vsub.f32 %v10281_v33, %v10458_v18 }
 0xdb1   :  { %v5541_v7 = vadd.f32 %v5540_v1, %v5539_v56  ;;  %v5600_v9 = vadd.f32 %v5599_v50, %v5598_v25  ;;  %v5583_v62 = vmul.f32 %v5567_v14, %v5567_v14  ;;  %v5601_v56 = vsel %vm5337_vm5, %v5581_v63, 0.0 }
 0xdb2   :  { %v5631_v1 = vsub.f32 %v10327_v35, %v10458_v18  ;;  %v5573_v26 = vsub.f32 %v10297_v42, %v10458_v18  ;;  %v5574_v8 = vsub.f32 %v10317_v15, %v10458_v18  ;;  %v5632_v19 = vsub.f32 %v10347_v41, %v10458_v18 }
 0xdb3   :  { %v5543_v51 = vadd.f32 %v5542_v2, %v5541_v7  ;;  %v5572_v2 = vsub.f32 %v10301_v12, %v10458_v18  ;;  %v5602_v11 = vadd.f32 %v5601_v56, %v5600_v9  ;;  %v5584_v7 = vmul.f32 %v5568_v60, %v5568_v60 }
 0xdb4   :  { %v5646_v46 = vmul.f32 %v5630_v36, %v5630_v36  ;;  %v5605_v25 = vsel %vm5337_vm5, %v5583_v62, 0.0  ;;  %v5633_v50 = vsub.f32 %v10343_v38, %v10458_v18  ;;  %v5586_v60 = vmul.f32 %v5570_v30, %v5570_v30 }
 0xdb5   :  { %v5545_v48 = vadd.f32 %v5544_v55, %v5543_v51  ;;  %v5603_v55 = vsel %vm5337_vm5, %v5582_v4, 0.0  ;;  %v5585_v51 = vmul.f32 %v5569_v61, %v5569_v61  ;;  %v5587_v56 = vmul.f32 %v5571_v40, %v5571_v40 }
 0xdb6   :  { %v5604_v63 = vadd.f32 %v5603_v55, %v5602_v11  ;;  %v5588_v35 = vmul.f32 %v5572_v2, %v5572_v2  ;;  %v5607_v41 = vsel %vm5337_vm5, %v5584_v7, 0.0  ;;  %v5589_v36 = vmul.f32 %v5573_v26, %v5573_v26 }
 0xdb7   :  { %v5547_v6 = vadd.f32 %v5546_v20, %v5545_v48  ;;  %v5575_v20 = vsub.f32 %v10313_v5, %v10458_v18  ;;  %v5647_v48 = vmul.f32 %v5631_v1, %v5631_v1  ;;  %v5662_v62 = vsel %vm5337_vm5, %v5646_v46, 0.0 }
 0xdb8   :  { %v5606_v4 = vadd.f32 %v5605_v25, %v5604_v63  ;;  %v5609_v55 = vsel %vm5337_vm5, %v5585_v51, 0.0  ;;  %v5649_v30 = vmul.f32 %v5633_v50, %v5633_v50  ;;  %v5590_v1 = vmul.f32 %v5574_v8, %v5574_v8 }
 0xdb9   :  { %v5549_v14 = vadd.f32 %v5548_v23, %v5547_v6  ;;  %v5634_v23 = vsub.f32 %v10363_v16, %v10458_v18  ;;  %v5648_v6 = vmul.f32 %v5632_v19, %v5632_v19  ;;  %v5663_v40 = vsel %vm5337_vm5, %v5647_v48, 0.0 }
 0xdba   :  { %v5608_v61 = vadd.f32 %v5607_v41, %v5606_v4  ;;  %v5591_v2 = vmul.f32 %v5575_v20, %v5575_v20  ;;  %v5611_v63 = vsel %vm5337_vm5, %v5586_v60, 0.0  ;;  %v5613_v51 = vsel %vm5337_vm5, %v5587_v56, 0.0 }
 0xdbb   :  { %v5551_v9 = vadd.f32 %v5550_v3, %v5549_v14  ;;  %v5635_v3 = vsub.f32 %v10355_v59, %v10458_v18  ;;  %v5664_v14 = vadd.f32 %v5663_v40, %v5662_v62  ;;  %v5650_v41 = vmul.f32 %v5634_v23, %v5634_v23 }
 0xdbc   :  { %v5610_v7 = vadd.f32 %v5609_v55, %v5608_v61  ;;  %v5665_v26 = vsel %vm5337_vm5, %v5648_v6, 0.0  ;;  %v5615_v50 = vsel %vm5337_vm5, %v5588_v35, 0.0  ;;  %v5637_v8 = vsub.f32 %v10371_v37, %v10458_v18 }
 0xdbd   :  { %v5553_v11 = vadd.f32 %v5552_v24, %v5551_v9  ;;  %v5636_v24 = vsub.f32 %v10379_v58, %v10458_v18  ;;  %v5666_v25 = vadd.f32 %v5665_v26, %v5664_v14  ;;  %v5651_v20 = vmul.f32 %v5635_v3, %v5635_v3  ;;  %v11408_v3 = vld [vmem:[#allocation28_spill] sm:$0xff] }
 0xdbe   :  { %v5612_v46 = vadd.f32 %v5611_v63, %v5610_v7  ;;  %v5667_v48 = vsel %vm5337_vm5, %v5649_v30, 0.0  ;;  %v5617_v60 = vsel %vm5337_vm5, %v5589_v36, 0.0  ;;  %v5619_v4 = vsel %vm5337_vm5, %v5590_v1, 0.0  ;;  %v11409_v7 = vld [vmem:[#allocation34_spill] sm:$0xff]  ;;  %v11410_v1 = vld [vmem:[#allocation32_spill] sm:$0xff] }
 0xdbf   :  { %v5554_v19 = vrot.slane %v5553_v11, 4  ;;  %v5668_v23 = vadd.f32 %v5667_v48, %v5666_v25  ;;  %v5621_v6 = vsel %vm5337_vm5, %v5591_v2, 0.0  ;;  %v5638_v56 = vsub.f32 %v10397_v17, %v10458_v18 }
 0xdc0   :  { %v5614_v9 = vadd.f32 %v5613_v51, %v5612_v46  ;;  %v5652_v61 = vmul.f32 %v5636_v24, %v5636_v24  ;;  %v5669_v35 = vsel %vm5337_vm5, %v5650_v41, 0.0  ;;  %v5639_v40 = vsub.f32 %v11408_v3, %v10458_v18  ;;  %v11411_v24 = vld [vmem:[#allocation38_spill] sm:$0xff]  ;;  %v11413_v51 = vld [vmem:[#allocation36_spill] sm:$0xff] }
 0xdc1   :  { %v5555_v62 = vadd.f32 %v5554_v19, %v5553_v11  ;;  %v5670_v30 = vadd.f32 %v5669_v35, %v5668_v23  ;;  %v5640_v36 = vsub.f32 %v11409_v7, %v10458_v18  ;;  %v5641_v14 = vsub.f32 %v11410_v1, %v10458_v18  ;;  %v11412_v11 = vld [vmem:[#allocation19_spill] sm:$0xff] }
 0xdc2   :  { %v5616_v55 = vadd.f32 %v5615_v50, %v5614_v9  ;;  %v5653_v63 = vmul.f32 %v5637_v8, %v5637_v8  ;;  %v5671_v2 = vsel %vm5337_vm5, %v5651_v20, 0.0  ;;  %v5642_v46 = vsub.f32 %v11411_v24, %v10458_v18  ;;  %v11414_v9 = vld [vmem:[#allocation18_spill] sm:$0xff] }
 0xdc3   :  { %v5672_v41 = vadd.f32 %v5671_v2, %v5670_v30  ;;  %v5700_v19 = vsub.f32 %v11412_v11, %v10458_v18  ;;  %v5643_v25 = vsub.f32 %v11413_v51, %v10458_v18  ;;  %v5654_v50 = vmul.f32 %v5638_v56, %v5638_v56  ;;  %v11415_v20 = vld [vmem:[#allocation42_spill] sm:$0xff]  ;;  %v11416_v30 = vld [vmem:[#allocation40_spill] sm:$0xff] }
 0xdc4   :  { %v5618_v26 = vadd.f32 %v5617_v60, %v5616_v55  ;;  %v5673_v48 = vsel %vm5337_vm5, %v5652_v61, 0.0  ;;  %v5701_v23 = vsub.f32 %v11414_v9, %v10458_v18  ;;  %v5556_v8 = vrot.slane %v5555_v62, 2  ;;  %v11417_v51 = vld [vmem:[#allocation22_spill] sm:$0xff] }
 0xdc5   :  { %v5644_v60 = vsub.f32 %v11415_v20, %v10458_v18  ;;  %v5674_v55 = vadd.f32 %v5673_v48, %v5672_v41  ;;  %v5645_v2 = vsub.f32 %v11416_v30, %v10458_v18  ;;  %v5655_v24 = vmul.f32 %v5639_v40, %v5639_v40 }
 0xdc6   :  { %v5620_v35 = vadd.f32 %v5619_v4, %v5618_v26  ;;  %v5675_v11 = vsel %vm5337_vm5, %v5653_v63, 0.0  ;;  %v5702_v56 = vsub.f32 %v11417_v51, %v10458_v18  ;;  %v5656_v61 = vmul.f32 %v5640_v36, %v5640_v36  ;;  %v11418_v26 = vld [vmem:[#allocation20_spill] sm:$0xff] }
 0xdc7   :  { %v5676_v7 = vadd.f32 %v5675_v11, %v5674_v55  ;;  %v5716_v3 = vmul.f32 %v5700_v19, %v5700_v19  ;;  %v5657_v9 = vmul.f32 %v5641_v14, %v5641_v14  ;;  %v5677_v4 = vsel %vm5337_vm5, %v5654_v50, 0.0  ;;  %v11419_v51 = vld [vmem:[#allocation24_spill] sm:$0xff] }
 0xdc8   :  { %v5622_v1 = vadd.f32 %v5621_v6, %v5620_v35  ;;  %v5703_v20 = vsub.f32 %v11418_v26, %v10458_v18  ;;  %v5717_v41 = vmul.f32 %v5701_v23, %v5701_v23  ;;  %v5557_v48 = vadd.f32 %v5556_v8, %v5555_v62  ;;  %v11420_v23 = vld [vmem:[#allocation23_spill] sm:$0xff] }
 0xdc9   :  { %v5658_v30 = vmul.f32 %v5642_v46, %v5642_v46  ;;  %v5678_v40 = vadd.f32 %v5677_v4, %v5676_v7  ;;  %v5659_v37 = vmul.f32 %v5643_v25, %v5643_v25  ;;  %v5679_v63 = vsel %vm5337_vm5, %v5655_v24, 0.0 }
 0xdca   :  { %v5623_v17 = vrot.slane %v5622_v1, 4  ;;  %v5704_v6 = vsub.f32 %v11419_v51, %v10458_v18  ;;  %v5718_v36 = vmul.f32 %v5702_v56, %v5702_v56  ;;  %v5660_v19 = vmul.f32 %v5644_v60, %v5644_v60 }
 0xdcb   :  { %v5680_v14 = vadd.f32 %v5679_v63, %v5678_v40  ;;  %v5732_v50 = vsel %vm5337_vm5, %v5716_v3, 0.0  ;;  %v5681_v35 = vsel %vm5337_vm5, %v5656_v61, 0.0  ;;  %v5705_v62 = vsub.f32 %v11420_v23, %v10458_v18 }
 0xdcc   :  { %v5624_v11 = vadd.f32 %v5623_v17, %v5622_v1  ;;  %v5719_v8 = vmul.f32 %v5703_v20, %v5703_v20  ;;  %v5733_v7 = vsel %vm5337_vm5, %v5717_v41, 0.0  ;;  %v5558_v46 = vrot.slane %v5557_v48, 1  ;;  %v11421_v17 = vld [vmem:[#allocation27_spill] sm:$0xff]  ;;  %v11422_v41 = vld [vmem:[#allocation26_spill] sm:$0xff] }
 0xdcd   :  { %v5682_v24 = vadd.f32 %v5681_v35, %v5680_v14  ;;  %v5734_v55 = vadd.f32 %v5733_v7, %v5732_v50  ;;  %v5683_v4 = vsel %vm5337_vm5, %v5657_v9, 0.0  ;;  %v5706_v1 = vsub.f32 %v11421_v17, %v10458_v18 }
 0xdce   :  { %v5625_v25 = vrot.slane %v5624_v11, 2  ;;  %v5720_v60 = vmul.f32 %v5704_v6, %v5704_v6  ;;  %v5735_v3 = vsel %vm5337_vm5, %v5718_v36, 0.0  ;;  %v5661_v61 = vmul.f32 %v5645_v2, %v5645_v2  ;;  %v11423_v36 = vld [vmem:[#allocation31_spill] sm:$0xff] }
 0xdcf   :  { %v5684_v40 = vadd.f32 %v5683_v4, %v5682_v24  ;;  %v5736_v63 = vadd.f32 %v5735_v3, %v5734_v55  ;;  %v5685_v20 = vsel %vm5337_vm5, %v5658_v30, 0.0  ;;  %v5707_v23 = vsub.f32 %v11422_v41, %v10458_v18 }
 0xdd0   :  { %v5626_v56 = vadd.f32 %v5625_v25, %v5624_v11  ;;  %v5721_v51 = vmul.f32 %v5705_v62, %v5705_v62  ;;  %v5737_v14 = vsel %vm5337_vm5, %v5719_v8, 0.0  ;;  %v5559_v50 = vadd.f32 %v5558_v46, %v5557_v48  ;;  %v11424_v62 = vld [vmem:[#allocation29_spill] sm:$0xff] }
 0xdd1   :  { %v5686_v35 = vadd.f32 %v5685_v20, %v5684_v40  ;;  %v5738_v7 = vadd.f32 %v5737_v14, %v5736_v63  ;;  %v5687_v6 = vsel %vm5337_vm5, %v5659_v37, 0.0  ;;  %v5708_v11 = vsub.f32 %v11423_v36, %v10458_v18 }
 0xdd2   :  { %v5627_v9 = vrot.slane %v5626_v56, 1  ;;  %v5722_v2 = vmul.f32 %v5706_v1, %v5706_v1  ;;  %v5739_v25 = vsel %vm5337_vm5, %v5720_v60, 0.0  ;;  %v5689_v4 = vsel %vm5337_vm5, %v5660_v19, 0.0  ;;  %v11425_v1 = vld [vmem:[#allocation35_spill] sm:$0xff]  ;;  %v11426_v19 = vld [vmem:[#allocation33_spill] sm:$0xff] }
 0xdd3   :  { %v5688_v30 = vadd.f32 %v5687_v6, %v5686_v35  ;;  %v5740_v55 = vadd.f32 %v5739_v25, %v5738_v7  ;;  %v5709_v8 = vsub.f32 %v11424_v62, %v10458_v18  ;;  %v5723_v48 = vmul.f32 %v5707_v23, %v5707_v23  ;;  %v11427_v6 = vld [vmem:[#allocation39_spill] sm:$0xff] }
 0xdd4   :  { %v5628_v24 = vadd.f32 %v5627_v9, %v5626_v56  ;;  %v5741_v46 = vsel %vm5337_vm5, %v5721_v51, 0.0  ;;  %v5691_v63 = vsel %vm5337_vm5, %v5661_v61, 0.0  ;;  %v5710_v20 = vsub.f32 %v11425_v1, %v10458_v18 }
 0xdd5   :  { %v5690_v40 = vadd.f32 %v5689_v4, %v5688_v30  ;;  %v5742_v37 = vadd.f32 %v5741_v46, %v5740_v55  ;;  %v5724_v60 = vmul.f32 %v5708_v11, %v5708_v11  ;;  %v5743_v56 = vsel %vm5337_vm5, %v5722_v2, 0.0  ;;  %v11428_v2 = vld [vmem:[#allocation37_spill] sm:$0xff] }
 0xdd6   :  { %v5629_v3 = vadd.f32 %v5628_v24, %v5559_v50  ;;  %v5711_v35 = vsub.f32 %v11426_v19, %v10458_v18  ;;  %v5725_v7 = vmul.f32 %v5709_v8, %v5709_v8  ;;  %v5745_v23 = vsel %vm5337_vm5, %v5723_v48, 0.0  ;;  %v11429_v48 = vld [vmem:[#allocation43_spill] sm:$0xff] }
 0xdd7   :  { %v5692_v14 = vadd.f32 %v5691_v63, %v5690_v40  ;;  %v5744_v9 = vadd.f32 %v5743_v56, %v5742_v37  ;;  %v5712_v25 = vsub.f32 %v11427_v6, %v10458_v18  ;;  %v5726_v61 = vmul.f32 %v5710_v20, %v5710_v20 }
 0xdd8   :  { %v5747_v24 = vsel %vm5337_vm5, %v5724_v60, 0.0  ;;  %v5713_v55 = vsub.f32 %v11428_v2, %v10458_v18  ;;  %v5727_v4 = vmul.f32 %v5711_v35, %v5711_v35  ;;  %v5749_v46 = vsel %vm5337_vm5, %v5725_v7, 0.0 }
 0xdd9   :  { %v5693_v51 = vrot.slane %v5692_v14, 4  ;;  %v5746_v50 = vadd.f32 %v5745_v23, %v5744_v9  ;;  %v5714_v37 = vsub.f32 %v11429_v48, %v10458_v18  ;;  %v5728_v63 = vmul.f32 %v5712_v25, %v5712_v25 }
 0xdda   :  { %v5751_v56 = vsel %vm5337_vm5, %v5726_v61, 0.0  ;;  %v5715_v60 = vsub.f32 %v10439_v43, %v10458_v18  ;;  %v5753_v23 = vsel %vm5337_vm5, %v5727_v4, 0.0 }
 0xddb   :  { %v5694_v30 = vadd.f32 %v5693_v51, %v5692_v14  ;;  %v5748_v11 = vadd.f32 %v5747_v24, %v5746_v50  ;;  %v5729_v14 = vmul.f32 %v5713_v55, %v5713_v55  ;;  %v5730_v50 = vmul.f32 %v5714_v37, %v5714_v37 }
 0xddc   :  { %v5755_v7 = vsel %vm5337_vm5, %v5728_v63, 0.0 }
 0xddd   :  { %v5695_v40 = vrot.slane %v5694_v30, 2  ;;  %v5750_v8 = vadd.f32 %v5749_v46, %v5748_v11  ;;  %v5731_v46 = vmul.f32 %v5715_v60, %v5715_v60  ;;  %v5757_v25 = vsel %vm5337_vm5, %v5729_v14, 0.0 }
 0xddf   :  { %v5696_v9 = vadd.f32 %v5695_v40, %v5694_v30  ;;  %v5752_v20 = vadd.f32 %v5751_v56, %v5750_v8  ;;  %v5759_v30 = vsel %vm5337_vm5, %v5730_v50, 0.0  ;;  %v5761_v8 = vsel %vm5337_vm5, %v5731_v46, 0.0 }
 0xde1   :  { %v5697_v51 = vrot.slane %v5696_v9, 1  ;;  %v5754_v35 = vadd.f32 %v5753_v23, %v5752_v20 }
 0xde3   :  { %v5698_v24 = vadd.f32 %v5697_v51, %v5696_v9  ;;  %v5756_v11 = vadd.f32 %v5755_v7, %v5754_v35  ;;  %v5775_v35 = vld [vmem:[%s11431_s8] sm:$0x1]  ;;  %v11432_v7 = vld [vmem:[#allocation8_spill] sm:$0xff] }
 0xde5   :  { %v5699_v48 = vadd.f32 %v5698_v24, %v5629_v3  ;;  %v5758_v61 = vadd.f32 %v5757_v25, %v5756_v11  ;;  %v5773_v3 = vld [vmem:[%s11430_s15] sm:$0x1] }
 0xde7   :  { %v5760_v40 = vadd.f32 %v5759_v30, %v5758_v61 }
 0xde9   :  { %v5762_v55 = vadd.f32 %v5761_v8, %v5760_v40  ;;  %v11434_v8 = vld [vmem:[#allocation14_spill] sm:$0xff] }
 0xdeb   :  { %v5763_v56 = vrot.slane %v5762_v55, 4 }
 0xded   :  { %v5764_v4 = vadd.f32 %v5763_v56, %v5762_v55  ;;  %v11436_v56 = vld [vmem:[#allocation16_spill] sm:$0xff] }
 0xdef   :  { %v5765_v43 = vrot.slane %v5764_v4, 2 }
 0xdf1   :  { %v5766_v20 = vadd.f32 %v5765_v43, %v5764_v4 }
 0xdf3   :  { %v5767_v37 = vrot.slane %v5766_v20, 1 }
 0xdf5   :  { %v5768_v23 = vadd.f32 %v5767_v37, %v5766_v20  ;;  %v11438_v20 = vld [vmem:[#allocation10_spill] sm:$0xff]  ;;  %v11439_v37 = vld [vmem:[#allocation9_spill] sm:$0xff] }
 0xdf7   :  { %v5769_v63 = vadd.f32 %v5768_v23, %v5699_v48 }
 0xdf9   :  { %v5770_v9 = vmul.f32 0.001953125, %v5769_v63  ;;  %v11440_v63 = vld [vmem:[#allocation11_spill] sm:$0xff] }
 0xdfb   :  { %v5771_v51 = vadd.f32 1e-05, %v5770_v9 }
 0xdfd   :  { %8266 = vrsqrt.f32 %v5771_v51 }
 0xe07   :  { %v8267_v60 = vpop.eup %8266 }
 0xe08   :  { %v5774_v14 = vmul.f32 %v8267_v60, %v5773_v3 }
 0xe0a   :  { %v5776_v50 = vmul.f32 %v5774_v14, %v10458_v18  ;;  %v10660_v43 = vrot.slane %v5774_v14, %v11432_v7 }
 0xe0c   :  { %v5777_v24 = vsub.f32 %v5775_v35, %v5776_v50  ;;  %v5782_v48 = vmul.f32 %v10660_v43, %v10207_v32  ;;  %v5783_v11 = vmul.f32 %v10199_v44, %v10660_v43  ;;  %v5784_v46 = vmul.f32 %v10660_v43, %v10219_v34 }
 0xe0d   :  { %v5785_v25 = vmul.f32 %v10215_v29, %v10660_v43  ;;  %v5786_v61 = vmul.f32 %v10660_v43, %v10235_v52  ;;  %v5787_v18 = vmul.f32 %v10231_v22, %v10660_v43  ;;  %v5788_v30 = vmul.f32 %v10660_v43, %v10251_v13  ;;  %v11433_v52 = vld [vmem:[#allocation12_spill] sm:$0xff]  ;;  %v11435_v13 = vld [vmem:[#allocation13_spill] sm:$0xff] }
 0xe0e   :  { %v5789_v32 = vmul.f32 %v10247_v54, %v10660_v43  ;;  %v5790_v44 = vmul.f32 %v10660_v43, %v10267_v10  ;;  %v5791_v34 = vmul.f32 %v10263_v49, %v10660_v43  ;;  %v5792_v29 = vmul.f32 %v10660_v43, %v10283_v57  ;;  %v11437_v10 = vld [vmem:[#allocation15_spill] sm:$0xff] }
 0xe0f   :  { %v5793_v40 = vmul.f32 %v11433_v52, %v10660_v43  ;;  %v5794_v22 = vmul.f32 %v10660_v43, %v11434_v8  ;;  %v5795_v55 = vmul.f32 %v11435_v13, %v10660_v43  ;;  %v5796_v54 = vmul.f32 %v10660_v43, %v11436_v56 }
 0xe10   :  { %v5797_v4 = vmul.f32 %v11437_v10, %v10660_v43  ;;  %v10695_v49 = vrot.slane %v5777_v24, %v11432_v7  ;;  %v5932_v57 = vmul.f32 %v10660_v43, %v11438_v20  ;;  %v5933_v23 = vmul.f32 %v11439_v37, %v10660_v43 }
 0xe11   :  { %v5934_v9 = vmul.f32 %v10660_v43, %v11440_v63  ;;  %v5935_v51 = vmul.f32 %v10217_v21, %v10660_v43  ;;  %v5936_v3 = vmul.f32 %v10660_v43, %v10237_v28  ;;  %v5937_v60 = vmul.f32 %v10233_v39, %v10660_v43 }
 0xe12   :  { %v5804_v14 = vadd.f32 %v10695_v49, %v5782_v48  ;;  %v5805_v35 = vadd.f32 %v10695_v49, %v5783_v11  ;;  %v5806_v50 = vadd.f32 %v10695_v49, %v5784_v46  ;;  %v5807_v7 = vadd.f32 %v10695_v49, %v5785_v25 }
 0xe13   :  { %v5808_v24 = vadd.f32 %v10695_v49, %v5786_v61  ;;  %v5809_v52 = vadd.f32 %v10695_v49, %v5787_v18  ;;  %v5810_v21 = vadd.f32 %v10695_v49, %v5788_v30  ;;  %v5811_v8 = vadd.f32 %v10695_v49, %v5789_v32 }
 0xe14   :  { %v5812_v28 = vadd.f32 %v10695_v49, %v5790_v44  ;;  %v5813_v39 = vadd.f32 %v10695_v49, %v5791_v34  ;;  %v5814_v48 = vadd.f32 %v10695_v49, %v5792_v29  ;;  %v5815_v11 = vadd.f32 %v10695_v49, %v5793_v40 }
 0xe15   :  { %v5816_v46 = vadd.f32 %v10695_v49, %v5794_v22  ;;  %v5817_v25 = vadd.f32 %v10695_v49, %v5795_v55  ;;  %v5818_v61 = vadd.f32 %v10695_v49, %v5796_v54  ;;  %v5819_v18 = vadd.f32 %v10695_v49, %v5797_v4 }
 0xe16   :  { %v6522_v13 = vmul.f32 -1.442695, %v5804_v14  ;;  %v6523_v30 = vmul.f32 -1.442695, %v5805_v35  ;;  %v6524_v56 = vmul.f32 -1.442695, %v5806_v50  ;;  %v5938_v32 = vmul.f32 %v10660_v43, %v10253_v53 }
 0xe17   :  { %v6525_v44 = vmul.f32 -1.442695, %v5807_v7  ;;  %v6526_v34 = vmul.f32 -1.442695, %v5808_v24  ;;  %v5939_v29 = vmul.f32 %v10249_v0, %v10660_v43  ;;  %v6527_v40 = vmul.f32 -1.442695, %v5809_v52 }
 0xe18   :  { %8268 = vpow2.f32 %v6522_v13  ;;  %v6528_v22 = vmul.f32 -1.442695, %v5810_v21  ;;  %v6529_v10 = vmul.f32 -1.442695, %v5811_v8  ;;  %v6530_v55 = vmul.f32 -1.442695, %v5812_v28 }
 0xe19   :  { %8270 = vpow2.f32 %v6523_v30  ;;  %v6531_v54 = vmul.f32 -1.442695, %v5813_v39  ;;  %v6532_v20 = vmul.f32 -1.442695, %v5814_v48  ;;  %v6533_v4 = vmul.f32 -1.442695, %v5815_v11 }
 0xe1a   :  { %8272 = vpow2.f32 %v6524_v56  ;;  %v6534_v37 = vmul.f32 -1.442695, %v5816_v46  ;;  %v6535_v63 = vmul.f32 -1.442695, %v5817_v25  ;;  %v6536_v14 = vmul.f32 -1.442695, %v5818_v61 }
 0xe1b   :  { %8274 = vpow2.f32 %v6525_v44  ;;  %v5940_v53 = vmul.f32 %v10660_v43, %v10269_v45  ;;  %v5941_v0 = vmul.f32 %v10265_v27, %v10660_v43  ;;  %v5942_v35 = vmul.f32 %v10660_v43, %v10285_v31 }
 0xe1c   :  { %8276 = vpow2.f32 %v6526_v34  ;;  %v5943_v50 = vmul.f32 %v10281_v33, %v10660_v43  ;;  %v5944_v7 = vmul.f32 %v10660_v43, %v10301_v12  ;;  %v5945_v24 = vmul.f32 %v10297_v42, %v10660_v43 }
 0xe1d   :  { %8278 = vpow2.f32 %v6527_v40  ;;  %v5946_v45 = vmul.f32 %v10660_v43, %v10317_v15  ;;  %v5947_v27 = vmul.f32 %v10313_v5, %v10660_v43  ;;  %v5948_v52 = vadd.f32 %v5932_v57, %v10695_v49 }
 0xe1e   :  { %8280 = vpow2.f32 %v6528_v22  ;;  %v5949_v31 = vadd.f32 %v5933_v23, %v10695_v49  ;;  %v5950_v33 = vadd.f32 %v5934_v9, %v10695_v49  ;;  %v5951_v12 = vadd.f32 %v5935_v51, %v10695_v49 }
 0xe1f   :  { %8282 = vpow2.f32 %v6529_v10  ;;  %v10750_v21 = vadd.f32 %v5936_v3, %v10695_v49  ;;  %v10753_v42 = vadd.f32 %v5937_v60, %v10695_v49  ;;  %v10756_v15 = vadd.f32 %v5938_v32, %v10695_v49 }
 0xe20   :  { %8284 = vpow2.f32 %v6530_v55  ;;  %v10759_v5 = vadd.f32 %v5939_v29, %v10695_v49  ;;  %v10762_v57 = vadd.f32 %v5940_v53, %v10695_v49  ;;  %v10765_v23 = vadd.f32 %v5941_v0, %v10695_v49 }
 0xe21   :  { %8286 = vpow2.f32 %v6531_v54  ;;  %v10768_v9 = vadd.f32 %v5942_v35, %v10695_v49  ;;  %v10771_v51 = vadd.f32 %v5943_v50, %v10695_v49  ;;  %v10774_v60 = vadd.f32 %v5944_v7, %v10695_v49  ;;  %v11441_v50 = vld [vmem:[#allocation17_spill] sm:$0xff] }
 0xe22   :  { %v8269_v3 = vpop.eup %8268  ;;  %8288 = vpow2.f32 %v6532_v20  ;;  %v10777_v8 = vadd.f32 %v5945_v24, %v10695_v49  ;;  %v10780_v28 = vadd.f32 %v5946_v45, %v10695_v49  ;;  %v6537_v48 = vmul.f32 -1.442695, %v5819_v18  ;;  %v11442_v24 = vld [vmem:[#allocation21_spill] sm:$0xff] }
 0xe23   :  { %v8271_v39 = vpop.eup %8270  ;;  %8290 = vpow2.f32 %v6533_v4  ;;  %v10783_v11 = vadd.f32 %v5947_v27, %v10695_v49  ;;  %v5868_v25 = vadd.f32 1.0, %v8269_v3  ;;  %v10785_v22 = vmul.f32 -1.442695, %v5948_v52 }
 0xe24   :  { %v8273_v46 = vpop.eup %8272  ;;  %8292 = vpow2.f32 %v6534_v37  ;;  %v5869_v13 = vadd.f32 1.0, %v8271_v39  ;;  %v10787_v10 = vmul.f32 -1.442695, %v5949_v31  ;;  %v10789_v20 = vmul.f32 -1.442695, %v5950_v33 }
 0xe25   :  { %v8275_v61 = vpop.eup %8274  ;;  %8294 = vpow2.f32 %v6535_v63  ;;  %v5870_v56 = vadd.f32 1.0, %v8273_v46  ;;  %v10791_v4 = vmul.f32 -1.442695, %v5951_v12  ;;  %v6076_v53 = vmul.f32 %v10660_v43, %v10335_v47 }
 0xe26   :  { %v8277_v30 = vpop.eup %8276  ;;  %8296 = vpow2.f32 %v6536_v14  ;;  %v5871_v44 = vadd.f32 1.0, %v8275_v61  ;;  %v6077_v7 = vmul.f32 %v11441_v50, %v10660_v43  ;;  %v6078_v45 = vmul.f32 %v10660_v43, %v11442_v24 }
 0xe27   :  { %v8279_v32 = vpop.eup %8278  ;;  %8298 = vpow2.f32 %v6537_v48  ;;  %v5872_v29 = vadd.f32 1.0, %v8277_v30  ;;  %v6079_v31 = vmul.f32 %v10343_v38, %v10660_v43  ;;  %v6080_v33 = vmul.f32 %v10660_v43, %v10363_v16 }
 0xe28   :  { %v8281_v34 = vpop.eup %8280  ;;  %8300 = vrcp.f32 %v5868_v25  ;;  %v5873_v18 = vadd.f32 1.0, %v8279_v32  ;;  %v6081_v3 = vmul.f32 %v10355_v59, %v10660_v43  ;;  %v6082_v39 = vmul.f32 %v10660_v43, %v10379_v58  ;;  %v11443_v25 = vld [vmem:[#allocation25_spill] sm:$0xff] }
 0xe29   :  { %v8283_v40 = vpop.eup %8282  ;;  %8302 = vrcp.f32 %v5869_v13  ;;  %v5874_v54 = vadd.f32 1.0, %v8281_v34  ;;  %v6083_v61 = vmul.f32 %v11443_v25, %v10660_v43  ;;  %v11444_v13 = vld [vmem:[#allocation30_spill] sm:$0xff]  ;;  %v10843_v25 = vadd.f32 %v6079_v31, %v10695_v49 }
 0xe2a   :  { %v8285_v55 = vpop.eup %8284  ;;  %8304 = vrcp.f32 %v5870_v56  ;;  %v5875_v63 = vadd.f32 1.0, %v8283_v40  ;;  %v6084_v38 = vmul.f32 %v10660_v43, %v11444_v13  ;;  %v11445_v56 = vld [vmem:[#allocation28_spill] sm:$0xff]  ;;  %v10846_v13 = vadd.f32 %v6080_v33, %v10695_v49 }
 0xe2b   :  { %v8287_v37 = vpop.eup %8286  ;;  %v5876_v14 = vadd.f32 1.0, %v8285_v55  ;;  %8306 = vrcp.f32 %v5871_v44  ;;  %v6085_v32 = vmul.f32 %v11445_v56, %v10660_v43  ;;  %v11446_v44 = vld [vmem:[#allocation34_spill] sm:$0xff] }
 0xe2c   :  { %v8289_v0 = vpop.eup %8288  ;;  %v5877_v35 = vadd.f32 1.0, %v8287_v37  ;;  %8308 = vrcp.f32 %v5872_v29  ;;  %v6086_v59 = vmul.f32 %v10660_v43, %v11446_v44  ;;  %v11447_v29 = vld [vmem:[#allocation32_spill] sm:$0xff]  ;;  %v10866_v33 = vadd.f32 %v6084_v38, %v10695_v49 }
 0xe2d   :  { %v8291_v27 = vpop.eup %8290  ;;  %v5878_v52 = vadd.f32 1.0, %v8289_v0  ;;  %8310 = vrcp.f32 %v5873_v18  ;;  %v6087_v40 = vmul.f32 %v11447_v29, %v10660_v43  ;;  %v11448_v18 = vld [vmem:[#allocation38_spill] sm:$0xff] }
 0xe2e   :  { %v8293_v12 = vpop.eup %8292  ;;  %v5879_v47 = vadd.f32 1.0, %v8291_v27  ;;  %8312 = vrcp.f32 %v5874_v54  ;;  %v6088_v55 = vmul.f32 %v10660_v43, %v11448_v18  ;;  %v11450_v0 = vld [vmem:[#allocation42_spill] sm:$0xff]  ;;  %v6549_v18 = vmul.f32 -1.442695, %v10771_v51 }
 0xe2f   :  { %v8295_v48 = vpop.eup %8294  ;;  %v5880_v46 = vadd.f32 1.0, %v8293_v12  ;;  %8314 = vrcp.f32 %v5875_v63  ;;  %v11449_v63 = vld [vmem:[#allocation36_spill] sm:$0xff]  ;;  %v6090_v50 = vmul.f32 %v10660_v43, %v11450_v0  ;;  %v10830_v12 = vadd.f32 %v6076_v53, %v10695_v49  ;;  %v11454_v51 = vld [vmem:[#allocation18_spill] sm:$0xff] }
 0xe30   :  { %v8297_v30 = vpop.eup %8296  ;;  %v5881_v16 = vadd.f32 1.0, %v8295_v48  ;;  %8316 = vrcp.f32 %v5876_v14  ;;  %v6089_v14 = vmul.f32 %v11449_v63, %v10660_v43  ;;  %v11455_v63 = vld [vmem:[#allocation22_spill] sm:$0xff] }
 0xe31   :  { %v8299_v34 = vpop.eup %8298  ;;  %v5882_v58 = vadd.f32 1.0, %v8297_v30  ;;  %8318 = vrcp.f32 %v5877_v35  ;;  %v11452_v35 = vld [vmem:[#allocation40_spill] sm:$0xff]  ;;  %v10869_v30 = vadd.f32 %v6085_v32, %v10695_v49  ;;  %v6542_v32 = vmul.f32 -1.442695, %v10750_v21 }
 0xe32   :  { %v8301_v54 = vpop.eup %8300  ;;  %v5883_v37 = vadd.f32 1.0, %v8299_v34  ;;  %8320 = vrcp.f32 %v5878_v52  ;;  %v6091_v27 = vmul.f32 %v11452_v35, %v10660_v43  ;;  %v10833_v52 = vadd.f32 %v6077_v7, %v10695_v49 }
 0xe33   :  { %v8303_v24 = vpop.eup %8302  ;;  %8322 = vrcp.f32 %v5879_v47  ;;  %5916 = vst.msk [vmem:[%s11451_s29] sm:$0xff] %vm5337_vm5, %v8301_v54  ;;  %v10840_v47 = vadd.f32 %v6078_v45, %v10695_v49  ;;  %v10853_v7 = vadd.f32 %v6081_v3, %v10695_v49  ;;  %v10859_v45 = vadd.f32 %v6083_v61, %v10695_v49 }
 0xe34   :  { %v8305_v48 = vpop.eup %8304  ;;  %8324 = vrcp.f32 %v5880_v46  ;;  %5917 = vst.msk [vmem:[%s11451_s29 + $0x8] sm:$0xff] %vm5337_vm5, %v8303_v24  ;;  %v10856_v46 = vadd.f32 %v6082_v39, %v10695_v49  ;;  %v10872_v3 = vadd.f32 %v6086_v59, %v10695_v49  ;;  %v10879_v61 = vadd.f32 %v6087_v40, %v10695_v49 }
 0xe35   :  { %v8307_v53 = vpop.eup %8306  ;;  %8326 = vrcp.f32 %v5881_v16  ;;  %5918 = vst.msk [vmem:[%s11451_s29 + $0x10] sm:$0xff] %vm5337_vm5, %v8305_v48  ;;  %v10882_v16 = vadd.f32 %v6088_v55, %v10695_v49  ;;  %v10885_v38 = vadd.f32 %v6089_v14, %v10695_v49  ;;  %v10894_v44 = vadd.f32 %v6090_v50, %v10695_v49  ;;  %v11457_v50 = vld [vmem:[#allocation23_spill] sm:$0xff] }
 0xe36   :  { %v8309_v31 = vpop.eup %8308  ;;  %8328 = vrcp.f32 %v5882_v58  ;;  %5919 = vst.msk [vmem:[%s11451_s29 + $0x18] sm:$0xff] %vm5337_vm5, %v8307_v53  ;;  %v10897_v59 = vadd.f32 %v6091_v27, %v10695_v49  ;;  %v6543_v58 = vmul.f32 -1.442695, %v10753_v42  ;;  %v6544_v21 = vmul.f32 -1.442695, %v10756_v15 }
 0xe37   :  { %v8311_v39 = vpop.eup %8310  ;;  %8330 = vrcp.f32 %v5883_v37  ;;  %5920 = vst.msk [vmem:[%s11451_s29 + $0x20] sm:$0xff] %vm5337_vm5, %v8309_v31  ;;  %v6545_v42 = vmul.f32 -1.442695, %v10759_v5  ;;  %v6547_v15 = vmul.f32 -1.442695, %v10765_v23  ;;  %v11453_v23 = vld [vmem:[#allocation19_spill] sm:$0xff]  ;;  %v6221_v37 = vmul.f32 %v11454_v51, %v10660_v43 }
 0xe38   :  { %v8313_v56 = vpop.eup %8312  ;;  %5921 = vst.msk [vmem:[%s11451_s29 + $0x28] sm:$0xff] %vm5337_vm5, %v8311_v39  ;;  %8332 = vpow2.f32 %v10785_v22  ;;  %v6550_v5 = vmul.f32 -1.442695, %v10774_v60  ;;  %v6222_v60 = vmul.f32 %v10660_v43, %v11455_v63  ;;  %v6225_v24 = vmul.f32 %v11457_v50, %v10660_v43 }
 0xe39   :  { %v8315_v34 = vpop.eup %8314  ;;  %5922 = vst.msk [vmem:[%s11451_s29 + $0x30] sm:$0xff] %vm5337_vm5, %v8313_v56  ;;  %8334 = vpow2.f32 %v10787_v10  ;;  %v6546_v10 = vmul.f32 -1.442695, %v10762_v57  ;;  %v6551_v57 = vmul.f32 -1.442695, %v10777_v8  ;;  %v6223_v8 = vmul.f32 %v11418_v26, %v10660_v43 }
 0xe3a   :  { %v8317_v29 = vpop.eup %8316  ;;  %5923 = vst.msk [vmem:[%s11451_s29 + $0x38] sm:$0xff] %vm5337_vm5, %v8315_v34  ;;  %8336 = vpow2.f32 %v10789_v20  ;;  %v6548_v20 = vmul.f32 -1.442695, %v10768_v9  ;;  %v6220_v9 = vmul.f32 %v10660_v43, %v11453_v23  ;;  %v6226_v27 = vmul.f32 %v10660_v43, %v11421_v17  ;;  %v11459_v34 = vld [vmem:[#allocation41_spill] sm:$0xff] }
 0xe3b   :  { %v8319_v22 = vpop.eup %8318  ;;  %5924 = vst.msk [vmem:[%s11451_s29 + $0x40] sm:$0xff] %vm5337_vm5, %v8317_v29  ;;  %8338 = vpow2.f32 %v10791_v4  ;;  %v6552_v4 = vmul.f32 -1.442695, %v10780_v28  ;;  %v11456_v28 = vld [vmem:[#allocation24_spill] sm:$0xff]  ;;  %v6227_v48 = vmul.f32 %v11422_v41, %v10660_v43  ;;  %v6228_v26 = vmul.f32 %v10660_v43, %v11423_v36 }
 0xe3c   :  { %v8321_v40 = vpop.eup %8320  ;;  %5925 = vst.msk [vmem:[%s11451_s29 + $0x48] sm:$0xff] %vm5337_vm5, %v8319_v22  ;;  %8340 = vpow2.f32 %v6542_v32  ;;  %v6224_v0 = vmul.f32 %v10660_v43, %v11456_v28  ;;  %v6229_v31 = vmul.f32 %v11424_v62, %v10660_v43  ;;  %v6230_v39 = vmul.f32 %v10660_v43, %v11425_v1  ;;  %v11458_v62 = vld [vmem:[#allocation43_spill] sm:$0xff] }
 0xe3d   :  { %v8323_v55 = vpop.eup %8322  ;;  %5926 = vst.msk [vmem:[%s11451_s29 + $0x50] sm:$0xff] %vm5337_vm5, %v8321_v40  ;;  %8342 = vpow2.f32 %v6543_v58  ;;  %v6231_v17 = vmul.f32 %v11426_v19, %v10660_v43  ;;  %v6232_v36 = vmul.f32 %v10660_v43, %v11427_v6  ;;  %v6233_v56 = vmul.f32 %v11428_v2, %v10660_v43 }
 0xe3e   :  { %v8325_v54 = vpop.eup %8324  ;;  %5927 = vst.msk [vmem:[%s11451_s29 + $0x58] sm:$0xff] %vm5337_vm5, %v8323_v55  ;;  %8344 = vpow2.f32 %v6544_v21  ;;  %v6234_v32 = vmul.f32 %v10660_v43, %v11458_v62  ;;  %v6553_v19 = vmul.f32 -1.442695, %v10783_v11  ;;  %v6235_v58 = vmul.f32 %v11459_v34, %v10660_v43 }
 0xe3f   :  { %v8327_v14 = vpop.eup %8326  ;;  %5928 = vst.msk [vmem:[%s11451_s29 + $0x60] sm:$0xff] %vm5337_vm5, %v8325_v54  ;;  %8346 = vpow2.f32 %v6545_v42  ;;  %v10986_v29 = vadd.f32 %v6220_v9, %v10695_v49  ;;  %v10989_v6 = vadd.f32 %v6221_v37, %v10695_v49  ;;  %v10992_v2 = vadd.f32 %v6222_v60, %v10695_v49 }
 0xe40   :  { %v8329_v35 = vpop.eup %8328  ;;  %5929 = vst.msk [vmem:[%s11451_s29 + $0x68] sm:$0xff] %vm5337_vm5, %v8327_v14  ;;  %8348 = vpow2.f32 %v6546_v10  ;;  %v10995_v11 = vadd.f32 %v6223_v8, %v10695_v49  ;;  %v10998_v43 = vadd.f32 %v6224_v0, %v10695_v49  ;;  %v11010_v54 = vadd.f32 %v6228_v26, %v10695_v49 }
 0xe41   :  { %v8331_v53 = vpop.eup %8330  ;;  %5930 = vst.msk [vmem:[%s11451_s29 + $0x70] sm:$0xff] %vm5337_vm5, %v8329_v35  ;;  %8350 = vpow2.f32 %v6547_v15  ;;  %v11016_v51 = vadd.f32 %v6230_v39, %v10695_v49  ;;  %v11019_v60 = vadd.f32 %v6231_v17, %v10695_v49  ;;  %v11022_v14 = vadd.f32 %v6232_v36, %v10695_v49 }
 0xe42   :  { %v8333_v41 = vpop.eup %8332  ;;  %5931 = vst.msk [vmem:[%s11451_s29 + $0x78] sm:$0xff] %vm5337_vm5, %v8331_v53  ;;  %8352 = vpow2.f32 %v6548_v20  ;;  %v11001_v20 = vadd.f32 %v6225_v24, %v10695_v49  ;;  %v11025_v0 = vadd.f32 %v6233_v56, %v10695_v49  ;;  %v11028_v50 = vadd.f32 %v6234_v32, %v10695_v49 }
 0xe43   :  { %v8335_v1 = vpop.eup %8334  ;;  %8354 = vpow2.f32 %v6549_v18  ;;  %v6012_v22 = vadd.f32 1.0, %v8333_v41  ;;  %v11004_v18 = vadd.f32 %v6226_v27, %v10695_v49  ;;  %v11031_v27 = vadd.f32 %v6235_v58, %v10695_v49 }
 0xe44   :  { %v8337_v21 = vpop.eup %8336  ;;  %8356 = vpow2.f32 %v6550_v5  ;;  %v6013_v10 = vadd.f32 1.0, %v8335_v1 }
 0xe45   :  { %v8339_v42 = vpop.eup %8338  ;;  %8358 = vpow2.f32 %v6551_v57  ;;  %v6014_v15 = vadd.f32 1.0, %v8337_v21  ;;  %v11007_v57 = vadd.f32 %v6227_v48, %v10695_v49 }
 0xe46   :  { %v8341_v40 = vpop.eup %8340  ;;  %8360 = vpow2.f32 %v6552_v4  ;;  %v6015_v5 = vadd.f32 1.0, %v8339_v42  ;;  %v11013_v4 = vadd.f32 %v6229_v31, %v10695_v49 }
 0xe47   :  { %v8343_v55 = vpop.eup %8342  ;;  %8362 = vpow2.f32 %v6553_v19  ;;  %v6016_v9 = vadd.f32 1.0, %v8341_v40 }
 0xe48   :  { %v8345_v23 = vpop.eup %8344  ;;  %8364 = vrcp.f32 %v6012_v22  ;;  %v6017_v63 = vadd.f32 1.0, %v8343_v55  ;;  %v6554_v22 = vmul.f32 -1.442695, %v10830_v12  ;;  %v6557_v12 = vmul.f32 -1.442695, %v10843_v25 }
 0xe49   :  { %v8347_v37 = vpop.eup %8346  ;;  %8366 = vrcp.f32 %v6013_v10  ;;  %v6018_v28 = vadd.f32 1.0, %v8345_v23  ;;  %v6555_v10 = vmul.f32 -1.442695, %v10833_v52  ;;  %v6558_v52 = vmul.f32 -1.442695, %v10846_v13 }
 0xe4a   :  { %v8349_v8 = vpop.eup %8348  ;;  %8368 = vrcp.f32 %v6014_v15  ;;  %v6019_v35 = vadd.f32 1.0, %v8347_v37  ;;  %v6556_v15 = vmul.f32 -1.442695, %v10840_v47  ;;  %v6559_v47 = vmul.f32 -1.442695, %v10853_v7 }
 0xe4b   :  { %v8351_v24 = vpop.eup %8350  ;;  %8370 = vrcp.f32 %v6015_v5  ;;  %v6020_v26 = vadd.f32 1.0, %v8349_v8  ;;  %v6560_v25 = vmul.f32 -1.442695, %v10856_v46  ;;  %v6561_v13 = vmul.f32 -1.442695, %v10859_v45 }
 0xe4c   :  { %v8353_v48 = vpop.eup %8352  ;;  %8372 = vrcp.f32 %v6016_v9  ;;  %v6021_v31 = vadd.f32 1.0, %v8351_v24  ;;  %v6562_v7 = vmul.f32 -1.442695, %v10866_v33  ;;  %v6563_v46 = vmul.f32 -1.442695, %v10869_v30 }
 0xe4d   :  { %v8355_v53 = vpop.eup %8354  ;;  %8374 = vrcp.f32 %v6017_v63  ;;  %v6022_v17 = vadd.f32 1.0, %v8353_v48  ;;  %v6564_v45 = vmul.f32 -1.442695, %v10872_v3  ;;  %v6565_v33 = vmul.f32 -1.442695, %v10879_v61 }
 0xe4e   :  { %v8357_v39 = vpop.eup %8356  ;;  %8376 = vrcp.f32 %v6018_v28  ;;  %v6023_v36 = vadd.f32 1.0, %v8355_v53  ;;  %v6566_v30 = vmul.f32 -1.442695, %v10882_v16  ;;  %v6567_v3 = vmul.f32 -1.442695, %v10885_v38 }
 0xe4f   :  { %v8359_v41 = vpop.eup %8358  ;;  %8378 = vrcp.f32 %v6019_v35  ;;  %v6024_v62 = vadd.f32 1.0, %v8357_v39  ;;  %v6568_v61 = vmul.f32 -1.442695, %v10894_v44  ;;  %v6569_v16 = vmul.f32 -1.442695, %v10897_v59 }
 0xe50   :  { %v8361_v56 = vpop.eup %8360  ;;  %8380 = vrcp.f32 %v6020_v26  ;;  %v6025_v1 = vadd.f32 1.0, %v8359_v41 }
 0xe51   :  { %v8363_v32 = vpop.eup %8362  ;;  %8382 = vrcp.f32 %v6021_v31  ;;  %v6026_v19 = vadd.f32 1.0, %v8361_v56 }
 0xe52   :  { %v8365_v49 = vpop.eup %8364  ;;  %8384 = vrcp.f32 %v6022_v17  ;;  %v6027_v58 = vadd.f32 1.0, %v8363_v32 }
 0xe53   :  { %v8367_v34 = vpop.eup %8366  ;;  %8386 = vrcp.f32 %v6023_v36  ;;  %6060 = vst.msk [vmem:[%s11451_s29 + $0x80] sm:$0xff] %vm5337_vm5, %v8365_v49 }
 0xe54   :  { %v8369_v21 = vpop.eup %8368  ;;  %8388 = vrcp.f32 %v6024_v62  ;;  %6061 = vst.msk [vmem:[%s11451_s29 + $0x88] sm:$0xff] %vm5337_vm5, %v8367_v34 }
 0xe55   :  { %v8371_v42 = vpop.eup %8370  ;;  %8390 = vrcp.f32 %v6025_v1  ;;  %6062 = vst.msk [vmem:[%s11451_s29 + $0x90] sm:$0xff] %vm5337_vm5, %v8369_v21 }
 0xe56   :  { %v8373_v40 = vpop.eup %8372  ;;  %8392 = vrcp.f32 %v6026_v19  ;;  %6063 = vst.msk [vmem:[%s11451_s29 + $0x98] sm:$0xff] %vm5337_vm5, %v8371_v42 }
 0xe57   :  { %v8375_v55 = vpop.eup %8374  ;;  %8394 = vrcp.f32 %v6027_v58  ;;  %6064 = vst.msk [vmem:[%s11451_s29 + $0xa0] sm:$0xff] %vm5337_vm5, %v8373_v40 }
 0xe58   :  { %v8377_v5 = vpop.eup %8376  ;;  %6065 = vst.msk [vmem:[%s11451_s29 + $0xa8] sm:$0xff] %vm5337_vm5, %v8375_v55  ;;  %8396 = vpow2.f32 %v6554_v22 }
 0xe59   :  { %v8379_v23 = vpop.eup %8378  ;;  %6066 = vst.msk [vmem:[%s11451_s29 + $0xb0] sm:$0xff] %vm5337_vm5, %v8377_v5  ;;  %8398 = vpow2.f32 %v6555_v10 }
 0xe5a   :  { %v8381_v9 = vpop.eup %8380  ;;  %6067 = vst.msk [vmem:[%s11451_s29 + $0xb8] sm:$0xff] %vm5337_vm5, %v8379_v23  ;;  %8400 = vpow2.f32 %v6556_v15 }
 0xe5b   :  { %v8383_v37 = vpop.eup %8382  ;;  %6068 = vst.msk [vmem:[%s11451_s29 + $0xc0] sm:$0xff] %vm5337_vm5, %v8381_v9  ;;  %8402 = vpow2.f32 %v6557_v12 }
 0xe5c   :  { %v8385_v63 = vpop.eup %8384  ;;  %6069 = vst.msk [vmem:[%s11451_s29 + $0xc8] sm:$0xff] %vm5337_vm5, %v8383_v37  ;;  %8404 = vpow2.f32 %v6558_v52 }
 0xe5d   :  { %v8387_v8 = vpop.eup %8386  ;;  %6070 = vst.msk [vmem:[%s11451_s29 + $0xd0] sm:$0xff] %vm5337_vm5, %v8385_v63  ;;  %8406 = vpow2.f32 %v6559_v47 }
 0xe5e   :  { %v8389_v28 = vpop.eup %8388  ;;  %6071 = vst.msk [vmem:[%s11451_s29 + $0xd8] sm:$0xff] %vm5337_vm5, %v8387_v8  ;;  %8408 = vpow2.f32 %v6560_v25 }
 0xe5f   :  { %v8391_v24 = vpop.eup %8390  ;;  %6072 = vst.msk [vmem:[%s11451_s29 + $0xe0] sm:$0xff] %vm5337_vm5, %v8389_v28  ;;  %8410 = vpow2.f32 %v6561_v13 }
 0xe60   :  { %v8393_v35 = vpop.eup %8392  ;;  %6073 = vst.msk [vmem:[%s11451_s29 + $0xe8] sm:$0xff] %vm5337_vm5, %v8391_v24  ;;  %8412 = vpow2.f32 %v6562_v7  ;;  %v6570_v7 = vmul.f32 -1.442695, %v10986_v29  ;;  %v6573_v29 = vmul.f32 -1.442695, %v10995_v11 }
 0xe61   :  { %v8395_v48 = vpop.eup %8394  ;;  %6074 = vst.msk [vmem:[%s11451_s29 + $0xf0] sm:$0xff] %vm5337_vm5, %v8393_v35  ;;  %8414 = vpow2.f32 %v6563_v46  ;;  %v6571_v46 = vmul.f32 -1.442695, %v10989_v6  ;;  %v6574_v6 = vmul.f32 -1.442695, %v10998_v43 }
 0xe62   :  { %v8397_v26 = vpop.eup %8396  ;;  %6075 = vst.msk [vmem:[%s11451_s29 + $0xf8] sm:$0xff] %vm5337_vm5, %v8395_v48  ;;  %8416 = vpow2.f32 %v6564_v45  ;;  %v6572_v45 = vmul.f32 -1.442695, %v10992_v2  ;;  %v6575_v2 = vmul.f32 -1.442695, %v11001_v20 }
 0xe63   :  { %v8399_v53 = vpop.eup %8398  ;;  %8418 = vpow2.f32 %v6565_v33  ;;  %v6156_v39 = vadd.f32 1.0, %v8397_v26  ;;  %v6576_v11 = vmul.f32 -1.442695, %v11004_v18  ;;  %v6577_v43 = vmul.f32 -1.442695, %v11007_v57 }
 0xe64   :  { %v8401_v31 = vpop.eup %8400  ;;  %8420 = vpow2.f32 %v6566_v30  ;;  %v6157_v41 = vadd.f32 1.0, %v8399_v53  ;;  %v6578_v20 = vmul.f32 -1.442695, %v11010_v54  ;;  %v6579_v18 = vmul.f32 -1.442695, %v11013_v4 }
 0xe65   :  { %v8403_v17 = vpop.eup %8402  ;;  %8422 = vpow2.f32 %v6567_v3  ;;  %v6158_v36 = vadd.f32 1.0, %v8401_v31  ;;  %v6580_v57 = vmul.f32 -1.442695, %v11016_v51  ;;  %v6581_v54 = vmul.f32 -1.442695, %v11019_v60 }
 0xe66   :  { %v8405_v38 = vpop.eup %8404  ;;  %8424 = vpow2.f32 %v6568_v61  ;;  %v6159_v62 = vadd.f32 1.0, %v8403_v17  ;;  %v6582_v4 = vmul.f32 -1.442695, %v11022_v14  ;;  %v6583_v51 = vmul.f32 -1.442695, %v11025_v0 }
 0xe67   :  { %v8407_v56 = vpop.eup %8406  ;;  %8426 = vpow2.f32 %v6569_v16  ;;  %v6160_v1 = vadd.f32 1.0, %v8405_v38  ;;  %v6584_v60 = vmul.f32 -1.442695, %v11028_v50  ;;  %v6585_v14 = vmul.f32 -1.442695, %v11031_v27 }
 0xe68   :  { %v8409_v32 = vpop.eup %8408  ;;  %8428 = vrcp.f32 %v6156_v39  ;;  %v6161_v49 = vadd.f32 1.0, %v8407_v56 }
 0xe69   :  { %v8411_v44 = vpop.eup %8410  ;;  %8430 = vrcp.f32 %v6157_v41  ;;  %v6162_v59 = vadd.f32 1.0, %v8409_v32 }
 0xe6a   :  { %v8413_v19 = vpop.eup %8412  ;;  %8432 = vrcp.f32 %v6158_v36  ;;  %v6163_v58 = vadd.f32 1.0, %v8411_v44 }
 0xe6b   :  { %v8415_v34 = vpop.eup %8414  ;;  %8434 = vrcp.f32 %v6159_v62  ;;  %v6164_v22 = vadd.f32 1.0, %v8413_v19 }
 0xe6c   :  { %v8417_v21 = vpop.eup %8416  ;;  %8436 = vrcp.f32 %v6160_v1  ;;  %v6165_v10 = vadd.f32 1.0, %v8415_v34 }
 0xe6d   :  { %v8419_v42 = vpop.eup %8418  ;;  %8438 = vrcp.f32 %v6161_v49  ;;  %v6166_v15 = vadd.f32 1.0, %v8417_v21 }
 0xe6e   :  { %v8421_v40 = vpop.eup %8420  ;;  %8440 = vrcp.f32 %v6162_v59  ;;  %v6167_v12 = vadd.f32 1.0, %v8419_v42 }
 0xe6f   :  { %v8423_v55 = vpop.eup %8422  ;;  %8442 = vrcp.f32 %v6163_v58  ;;  %v6168_v52 = vadd.f32 1.0, %v8421_v40 }
 0xe70   :  { %v8425_v5 = vpop.eup %8424  ;;  %8444 = vrcp.f32 %v6164_v22  ;;  %v6169_v47 = vadd.f32 1.0, %v8423_v55 }
 0xe71   :  { %v8427_v23 = vpop.eup %8426  ;;  %8446 = vrcp.f32 %v6165_v10  ;;  %v6170_v25 = vadd.f32 1.0, %v8425_v5 }
 0xe72   :  { %v8429_v9 = vpop.eup %8428  ;;  %8448 = vrcp.f32 %v6166_v15  ;;  %v6171_v13 = vadd.f32 1.0, %v8427_v23 }
 0xe73   :  { %v8431_v37 = vpop.eup %8430  ;;  %8450 = vrcp.f32 %v6167_v12  ;;  %6204 = vst.msk [vmem:[%s11451_s29 + $0x100] sm:$0xff] %vm5337_vm5, %v8429_v9 }
 0xe74   :  { %v8433_v63 = vpop.eup %8432  ;;  %8452 = vrcp.f32 %v6168_v52  ;;  %6205 = vst.msk [vmem:[%s11451_s29 + $0x108] sm:$0xff] %vm5337_vm5, %v8431_v37 }
 0xe75   :  { %v8435_v8 = vpop.eup %8434  ;;  %8454 = vrcp.f32 %v6169_v47  ;;  %6206 = vst.msk [vmem:[%s11451_s29 + $0x110] sm:$0xff] %vm5337_vm5, %v8433_v63 }
 0xe76   :  { %v8437_v28 = vpop.eup %8436  ;;  %8456 = vrcp.f32 %v6170_v25  ;;  %6207 = vst.msk [vmem:[%s11451_s29 + $0x118] sm:$0xff] %vm5337_vm5, %v8435_v8 }
 0xe77   :  { %v8439_v24 = vpop.eup %8438  ;;  %8458 = vrcp.f32 %v6171_v13  ;;  %6208 = vst.msk [vmem:[%s11451_s29 + $0x120] sm:$0xff] %vm5337_vm5, %v8437_v28 }
 0xe78   :  { %v8441_v33 = vpop.eup %8440  ;;  %6209 = vst.msk [vmem:[%s11451_s29 + $0x128] sm:$0xff] %vm5337_vm5, %v8439_v24  ;;  %8460 = vpow2.f32 %v6570_v7 }
 0xe79   :  { %v8443_v35 = vpop.eup %8442  ;;  %6210 = vst.msk [vmem:[%s11451_s29 + $0x130] sm:$0xff] %vm5337_vm5, %v8441_v33  ;;  %8462 = vpow2.f32 %v6571_v46 }
 0xe7a   :  { %v8445_v30 = vpop.eup %8444  ;;  %6211 = vst.msk [vmem:[%s11451_s29 + $0x138] sm:$0xff] %vm5337_vm5, %v8443_v35  ;;  %8464 = vpow2.f32 %v6572_v45 }
 0xe7b   :  { %v8447_v48 = vpop.eup %8446  ;;  %6212 = vst.msk [vmem:[%s11451_s29 + $0x140] sm:$0xff] %vm5337_vm5, %v8445_v30  ;;  %8466 = vpow2.f32 %v6573_v29 }
 0xe7c   :  { %v8449_v3 = vpop.eup %8448  ;;  %6213 = vst.msk [vmem:[%s11451_s29 + $0x148] sm:$0xff] %vm5337_vm5, %v8447_v48  ;;  %8468 = vpow2.f32 %v6574_v6 }
 0xe7d   :  { %v8451_v26 = vpop.eup %8450  ;;  %6214 = vst.msk [vmem:[%s11451_s29 + $0x150] sm:$0xff] %vm5337_vm5, %v8449_v3  ;;  %8470 = vpow2.f32 %v6575_v2 }
 0xe7e   :  { %v8453_v61 = vpop.eup %8452  ;;  %6215 = vst.msk [vmem:[%s11451_s29 + $0x158] sm:$0xff] %vm5337_vm5, %v8451_v26  ;;  %8472 = vpow2.f32 %v6576_v11 }
 0xe7f   :  { %v8455_v53 = vpop.eup %8454  ;;  %6216 = vst.msk [vmem:[%s11451_s29 + $0x160] sm:$0xff] %vm5337_vm5, %v8453_v61  ;;  %8474 = vpow2.f32 %v6577_v43 }
 0xe80   :  { %v8457_v16 = vpop.eup %8456  ;;  %6217 = vst.msk [vmem:[%s11451_s29 + $0x168] sm:$0xff] %vm5337_vm5, %v8455_v53  ;;  %8476 = vpow2.f32 %v6578_v20 }
 0xe81   :  { %v8459_v31 = vpop.eup %8458  ;;  %6218 = vst.msk [vmem:[%s11451_s29 + $0x170] sm:$0xff] %vm5337_vm5, %v8457_v16  ;;  %8478 = vpow2.f32 %v6579_v18 }
 0xe82   :  { %v8461_v39 = vpop.eup %8460  ;;  %6219 = vst.msk [vmem:[%s11451_s29 + $0x178] sm:$0xff] %vm5337_vm5, %v8459_v31  ;;  %8480 = vpow2.f32 %v6580_v57 }
 0xe83   :  { %v8463_v17 = vpop.eup %8462  ;;  %8482 = vpow2.f32 %v6581_v54  ;;  %v6300_v38 = vadd.f32 1.0, %v8461_v39 }
 0xe84   :  { %v8465_v41 = vpop.eup %8464  ;;  %8484 = vpow2.f32 %v6582_v4  ;;  %v6301_v56 = vadd.f32 1.0, %v8463_v17 }
 0xe85   :  { %v8467_v36 = vpop.eup %8466  ;;  %8486 = vpow2.f32 %v6583_v51  ;;  %v6302_v62 = vadd.f32 1.0, %v8465_v41 }
 0xe86   :  { %v8469_v0 = vpop.eup %8468  ;;  %8488 = vpow2.f32 %v6584_v60  ;;  %v6303_v1 = vadd.f32 1.0, %v8467_v36 }
 0xe87   :  { %v8471_v32 = vpop.eup %8470  ;;  %8490 = vpow2.f32 %v6585_v14  ;;  %v6304_v49 = vadd.f32 1.0, %v8469_v0 }
 0xe88   :  { %v8473_v44 = vpop.eup %8472  ;;  %8492 = vrcp.f32 %v6300_v38  ;;  %v6305_v19 = vadd.f32 1.0, %v8471_v32 }
 0xe89   :  { %v8475_v50 = vpop.eup %8474  ;;  %8494 = vrcp.f32 %v6301_v56  ;;  %v6306_v27 = vadd.f32 1.0, %v8473_v44 }
 0xe8a   :  { %v8477_v59 = vpop.eup %8476  ;;  %8496 = vrcp.f32 %v6302_v62  ;;  %v6307_v58 = vadd.f32 1.0, %v8475_v50 }
 0xe8b   :  { %v8479_v34 = vpop.eup %8478  ;;  %8498 = vrcp.f32 %v6303_v1  ;;  %v6308_v22 = vadd.f32 1.0, %v8477_v59 }
 0xe8c   :  { %v8481_v21 = vpop.eup %8480  ;;  %8500 = vrcp.f32 %v6304_v49  ;;  %v6309_v10 = vadd.f32 1.0, %v8479_v34 }
 0xe8d   :  { %v8483_v42 = vpop.eup %8482  ;;  %8502 = vrcp.f32 %v6305_v19  ;;  %v6310_v15 = vadd.f32 1.0, %v8481_v21 }
 0xe8e   :  { %v8485_v40 = vpop.eup %8484  ;;  %8504 = vrcp.f32 %v6306_v27  ;;  %v6311_v12 = vadd.f32 1.0, %v8483_v42 }
 0xe8f   :  { %v8487_v55 = vpop.eup %8486  ;;  %8506 = vrcp.f32 %v6307_v58  ;;  %v6312_v52 = vadd.f32 1.0, %v8485_v40 }
 0xe90   :  { %v8489_v5 = vpop.eup %8488  ;;  %8508 = vrcp.f32 %v6308_v22  ;;  %v6313_v47 = vadd.f32 1.0, %v8487_v55 }
 0xe91   :  { %v8491_v23 = vpop.eup %8490  ;;  %8510 = vrcp.f32 %v6309_v10  ;;  %v6314_v25 = vadd.f32 1.0, %v8489_v5 }
 0xe92   :  { %v8493_v9 = vpop.eup %8492  ;;  %8512 = vrcp.f32 %v6310_v15  ;;  %v6315_v13 = vadd.f32 1.0, %v8491_v23 }
 0xe93   :  { %v8495_v37 = vpop.eup %8494  ;;  %8514 = vrcp.f32 %v6311_v12  ;;  %6348 = vst.msk [vmem:[%s11451_s29 + $0x180] sm:$0xff] %vm5337_vm5, %v8493_v9 }
 0xe94   :  { %v8497_v63 = vpop.eup %8496  ;;  %8516 = vrcp.f32 %v6312_v52  ;;  %6349 = vst.msk [vmem:[%s11451_s29 + $0x188] sm:$0xff] %vm5337_vm5, %v8495_v37 }
 0xe95   :  { %v8499_v7 = vpop.eup %8498  ;;  %8518 = vrcp.f32 %v6313_v47  ;;  %6350 = vst.msk [vmem:[%s11451_s29 + $0x190] sm:$0xff] %vm5337_vm5, %v8497_v63 }
 0xe96   :  { %v8501_v8 = vpop.eup %8500  ;;  %8520 = vrcp.f32 %v6314_v25  ;;  %6351 = vst.msk [vmem:[%s11451_s29 + $0x198] sm:$0xff] %vm5337_vm5, %v8499_v7 }
 0xe97   :  { %v8503_v46 = vpop.eup %8502  ;;  %8522 = vrcp.f32 %v6315_v13  ;;  %6352 = vst.msk [vmem:[%s11451_s29 + $0x1a0] sm:$0xff] %vm5337_vm5, %v8501_v8 }
 0xe98   :  { %v8505_v28 = vpop.eup %8504  ;;  %6353 = vst.msk [vmem:[%s11451_s29 + $0x1a8] sm:$0xff] %vm5337_vm5, %v8503_v46 }
 0xe99   :  { %v8507_v45 = vpop.eup %8506  ;;  %6354 = vst.msk [vmem:[%s11451_s29 + $0x1b0] sm:$0xff] %vm5337_vm5, %v8505_v28 }
 0xe9a   :  { %v8509_v24 = vpop.eup %8508  ;;  %6355 = vst.msk [vmem:[%s11451_s29 + $0x1b8] sm:$0xff] %vm5337_vm5, %v8507_v45 }
 0xe9b   :  { %v8511_v29 = vpop.eup %8510  ;;  %6356 = vst.msk [vmem:[%s11451_s29 + $0x1c0] sm:$0xff] %vm5337_vm5, %v8509_v24 }
 0xe9c   :  { %v8513_v33 = vpop.eup %8512  ;;  %6357 = vst.msk [vmem:[%s11451_s29 + $0x1c8] sm:$0xff] %vm5337_vm5, %v8511_v29 }
 0xe9d   :  { %v8515_v6 = vpop.eup %8514  ;;  %6358 = vst.msk [vmem:[%s11451_s29 + $0x1d0] sm:$0xff] %vm5337_vm5, %v8513_v33 }
 0xe9e   :  { %v8517_v35 = vpop.eup %8516  ;;  %6359 = vst.msk [vmem:[%s11451_s29 + $0x1d8] sm:$0xff] %vm5337_vm5, %v8515_v6 }
 0xe9f   :  { %v8519_v2 = vpop.eup %8518  ;;  %6360 = vst.msk [vmem:[%s11451_s29 + $0x1e0] sm:$0xff] %vm5337_vm5, %v8517_v35 }
 0xea0   :  { %v8521_v30 = vpop.eup %8520  ;;  %6361 = vst.msk [vmem:[%s11451_s29 + $0x1e8] sm:$0xff] %vm5337_vm5, %v8519_v2 }
 0xea1   :  { %v8523_v11 = vpop.eup %8522  ;;  %6362 = vst.msk [vmem:[%s11451_s29 + $0x1f0] sm:$0xff] %vm5337_vm5, %v8521_v30 }
 0xea2   :  { %6363 = vst.msk [vmem:[%s11451_s29 + $0x1f8] sm:$0xff] %vm5337_vm5, %v8523_v11 }

</bundles_post_ra>
